<compile_context>
chip_gen: v5e
topology: v5e:2x2
jax: 0.10.0
libtpu: 0.0.40
codegen_flags: <defaults>
</compile_context>

<pallas_src>
import functools

import jax
import jax.numpy as jnp
from jax import lax
from jax.experimental import pallas as pl
from jax.experimental.pallas import tpu as pltpu
import numpy as np

EPS = 1e-5
LANE = 128
MXU_DTYPE = jnp.bfloat16            # MXU operand dtype (accumulation stays f32)
VMEM_LIMIT = 32 * 1024 * 1024


def _round_up(x, m):
    return (x + m - 1) // m * m


def _pick_row_tile(m, target=256):
    """Largest divisor of m that is a multiple of 8 and <= target (fallback: m)."""
    for cand in range(min(target, m), 7, -1):
        if m % cand == 0 and cand % 8 == 0:
            return cand
    return m


# --------------------------------------------------------------------------- #
# Kernel 1: per-channel sum / sum-of-squares partials (tiled -> bn1 stats).    #
# --------------------------------------------------------------------------- #

def _channel_stats_kernel(x_ref, stats_ref):
    x = x_ref[...].astype(jnp.float32)
    stats_ref[0, 0:1, :] = jnp.sum(x, axis=0, keepdims=True)
    stats_ref[0, 1:2, :] = jnp.sum(x * x, axis=0, keepdims=True)


def channel_stats_pallas(x_flat):
    """x_flat: (M, C) -> (2, C) = [per-channel sum ; per-channel sum of squares]."""
    m, c = x_flat.shape
    tm = _pick_row_tile(m)
    nt = m // tm
    partials = pl.pallas_call(
        _channel_stats_kernel,
        out_shape=jax.ShapeDtypeStruct((nt, 2, c), jnp.float32),
        grid=(nt,),
        in_specs=[pl.BlockSpec((tm, c), lambda i: (i, 0))],
        out_specs=pl.BlockSpec((1, 2, c), lambda i: (i, 0, 0)),
        compiler_params=pltpu.CompilerParams(
            dimension_semantics=("parallel",),    # disjoint output blocks per step
            vmem_limit_bytes=VMEM_LIMIT),
    )(x_flat)
    # Tiny cross-tile reduction left to XLA (keeps the Pallas grid fully parallel).
    return jnp.sum(partials, axis=0)


# --------------------------------------------------------------------------- #
# Kernel 2: fused [BN affine + ReLU] -> 3x3 conv (9-tap MXU accumulation)      #
#           (+ fused 1x1 shortcut, + fused residual add, + fused bn2 stats).   #
# --------------------------------------------------------------------------- #

def _make_conv_kernel(*, stride, H, W, Ho, Wo, Hph, Wph,
                      has_sc_conv, emit_sc, has_residual, emit_stats, pad_output):
    s = stride

    def kernel(*refs):
        it = iter(refs)
        phases_ref = next(it)                            # (1, s*s, Hph, Wph, Cin_p)
        scale_ref = next(it)                             # (1, Cin_p)
        shift_ref = next(it)                             # (1, Cin_p)
        w_ref = next(it)                                 # (9, Cin_p, Cout_p) bf16, VMEM-resident
        wsc_ref = next(it) if has_sc_conv else None      # (Cin_p, Cout_p)
        res_ref = next(it) if has_residual else None     # (1, Ho, Wo, Cout_p)
        out_ref = next(it)
        sc_ref = next(it) if emit_sc else None
        stats_ref = next(it) if emit_stats else None     # (1, 2, Cout_p)
        act_ref = next(it)                               # VMEM scratch (s*s, Hph, Wph, Cin_p) f32
        acc_ref = next(it)                               # VMEM scratch (Ho*Wo, Cout_p) f32

        scale = scale_ref[...]
        shift = shift_ref[...]

        # ---- fused BN affine + ReLU on the conv input ------------------------------
        # Only positions that came from real pixels are activated; the conv's zero-padding
        # ring stays exactly zero (padding is applied AFTER bn+relu in the module).
        # All bounds are static Python ints -> plain contiguous, lane-dense VMEM stores.
        act_ref[...] = jnp.zeros_like(act_ref)
        for p in range(s):
            for q in range(s):
                k = p * s + q
                i0 = 0 if p >= 1 else 1
                i1 = min(Hph - 1, (H - p) // s)
                j0 = 0 if q >= 1 else 1
                j1 = min(Wph - 1, (W - q) // s)
                if i0 > i1 or j0 > j1:
                    continue
                xph = phases_ref[0, k, i0:i1 + 1, j0:j1 + 1, :].astype(jnp.float32)
                act_ref[k, i0:i1 + 1, j0:j1 + 1, :] = jnp.maximum(
                    xph * scale + shift, 0.0)

        # ---- 9-tap conv: accumulate (rows, Cin) @ (Cin, Cout) on the MXU -----------
        # f32 accumulator lives in VMEM scratch (bounds vreg pressure for large tiles).
        acc_ref[...] = jnp.zeros_like(acc_ref)
        for di in range(3):
            for dj in range(3):
                k = (di % s) * s + (dj % s)
                r0, c0 = di // s, dj // s
                a_f32 = act_ref[k, r0:r0 + Ho, c0:c0 + Wo, :].reshape(Ho * Wo, -1)
                a = a_f32.astype(MXU_DTYPE)
                acc_ref[...] += jnp.dot(a, w_ref[di * 3 + dj],
                                        preferred_element_type=jnp.float32)
                if emit_sc and di == 1 and dj == 1:
                    # Shortcut reads exactly the centre tap's window; write it out right
                    # away so its value does not stay live across the remaining taps.
                    if has_sc_conv:
                        sc = jnp.dot(a, wsc_ref[...],
                                     preferred_element_type=jnp.float32)
                    else:
                        sc = a_f32                      # identity shortcut = relu(bn1(x))
                    sc_ref[0] = sc.reshape(Ho, Wo, -1).astype(sc_ref.dtype)

        acc = acc_ref[...]

        # ---- fused bn2-statistics epilogue (per-batch partial sums) ----------------
        if emit_stats:
            stats_ref[0, 0:1, :] = jnp.sum(acc, axis=0, keepdims=True)
            stats_ref[0, 1:2, :] = jnp.sum(acc * acc, axis=0, keepdims=True)

        if has_residual:
            acc = acc + res_ref[0].reshape(Ho * Wo, -1).astype(jnp.float32)

        cout_p = acc.shape[-1]
        acc3 = acc.reshape(Ho, Wo, cout_p).astype(out_ref.dtype)
        if pad_output:
            # Write the NEXT conv's zero-padding ring directly (saves a jnp.pad HBM pass).
            out_ref[...] = jnp.zeros_like(out_ref)
            out_ref[0, 1:1 + Ho, 1:1 + Wo, :] = acc3
        else:
            out_ref[0] = acc3

    return kernel


def conv3x3_fused_pallas(phases, scale, shift, w_taps, *, stride, H, W, Ho, Wo,
                         wsc=None, residual=None, emit_sc=False, emit_stats=False,
                         pad_output=False, out_dtype=jnp.float32):
    n, n_phase, hph, wph, cin_p = phases.shape
    cout_p = w_taps.shape[-1]

    kernel = _make_conv_kernel(
        stride=stride, H=H, W=W, Ho=Ho, Wo=Wo, Hph=hph, Wph=wph,
        has_sc_conv=wsc is not None, emit_sc=emit_sc,
        has_residual=residual is not None, emit_stats=emit_stats,
        pad_output=pad_output)

    inputs = [phases, scale, shift, w_taps]
    in_specs = [
        pl.BlockSpec((1, n_phase, hph, wph, cin_p), lambda b: (b, 0, 0, 0, 0)),
        pl.BlockSpec((1, cin_p), lambda b: (0, 0)),
        pl.BlockSpec((1, cin_p), lambda b: (0, 0)),
        # constant index_map -> conv weights stay VMEM-resident across the whole grid
        pl.BlockSpec((9, cin_p, cout_p), lambda b: (0, 0, 0)),
    ]
    if wsc is not None:
        inputs.append(wsc)
        in_specs.append(pl.BlockSpec((cin_p, cout_p), lambda b: (0, 0)))
    if residual is not None:
        inputs.append(residual)
        in_specs.append(pl.BlockSpec((1, Ho, Wo, cout_p), lambda b: (b, 0, 0, 0)))

    if pad_output:
        out_shapes = [jax.ShapeDtypeStruct((n, Ho + 2, Wo + 2, cout_p), out_dtype)]
        out_specs = [pl.BlockSpec((1, Ho + 2, Wo + 2, cout_p), lambda b: (b, 0, 0, 0))]
    else:
        out_shapes = [jax.ShapeDtypeStruct((n, Ho, Wo, cout_p), out_dtype)]
        out_specs = [pl.BlockSpec((1, Ho, Wo, cout_p), lambda b: (b, 0, 0, 0))]
    if emit_sc:
        sc_c = cout_p if wsc is not None else cin_p
        out_shapes.append(jax.ShapeDtypeStruct((n, Ho, Wo, sc_c), jnp.float32))
        out_specs.append(pl.BlockSpec((1, Ho, Wo, sc_c), lambda b: (b, 0, 0, 0)))
    if emit_stats:
        # Per-batch partial stats -> every grid step writes a disjoint block, so the
        # batch axis stays "parallel" (megacore) even when statistics are emitted.
        out_shapes.append(jax.ShapeDtypeStruct((n, 2, cout_p), jnp.float32))
        out_specs.append(pl.BlockSpec((1, 2, cout_p), lambda b: (b, 0, 0)))

    single = len(out_shapes) == 1
    return pl.pallas_call(
        kernel,
        out_shape=out_shapes[0] if single else tuple(out_shapes),
        grid=(n,),
        in_specs=in_specs,
        out_specs=out_specs[0] if single else tuple(out_specs),
        scratch_shapes=[pltpu.VMEM((n_phase, hph, wph, cin_p), jnp.float32),
                        pltpu.VMEM((Ho * Wo, cout_p), jnp.float32)],
        compiler_params=pltpu.CompilerParams(
            dimension_semantics=("parallel",),
            vmem_limit_bytes=VMEM_LIMIT),
    )(*inputs)


# --------------------------------------------------------------------------- #
# Plain-JAX glue: layout transforms + tiny per-channel math.                   #
# --------------------------------------------------------------------------- #

def _pad_last(a, target):
    c = a.shape[-1]
    if c == target:
        return a
    return jnp.pad(a, [(0, 0)] * (a.ndim - 1) + [(0, target - c)])


def _conv_weight_taps(w, cin_p, cout_p):
    """(Cout, Cin, 3, 3) -> (9, cin_p, cout_p) in MXU dtype; tap index = 3*di + dj."""
    co, ci, kh, kw = w.shape
    wt = jnp.transpose(w, (2, 3, 1, 0)).reshape(kh * kw, ci, co)
    wt = jnp.pad(wt, ((0, 0), (0, cin_p - ci), (0, cout_p - co)))
    return wt.astype(MXU_DTYPE)


def _phase_decompose(x_pad, stride, Ho, Wo):
    """Rearrange a spatially padded NHWC tensor into stride*stride stride-1 'phases'.

    Tap (di, dj) of the 3x3/stride-s conv then reads the static contiguous window
    phases[:, (di % s)*s + (dj % s), di//s : di//s + Ho, dj//s : dj//s + Wo, :].
    Layout-only (roughly 1x the padded input), unlike im2col's 9x blow-up.
    """
    s = stride
    # Tap offsets di in {0,1,2} need rows di//s .. di//s + Ho - 1 -> Ho + (2 // s) rows.
    hph = Ho + (2 // s)
    wph = Wo + (2 // s)
    out = []
    for p in range(s):
        for q in range(s):
            ph = x_pad[:, p::s, q::s, :][:, :hph, :wph, :]
            pad_h, pad_w = hph - ph.shape[1], wph - ph.shape[2]
            if pad_h or pad_w:
                ph = jnp.pad(ph, ((0, 0), (0, pad_h), (0, pad_w), (0, 0)))
            out.append(ph)
    return jnp.stack(out, axis=1)


def _bn_affine_from_stats(stats, gamma, beta, count, c_pad):
    """Training-mode BN (batch mean, biased variance) as a per-channel scale/shift."""
    c = gamma.shape[0]
    mean = stats[0, :c] / count
    var = stats[1, :c] / count - mean * mean
    scale = gamma / jnp.sqrt(var + EPS)
    shift = beta - mean * scale
    scale = _pad_last(scale.reshape(1, c), c_pad)
    shift = _pad_last(shift.reshape(1, c), c_pad)
    return scale.astype(jnp.float32), shift.astype(jnp.float32)


# --------------------------------------------------------------------------- #
# PreActBlock forward.                                                          #
# --------------------------------------------------------------------------- #

@functools.partial(jax.jit, static_argnums=(2,))
def preact_block_forward(x_nchw, params, stride):
    n, cin, h, w = x_nchw.shape
    cout = params['conv1_w'].shape[0]
    s = stride
    ho, wo = (h - 1) // s + 1, (w - 1) // s + 1
    cin_p, cout_p = _round_up(cin, LANE), _round_up(cout, LANE)
    has_sc_conv = (s != 1) or (cin != cout)

    # NCHW -> NHWC, lane-dense channel padding.
    x = jnp.transpose(x_nchw, (0, 2, 3, 1)).astype(jnp.float32)
    x = _pad_last(x, cin_p)                                     # (n, h, w, cin_p)

    # bn1 batch statistics (tiled Pallas partial reduction) -> per-channel affine.
    stats1 = channel_stats_pallas(x.reshape(n * h * w, cin_p))
    scale1, shift1 = _bn_affine_from_stats(stats1, params['bn1_gamma'],
                                           params['bn1_beta'], n * h * w, cin_p)

    # Spatial pad + phase decomposition (layout-only; no im2col blow-up).
    x_pad = jnp.pad(x, ((0, 0), (1, 1), (1, 1), (0, 0)))
    phases1 = _phase_decompose(x_pad, s, ho, wo)                # (n, s*s, ., ., cin_p)

    w1 = _conv_weight_taps(params['conv1_w'], cin_p, cout_p)
    w2 = _conv_weight_taps(params['conv2_w'], cout_p, cout_p)
    wsc = None
    if has_sc_conv:
        wsc = jnp.pad(params['sc_w'][:, :, 0, 0].T,
                      ((0, cin_p - cin), (0, cout_p - cout))).astype(MXU_DTYPE)

    # conv1: fused bn1 affine+ReLU on input, 9-tap MXU conv, 1x1 shortcut on the centre
    # tap, bn2 sum/sum-sq epilogue; output already carries conv2's zero-padding ring.
    o1_pad, shortcut, stats2_part = conv3x3_fused_pallas(
        phases1, scale1, shift1, w1, stride=s, H=h, W=w, Ho=ho, Wo=wo,
        wsc=wsc, emit_sc=True, emit_stats=True, pad_output=True,
        out_dtype=jnp.float32)
    stats2 = jnp.sum(stats2_part, axis=0)                       # (2, cout_p)

    scale2, shift2 = _bn_affine_from_stats(stats2, params['bn2_gamma'],
                                           params['bn2_beta'], n * ho * wo, cout_p)

    # conv2: stride 1; fused bn2 affine+ReLU on input and fused residual add.
    phases2 = o1_pad.reshape(n, 1, ho + 2, wo + 2, cout_p)
    out = conv3x3_fused_pallas(
        phases2, scale2, shift2, w2, stride=1, H=ho, W=wo, Ho=ho, Wo=wo,
        residual=shortcut, emit_sc=False, emit_stats=False, pad_output=False,
        out_dtype=jnp.float32)

    out = out[..., :cout]                                       # drop channel padding
    return jnp.transpose(out, (0, 3, 1, 2))                     # NHWC -> NCHW


# --------------------------------------------------------------------------- #
# Pure-JAX reference (module semantics: training-mode BatchNorm).               #
# --------------------------------------------------------------------------- #

def _ref_bn(x, gamma, beta):
    mean = jnp.mean(x, axis=(0, 2, 3), keepdims=True)
    var = jnp.mean((x - mean) ** 2, axis=(0, 2, 3), keepdims=True)
    return gamma[None, :, None, None] * (x - mean) / jnp.sqrt(var + EPS) \
        + beta[None, :, None, None]


def preact_block_ref(x, params, stride):
    dn = ('NCHW', 'OIHW', 'NCHW')
    out = jax.nn.relu(_ref_bn(x, params['bn1_gamma'], params['bn1_beta']))
    if stride != 1 or x.shape[1] != params['conv1_w'].shape[0]:
        shortcut = lax.conv_general_dilated(out, params['sc_w'], (stride, stride),
                                            'VALID', dimension_numbers=dn)
    else:
        shortcut = out                      # spec: shortcut = nn.Sequential()(out)
    o = lax.conv_general_dilated(out, params['conv1_w'], (stride, stride),
                                 ((1, 1), (1, 1)), dimension_numbers=dn)
    o = jax.nn.relu(_ref_bn(o, params['bn2_gamma'], params['bn2_beta']))
    o = lax.conv_general_dilated(o, params['conv2_w'], (1, 1),
                                 ((1, 1), (1, 1)), dimension_numbers=dn)
    return o + shortcut


# --------------------------------------------------------------------------- #
# Main.                                                                         #
# --------------------------------------------------------------------------- #

if __name__ == "__main__":
    k = jax.random.split(jax.random.PRNGKey(0), 16)

    # --- case 1: projection shortcut (stride 2, 4 -> 8 channels) ---
    in_planes, out_planes, stride = 4, 8, 2
    x = jax.random.normal(k[0], (2, in_planes, 16, 16), dtype=jnp.float32)
    params = {
        'bn1_gamma': 1.0 + 0.1 * jax.random.normal(k[1], (in_planes,), jnp.float32),
        'bn1_beta': 0.1 * jax.random.normal(k[2], (in_planes,), jnp.float32),
        'conv1_w': 0.1 * jax.random.normal(k[3], (out_planes, in_planes, 3, 3), jnp.float32),
        'bn2_gamma': 1.0 + 0.1 * jax.random.normal(k[4], (out_planes,), jnp.float32),
        'bn2_beta': 0.1 * jax.random.normal(k[5], (out_planes,), jnp.float32),
        'conv2_w': 0.1 * jax.random.normal(k[6], (out_planes, out_planes, 3, 3), jnp.float32),
        'sc_w': 0.1 * jax.random.normal(k[7], (out_planes, in_planes, 1, 1), jnp.float32),
    }
    y = jax.block_until_ready(preact_block_forward(x, params, stride))
    y_ref = jax.block_until_ready(preact_block_ref(x, params, stride))
    np.testing.assert_allclose(np.asarray(y), np.asarray(y_ref), rtol=5e-2, atol=5e-2)
    assert y.shape == (2, out_planes, 8, 8)

    # --- case 2: identity shortcut (stride 1, 8 -> 8 channels) ---
    planes = 8
    x2 = jax.random.normal(k[8], (2, planes, 8, 8), dtype=jnp.float32)
    params2 = {
        'bn1_gamma': 1.0 + 0.1 * jax.random.normal(k[9], (planes,), jnp.float32),
        'bn1_beta': 0.1 * jax.random.normal(k[10], (planes,), jnp.float32),
        'conv1_w': 0.1 * jax.random.normal(k[11], (planes, planes, 3, 3), jnp.float32),
        'bn2_gamma': 1.0 + 0.1 * jax.random.normal(k[12], (planes,), jnp.float32),
        'bn2_beta': 0.1 * jax.random.normal(k[13], (planes,), jnp.float32),
        'conv2_w': 0.1 * jax.random.normal(k[14], (planes, planes, 3, 3), jnp.float32),
    }
    y2 = jax.block_until_ready(preact_block_forward(x2, params2, 1))
    y2_ref = jax.block_until_ready(preact_block_ref(x2, params2, 1))
    np.testing.assert_allclose(np.asarray(y2), np.asarray(y2_ref), rtol=5e-2, atol=5e-2)
    assert y2.shape == (2, planes, 8, 8)

    print("KERNEL_OK")
</pallas_src>

<mosaic_0001>
module attributes {stable_mosaic.version = 11 : i64} {
  func.func @_channel_stats_kernel(%arg0: i32, %arg1: memref<256x128xf32, #tpu.memory_space<vmem>>, %arg2: memref<1x2x128xf32, #tpu.memory_space<vmem>>) attributes {dimension_semantics = [#tpu.dimension_semantics<parallel>], iteration_bounds = array<i64: 2>, scalar_prefetch = 0 : i64, scratch_operands = 0 : i64, tpu.core_type = #tpu.core_type<tc>, window_params = [{transform_indices = @transform_0, window_bounds = array<i64: 256, 128>}, {transform_indices = @transform_1, window_bounds = array<i64: 1, 2, 128>}]} {
    %c0 = arith.constant 0 : index
    %c0_0 = arith.constant 0 : index
    %0 = vector.load %arg1[%c0, %c0_0] : memref<256x128xf32, #tpu.memory_space<vmem>>, vector<256x128xf32>
    %cst = arith.constant dense<0.000000e+00> : vector<128xf32>
    %1 = vector.multi_reduction <add>, %0, %cst [0] : vector<256x128xf32> to vector<128xf32>
    %2 = vector.shape_cast %1 : vector<128xf32> to vector<1x128xf32>
    %c0_1 = arith.constant 0 : index
    %c0_2 = arith.constant 0 : index
    %c0_3 = arith.constant 0 : index
    %3 = vector.load %arg2[%c0_1, %c0_2, %c0_3] : memref<1x2x128xf32, #tpu.memory_space<vmem>>, vector<1x1x128xf32>
    %4 = vector.shape_cast %3 : vector<1x1x128xf32> to vector<1x128xf32>
    %5 = vector.shape_cast %2 : vector<1x128xf32> to vector<1x1x128xf32>
    tpu.vector_store %arg2[%c0_1, %c0_2, %c0_3], %5 {strides = array<i32>} : memref<1x2x128xf32, #tpu.memory_space<vmem>>, vector<1x1x128xf32>,
    %6 = arith.mulf %0, %0 : vector<256x128xf32>
    %cst_4 = arith.constant dense<0.000000e+00> : vector<128xf32>
    %7 = vector.multi_reduction <add>, %6, %cst_4 [0] : vector<256x128xf32> to vector<128xf32>
    %8 = vector.shape_cast %7 : vector<128xf32> to vector<1x128xf32>
    %c0_5 = arith.constant 0 : index
    %c1 = arith.constant 1 : index
    %c0_6 = arith.constant 0 : index
    %9 = vector.load %arg2[%c0_5, %c1, %c0_6] : memref<1x2x128xf32, #tpu.memory_space<vmem>>, vector<1x1x128xf32>
    %10 = vector.shape_cast %9 : vector<1x1x128xf32> to vector<1x128xf32>
    %11 = vector.shape_cast %8 : vector<1x128xf32> to vector<1x1x128xf32>
    tpu.vector_store %arg2[%c0_5, %c1, %c0_6], %11 {strides = array<i32>} : memref<1x2x128xf32, #tpu.memory_space<vmem>>, vector<1x1x128xf32>,
    return
  }
  func.func @transform_0(%arg0: i32) -> (i32, i32) {
    %c0_i32 = arith.constant 0 : i32
    %c0_i32_0 = arith.constant 0 : i32
    return %arg0, %c0_i32 : i32, i32
  }
  func.func @transform_1(%arg0: i32) -> (i32, i32, i32) {
    %c0_i32 = arith.constant 0 : i32
    %c0_i32_0 = arith.constant 0 : i32
    %c0_i32_1 = arith.constant 0 : i32
    return %arg0, %c0_i32, %c0_i32_0 : i32, i32, i32
  }
}

module attributes {stable_mosaic.version = 11 : i64} {
  func.func @kernel(%arg0: i32, %arg1: memref<1x4x9x9x128xf32, #tpu.memory_space<vmem>>, %arg2: memref<1x128xf32, #tpu.memory_space<vmem>>, %arg3: memref<1x128xf32, #tpu.memory_space<vmem>>, %arg4: memref<9x128x128xbf16, #tpu.memory_space<vmem>>, %arg5: memref<128x128xbf16, #tpu.memory_space<vmem>>, %arg6: memref<1x10x10x128xf32, #tpu.memory_space<vmem>>, %arg7: memref<1x8x8x128xf32, #tpu.memory_space<vmem>>, %arg8: memref<1x2x128xf32, #tpu.memory_space<vmem>>, %arg9: memref<4x9x9x128xf32, #tpu.memory_space<vmem>>, %arg10: memref<64x128xf32, #tpu.memory_space<vmem>>) attributes {dimension_semantics = [#tpu.dimension_semantics<parallel>], iteration_bounds = array<i64: 2>, scalar_prefetch = 0 : i64, scratch_operands = 2 : i64, tpu.core_type = #tpu.core_type<tc>, window_params = [{transform_indices = @transform_0, window_bounds = array<i64: 1, 4, 9, 9, 128>}, {pipeline_mode = #tpu.pipeline_mode<synchronous>, transform_indices = @transform_1, window_bounds = array<i64: 1, 128>}, {pipeline_mode = #tpu.pipeline_mode<synchronous>, transform_indices = @transform_2, window_bounds = array<i64: 1, 128>}, {pipeline_mode = #tpu.pipeline_mode<synchronous>, transform_indices = @transform_3, window_bounds = array<i64: 9, 128, 128>}, {pipeline_mode = #tpu.pipeline_mode<synchronous>, transform_indices = @transform_4, window_bounds = array<i64: 128, 128>}, {transform_indices = @transform_5, window_bounds = array<i64: 1, 10, 10, 128>}, {transform_indices = @transform_6, window_bounds = array<i64: 1, 8, 8, 128>}, {transform_indices = @transform_7, window_bounds = array<i64: 1, 2, 128>}]} {
    %c0 = arith.constant 0 : index
    %c0_0 = arith.constant 0 : index
    %0 = vector.load %arg2[%c0, %c0_0] : memref<1x128xf32, #tpu.memory_space<vmem>>, vector<1x128xf32>
    %c0_1 = arith.constant 0 : index
    %c0_2 = arith.constant 0 : index
    %1 = vector.load %arg3[%c0_1, %c0_2] : memref<1x128xf32, #tpu.memory_space<vmem>>, vector<1x128xf32>
    %cst = arith.constant 0.000000e+00 : f32
    %2 = vector.broadcast %cst : f32 to vector<4x9x9x128xf32>
    %c0_3 = arith.constant 0 : index
    %c0_4 = arith.constant 0 : index
    %c0_5 = arith.constant 0 : index
    %c0_6 = arith.constant 0 : index
    %3 = vector.load %arg9[%c0_3, %c0_4, %c0_5, %c0_6] : memref<4x9x9x128xf32, #tpu.memory_space<vmem>>, vector<4x9x9x128xf32>
    tpu.vector_store %arg9[%c0_3, %c0_4, %c0_5, %c0_6], %2 {strides = array<i32>} : memref<4x9x9x128xf32, #tpu.memory_space<vmem>>, vector<4x9x9x128xf32>,
    %c0_7 = arith.constant 0 : index
    %c0_8 = arith.constant 0 : index
    %c1 = arith.constant 1 : index
    %c1_9 = arith.constant 1 : index
    %c0_10 = arith.constant 0 : index
    %4 = vector.load %arg1[%c0_7, %c0_8, %c1, %c1_9, %c0_10] : memref<1x4x9x9x128xf32, #tpu.memory_space<vmem>>, vector<1x1x8x8x128xf32>
    %5 = vector.shape_cast %4 : vector<1x1x8x8x128xf32> to vector<8x8x128xf32>
    %6 = vector.shape_cast %0 : vector<1x128xf32> to vector<1x1x128xf32>
    %7 = vector.broadcast %6 : vector<1x1x128xf32> to vector<8x8x128xf32>
    %8 = arith.mulf %5, %7 : vector<8x8x128xf32>
    %9 = vector.shape_cast %1 : vector<1x128xf32> to vector<1x1x128xf32>
    %10 = vector.broadcast %9 : vector<1x1x128xf32> to vector<8x8x128xf32>
    %11 = arith.addf %8, %10 : vector<8x8x128xf32>
    %cst_11 = arith.constant 0.000000e+00 : f32
    %12 = vector.broadcast %cst_11 : f32 to vector<8x8x128xf32>
    %13 = arith.maximumf %11, %12 : vector<8x8x128xf32>
    %c0_12 = arith.constant 0 : index
    %c1_13 = arith.constant 1 : index
    %c1_14 = arith.constant 1 : index
    %c0_15 = arith.constant 0 : index
    %14 = vector.load %arg9[%c0_12, %c1_13, %c1_14, %c0_15] : memref<4x9x9x128xf32, #tpu.memory_space<vmem>>, vector<1x8x8x128xf32>
    %15 = vector.shape_cast %14 : vector<1x8x8x128xf32> to vector<8x8x128xf32>
    %16 = vector.shape_cast %13 : vector<8x8x128xf32> to vector<1x8x8x128xf32>
    tpu.vector_store %arg9[%c0_12, %c1_13, %c1_14, %c0_15], %16 {strides = array<i32>} : memref<4x9x9x128xf32, #tpu.memory_space<vmem>>, vector<1x8x8x128xf32>,
    %c0_16 = arith.constant 0 : index
    %c1_17 = arith.constant 1 : index
    %c1_18 = arith.constant 1 : index
    %c0_19 = arith.constant 0 : index
    %c0_20 = arith.constant 0 : index
    %17 = vector.load %arg1[%c0_16, %c1_17, %c1_18, %c0_19, %c0_20] : memref<1x4x9x9x128xf32, #tpu.memory_space<vmem>>, vector<1x1x8x8x128xf32>
    %18 = vector.shape_cast %17 : vector<1x1x8x8x128xf32> to vector<8x8x128xf32>
    %19 = vector.shape_cast %0 : vector<1x128xf32> to vector<1x1x128xf32>
    %20 = vector.broadcast %19 : vector<1x1x128xf32> to vector<8x8x128xf32>
    %21 = arith.mulf %18, %20 : vector<8x8x128xf32>
    %22 = vector.shape_cast %1 : vector<1x128xf32> to vector<1x1x128xf32>
    %23 = vector.broadcast %22 : vector<1x1x128xf32> to vector<8x8x128xf32>
    %24 = arith.addf %21, %23 : vector<8x8x128xf32>
    %cst_21 = arith.constant 0.000000e+00 : f32
    %25 = vector.broadcast %cst_21 : f32 to vector<8x8x128xf32>
    %26 = arith.maximumf %24, %25 : vector<8x8x128xf32>
    %c1_22 = arith.constant 1 : index
    %c1_23 = arith.constant 1 : index
    %c0_24 = arith.constant 0 : index
    %c0_25 = arith.constant 0 : index
    %27 = vector.load %arg9[%c1_22, %c1_23, %c0_24, %c0_25] : memref<4x9x9x128xf32, #tpu.memory_space<vmem>>, vector<1x8x8x128xf32>
    %28 = vector.shape_cast %27 : vector<1x8x8x128xf32> to vector<8x8x128xf32>
    %29 = vector.shape_cast %26 : vector<8x8x128xf32> to vector<1x8x8x128xf32>
    tpu.vector_store %arg9[%c1_22, %c1_23, %c0_24, %c0_25], %29 {strides = array<i32>} : memref<4x9x9x128xf32, #tpu.memory_space<vmem>>, vector<1x8x8x128xf32>,
    %c0_26 = arith.constant 0 : index
    %c2 = arith.constant 2 : index
    %c0_27 = arith.constant 0 : index
    %c1_28 = arith.constant 1 : index
    %c0_29 = arith.constant 0 : index
    %30 = vector.load %arg1[%c0_26, %c2, %c0_27, %c1_28, %c0_29] : memref<1x4x9x9x128xf32, #tpu.memory_space<vmem>>, vector<1x1x8x8x128xf32>
    %31 = vector.shape_cast %30 : vector<1x1x8x8x128xf32> to vector<8x8x128xf32>
    %32 = vector.shape_cast %0 : vector<1x128xf32> to vector<1x1x128xf32>
    %33 = vector.broadcast %32 : vector<1x1x128xf32> to vector<8x8x128xf32>
    %34 = arith.mulf %31, %33 : vector<8x8x128xf32>
    %35 = vector.shape_cast %1 : vector<1x128xf32> to vector<1x1x128xf32>
    %36 = vector.broadcast %35 : vector<1x1x128xf32> to vector<8x8x128xf32>
    %37 = arith.addf %34, %36 : vector<8x8x128xf32>
    %cst_30 = arith.constant 0.000000e+00 : f32
    %38 = vector.broadcast %cst_30 : f32 to vector<8x8x128xf32>
    %39 = arith.maximumf %37, %38 : vector<8x8x128xf32>
    %c2_31 = arith.constant 2 : index
    %c0_32 = arith.constant 0 : index
    %c1_33 = arith.constant 1 : index
    %c0_34 = arith.constant 0 : index
    %40 = vector.load %arg9[%c2_31, %c0_32, %c1_33, %c0_34] : memref<4x9x9x128xf32, #tpu.memory_space<vmem>>, vector<1x8x8x128xf32>
    %41 = vector.shape_cast %40 : vector<1x8x8x128xf32> to vector<8x8x128xf32>
    %42 = vector.shape_cast %39 : vector<8x8x128xf32> to vector<1x8x8x128xf32>
    tpu.vector_store %arg9[%c2_31, %c0_32, %c1_33, %c0_34], %42 {strides = array<i32>} : memref<4x9x9x128xf32, #tpu.memory_space<vmem>>, vector<1x8x8x128xf32>,
    %c0_35 = arith.constant 0 : index
    %c3 = arith.constant 3 : index
    %c0_36 = arith.constant 0 : index
    %c0_37 = arith.constant 0 : index
    %c0_38 = arith.constant 0 : index
    %43 = vector.load %arg1[%c0_35, %c3, %c0_36, %c0_37, %c0_38] : memref<1x4x9x9x128xf32, #tpu.memory_space<vmem>>, vector<1x1x8x8x128xf32>
    %44 = vector.shape_cast %43 : vector<1x1x8x8x128xf32> to vector<8x8x128xf32>
    %45 = vector.shape_cast %0 : vector<1x128xf32> to vector<1x1x128xf32>
    %46 = vector.broadcast %45 : vector<1x1x128xf32> to vector<8x8x128xf32>
    %47 = arith.mulf %44, %46 : vector<8x8x128xf32>
    %48 = vector.shape_cast %1 : vector<1x128xf32> to vector<1x1x128xf32>
    %49 = vector.broadcast %48 : vector<1x1x128xf32> to vector<8x8x128xf32>
    %50 = arith.addf %47, %49 : vector<8x8x128xf32>
    %cst_39 = arith.constant 0.000000e+00 : f32
    %51 = vector.broadcast %cst_39 : f32 to vector<8x8x128xf32>
    %52 = arith.maximumf %50, %51 : vector<8x8x128xf32>
    %c3_40 = arith.constant 3 : index
    %c0_41 = arith.constant 0 : index
    %c0_42 = arith.constant 0 : index
    %c0_43 = arith.constant 0 : index
    %53 = vector.load %arg9[%c3_40, %c0_41, %c0_42, %c0_43] : memref<4x9x9x128xf32, #tpu.memory_space<vmem>>, vector<1x8x8x128xf32>
    %54 = vector.shape_cast %53 : vector<1x8x8x128xf32> to vector<8x8x128xf32>
    %55 = vector.shape_cast %52 : vector<8x8x128xf32> to vector<1x8x8x128xf32>
    tpu.vector_store %arg9[%c3_40, %c0_41, %c0_42, %c0_43], %55 {strides = array<i32>} : memref<4x9x9x128xf32, #tpu.memory_space<vmem>>, vector<1x8x8x128xf32>,
    %cst_44 = arith.constant 0.000000e+00 : f32
    %56 = vector.broadcast %cst_44 : f32 to vector<64x128xf32>
    %c0_45 = arith.constant 0 : index
    %c0_46 = arith.constant 0 : index
    %57 = vector.load %arg10[%c0_45, %c0_46] : memref<64x128xf32, #tpu.memory_space<vmem>>, vector<64x128xf32>
    tpu.vector_store %arg10[%c0_45, %c0_46], %56 {strides = array<i32>} : memref<64x128xf32, #tpu.memory_space<vmem>>, vector<64x128xf32>,
    %c0_47 = arith.constant 0 : index
    %c0_48 = arith.constant 0 : index
    %c0_49 = arith.constant 0 : index
    %c0_50 = arith.constant 0 : index
    %58 = vector.load %arg9[%c0_47, %c0_48, %c0_49, %c0_50] : memref<4x9x9x128xf32, #tpu.memory_space<vmem>>, vector<1x8x8x128xf32>
    %59 = vector.shape_cast %58 : vector<1x8x8x128xf32> to vector<8x8x128xf32>
    %60 = vector.shape_cast %59 : vector<8x8x128xf32> to vector<64x128xf32>
    %61 = arith.truncf %60 : vector<64x128xf32> to vector<64x128xbf16>
    %c0_51 = arith.constant 0 : index
    %c0_52 = arith.constant 0 : index
    %62 = vector.load %arg10[%c0_51, %c0_52] : memref<64x128xf32, #tpu.memory_space<vmem>>, vector<64x128xf32>
    %c0_53 = arith.constant 0 : index
    %c0_54 = arith.constant 0 : index
    %c0_55 = arith.constant 0 : index
    %63 = vector.load %arg4[%c0_53, %c0_54, %c0_55] : memref<9x128x128xbf16, #tpu.memory_space<vmem>>, vector<1x128x128xbf16>
    %64 = vector.shape_cast %63 : vector<1x128x128xbf16> to vector<128x128xbf16>
    %cst_56 = arith.constant dense<0.000000e+00> : vector<64x128xf32>
    %65 = tpu.matmul %61, %64, %cst_56 {dimension_numbers = #tpu.dot_dimension_numbers<[1], [0], [0], [1], [0, 0, 1, 1], [], []>} : vector<64x128xbf16>, vector<128x128xbf16>, vector<64x128xf32> -> vector<64x128xf32>
    %66 = arith.addf %62, %65 : vector<64x128xf32>
    %c0_57 = arith.constant 0 : index
    %c0_58 = arith.constant 0 : index
    %67 = vector.load %arg10[%c0_57, %c0_58] : memref<64x128xf32, #tpu.memory_space<vmem>>, vector<64x128xf32>
    tpu.vector_store %arg10[%c0_57, %c0_58], %66 {strides = array<i32>} : memref<64x128xf32, #tpu.memory_space<vmem>>, vector<64x128xf32>,
    %c1_59 = arith.constant 1 : index
    %c0_60 = arith.constant 0 : index
    %c0_61 = arith.constant 0 : index
    %c0_62 = arith.constant 0 : index
    %68 = vector.load %arg9[%c1_59, %c0_60, %c0_61, %c0_62] : memref<4x9x9x128xf32, #tpu.memory_space<vmem>>, vector<1x8x8x128xf32>
    %69 = vector.shape_cast %68 : vector<1x8x8x128xf32> to vector<8x8x128xf32>
    %70 = vector.shape_cast %69 : vector<8x8x128xf32> to vector<64x128xf32>
    %71 = arith.truncf %70 : vector<64x128xf32> to vector<64x128xbf16>
    %c0_63 = arith.constant 0 : index
    %c0_64 = arith.constant 0 : index
    %72 = vector.load %arg10[%c0_63, %c0_64] : memref<64x128xf32, #tpu.memory_space<vmem>>, vector<64x128xf32>
    %c1_65 = arith.constant 1 : index
    %c0_66 = arith.constant 0 : index
    %c0_67 = arith.constant 0 : index
    %73 = vector.load %arg4[%c1_65, %c0_66, %c0_67] : memref<9x128x128xbf16, #tpu.memory_space<vmem>>, vector<1x128x128xbf16>
    %74 = vector.shape_cast %73 : vector<1x128x128xbf16> to vector<128x128xbf16>
    %cst_68 = arith.constant dense<0.000000e+00> : vector<64x128xf32>
    %75 = tpu.matmul %71, %74, %cst_68 {dimension_numbers = #tpu.dot_dimension_numbers<[1], [0], [0], [1], [0, 0, 1, 1], [], []>} : vector<64x128xbf16>, vector<128x128xbf16>, vector<64x128xf32> -> vector<64x128xf32>
    %76 = arith.addf %72, %75 : vector<64x128xf32>
    %c0_69 = arith.constant 0 : index
    %c0_70 = arith.constant 0 : index
    %77 = vector.load %arg10[%c0_69, %c0_70] : memref<64x128xf32, #tpu.memory_space<vmem>>, vector<64x128xf32>
    tpu.vector_store %arg10[%c0_69, %c0_70], %76 {strides = array<i32>} : memref<64x128xf32, #tpu.memory_space<vmem>>, vector<64x128xf32>,
    %c0_71 = arith.constant 0 : index
    %c0_72 = arith.constant 0 : index
    %c1_73 = arith.constant 1 : index
    %c0_74 = arith.constant 0 : index
    %78 = vector.load %arg9[%c0_71, %c0_72, %c1_73, %c0_74] : memref<4x9x9x128xf32, #tpu.memory_space<vmem>>, vector<1x8x8x128xf32>
    %79 = vector.shape_cast %78 : vector<1x8x8x128xf32> to vector<8x8x128xf32>
    %80 = vector.shape_cast %79 : vector<8x8x128xf32> to vector<64x128xf32>
    %81 = arith.truncf %80 : vector<64x128xf32> to vector<64x128xbf16>
    %c0_75 = arith.constant 0 : index
    %c0_76 = arith.constant 0 : index
    %82 = vector.load %arg10[%c0_75, %c0_76] : memref<64x128xf32, #tpu.memory_space<vmem>>, vector<64x128xf32>
    %c2_77 = arith.constant 2 : index
    %c0_78 = arith.constant 0 : index
    %c0_79 = arith.constant 0 : index
    %83 = vector.load %arg4[%c2_77, %c0_78, %c0_79] : memref<9x128x128xbf16, #tpu.memory_space<vmem>>, vector<1x128x128xbf16>
    %84 = vector.shape_cast %83 : vector<1x128x128xbf16> to vector<128x128xbf16>
    %cst_80 = arith.constant dense<0.000000e+00> : vector<64x128xf32>
    %85 = tpu.matmul %81, %84, %cst_80 {dimension_numbers = #tpu.dot_dimension_numbers<[1], [0], [0], [1], [0, 0, 1, 1], [], []>} : vector<64x128xbf16>, vector<128x128xbf16>, vector<64x128xf32> -> vector<64x128xf32>
    %86 = arith.addf %82, %85 : vector<64x128xf32>
    %c0_81 = arith.constant 0 : index
    %c0_82 = arith.constant 0 : index
    %87 = vector.load %arg10[%c0_81, %c0_82] : memref<64x128xf32, #tpu.memory_space<vmem>>, vector<64x128xf32>
    tpu.vector_store %arg10[%c0_81, %c0_82], %86 {strides = array<i32>} : memref<64x128xf32, #tpu.memory_space<vmem>>, vector<64x128xf32>,
    %c2_83 = arith.constant 2 : index
    %c0_84 = arith.constant 0 : index
    %c0_85 = arith.constant 0 : index
    %c0_86 = arith.constant 0 : index
    %88 = vector.load %arg9[%c2_83, %c0_84, %c0_85, %c0_86] : memref<4x9x9x128xf32, #tpu.memory_space<vmem>>, vector<1x8x8x128xf32>
    %89 = vector.shape_cast %88 : vector<1x8x8x128xf32> to vector<8x8x128xf32>
    %90 = vector.shape_cast %89 : vector<8x8x128xf32> to vector<64x128xf32>
    %91 = arith.truncf %90 : vector<64x128xf32> to vector<64x128xbf16>
    %c0_87 = arith.constant 0 : index
    %c0_88 = arith.constant 0 : index
    %92 = vector.load %arg10[%c0_87, %c0_88] : memref<64x128xf32, #tpu.memory_space<vmem>>, vector<64x128xf32>
    %c3_89 = arith.constant 3 : index
    %c0_90 = arith.constant 0 : index
    %c0_91 = arith.constant 0 : index
    %93 = vector.load %arg4[%c3_89, %c0_90, %c0_91] : memref<9x128x128xbf16, #tpu.memory_space<vmem>>, vector<1x128x128xbf16>
    %94 = vector.shape_cast %93 : vector<1x128x128xbf16> to vector<128x128xbf16>
    %cst_92 = arith.constant dense<0.000000e+00> : vector<64x128xf32>
    %95 = tpu.matmul %91, %94, %cst_92 {dimension_numbers = #tpu.dot_dimension_numbers<[1], [0], [0], [1], [0, 0, 1, 1], [], []>} : vector<64x128xbf16>, vector<128x128xbf16>, vector<64x128xf32> -> vector<64x128xf32>
    %96 = arith.addf %92, %95 : vector<64x128xf32>
    %c0_93 = arith.constant 0 : index
    %c0_94 = arith.constant 0 : index
    %97 = vector.load %arg10[%c0_93, %c0_94] : memref<64x128xf32, #tpu.memory_space<vmem>>, vector<64x128xf32>
    tpu.vector_store %arg10[%c0_93, %c0_94], %96 {strides = array<i32>} : memref<64x128xf32, #tpu.memory_space<vmem>>, vector<64x128xf32>,
    %c3_95 = arith.constant 3 : index
    %c0_96 = arith.constant 0 : index
    %c0_97 = arith.constant 0 : index
    %c0_98 = arith.constant 0 : index
    %98 = vector.load %arg9[%c3_95, %c0_96, %c0_97, %c0_98] : memref<4x9x9x128xf32, #tpu.memory_space<vmem>>, vector<1x8x8x128xf32>
    %99 = vector.shape_cast %98 : vector<1x8x8x128xf32> to vector<8x8x128xf32>
    %100 = vector.shape_cast %99 : vector<8x8x128xf32> to vector<64x128xf32>
    %101 = arith.truncf %100 : vector<64x128xf32> to vector<64x128xbf16>
    %c0_99 = arith.constant 0 : index
    %c0_100 = arith.constant 0 : index
    %102 = vector.load %arg10[%c0_99, %c0_100] : memref<64x128xf32, #tpu.memory_space<vmem>>, vector<64x128xf32>
    %c4 = arith.constant 4 : index
    %c0_101 = arith.constant 0 : index
    %c0_102 = arith.constant 0 : index
    %103 = vector.load %arg4[%c4, %c0_101, %c0_102] : memref<9x128x128xbf16, #tpu.memory_space<vmem>>, vector<1x128x128xbf16>
    %104 = vector.shape_cast %103 : vector<1x128x128xbf16> to vector<128x128xbf16>
    %cst_103 = arith.constant dense<0.000000e+00> : vector<64x128xf32>
    %105 = tpu.matmul %101, %104, %cst_103 {dimension_numbers = #tpu.dot_dimension_numbers<[1], [0], [0], [1], [0, 0, 1, 1], [], []>} : vector<64x128xbf16>, vector<128x128xbf16>, vector<64x128xf32> -> vector<64x128xf32>
    %106 = arith.addf %102, %105 : vector<64x128xf32>
    %c0_104 = arith.constant 0 : index
    %c0_105 = arith.constant 0 : index
    %107 = vector.load %arg10[%c0_104, %c0_105] : memref<64x128xf32, #tpu.memory_space<vmem>>, vector<64x128xf32>
    tpu.vector_store %arg10[%c0_104, %c0_105], %106 {strides = array<i32>} : memref<64x128xf32, #tpu.memory_space<vmem>>, vector<64x128xf32>,
    %c0_106 = arith.constant 0 : index
    %c0_107 = arith.constant 0 : index
    %108 = vector.load %arg5[%c0_106, %c0_107] : memref<128x128xbf16, #tpu.memory_space<vmem>>, vector<128x128xbf16>
    %cst_108 = arith.constant dense<0.000000e+00> : vector<64x128xf32>
    %109 = tpu.matmul %101, %108, %cst_108 {dimension_numbers = #tpu.dot_dimension_numbers<[1], [0], [0], [1], [0, 0, 1, 1], [], []>} : vector<64x128xbf16>, vector<128x128xbf16>, vector<64x128xf32> -> vector<64x128xf32>
    %110 = vector.shape_cast %109 : vector<64x128xf32> to vector<8x8x128xf32>
    %c0_109 = arith.constant 0 : index
    %c0_110 = arith.constant 0 : index
    %c0_111 = arith.constant 0 : index
    %c0_112 = arith.constant 0 : index
    %111 = vector.load %arg7[%c0_109, %c0_110, %c0_111, %c0_112] : memref<1x8x8x128xf32, #tpu.memory_space<vmem>>, vector<1x8x8x128xf32>
    %112 = vector.shape_cast %111 : vector<1x8x8x128xf32> to vector<8x8x128xf32>
    %113 = vector.shape_cast %110 : vector<8x8x128xf32> to vector<1x8x8x128xf32>
    tpu.vector_store %arg7[%c0_109, %c0_110, %c0_111, %c0_112], %113 {strides = array<i32>} : memref<1x8x8x128xf32, #tpu.memory_space<vmem>>, vector<1x8x8x128xf32>,
    %c2_113 = arith.constant 2 : index
    %c0_114 = arith.constant 0 : index
    %c1_115 = arith.constant 1 : index
    %c0_116 = arith.constant 0 : index
    %114 = vector.load %arg9[%c2_113, %c0_114, %c1_115, %c0_116] : memref<4x9x9x128xf32, #tpu.memory_space<vmem>>, vector<1x8x8x128xf32>
    %115 = vector.shape_cast %114 : vector<1x8x8x128xf32> to vector<8x8x128xf32>
    %116 = vector.shape_cast %115 : vector<8x8x128xf32> to vector<64x128xf32>
    %117 = arith.truncf %116 : vector<64x128xf32> to vector<64x128xbf16>
    %c0_117 = arith.constant 0 : index
    %c0_118 = arith.constant 0 : index
    %118 = vector.load %arg10[%c0_117, %c0_118] : memref<64x128xf32, #tpu.memory_space<vmem>>, vector<64x128xf32>
    %c5 = arith.constant 5 : index
    %c0_119 = arith.constant 0 : index
    %c0_120 = arith.constant 0 : index
    %119 = vector.load %arg4[%c5, %c0_119, %c0_120] : memref<9x128x128xbf16, #tpu.memory_space<vmem>>, vector<1x128x128xbf16>
    %120 = vector.shape_cast %119 : vector<1x128x128xbf16> to vector<128x128xbf16>
    %cst_121 = arith.constant dense<0.000000e+00> : vector<64x128xf32>
    %121 = tpu.matmul %117, %120, %cst_121 {dimension_numbers = #tpu.dot_dimension_numbers<[1], [0], [0], [1], [0, 0, 1, 1], [], []>} : vector<64x128xbf16>, vector<128x128xbf16>, vector<64x128xf32> -> vector<64x128xf32>
    %122 = arith.addf %118, %121 : vector<64x128xf32>
    %c0_122 = arith.constant 0 : index
    %c0_123 = arith.constant 0 : index
    %123 = vector.load %arg10[%c0_122, %c0_123] : memref<64x128xf32, #tpu.memory_space<vmem>>, vector<64x128xf32>
    tpu.vector_store %arg10[%c0_122, %c0_123], %122 {strides = array<i32>} : memref<64x128xf32, #tpu.memory_space<vmem>>, vector<64x128xf32>,
    %c0_124 = arith.constant 0 : index
    %c1_125 = arith.constant 1 : index
    %c0_126 = arith.constant 0 : index
    %c0_127 = arith.constant 0 : index
    %124 = vector.load %arg9[%c0_124, %c1_125, %c0_126, %c0_127] : memref<4x9x9x128xf32, #tpu.memory_space<vmem>>, vector<1x8x8x128xf32>
    %125 = vector.shape_cast %124 : vector<1x8x8x128xf32> to vector<8x8x128xf32>
    %126 = vector.shape_cast %125 : vector<8x8x128xf32> to vector<64x128xf32>
    %127 = arith.truncf %126 : vector<64x128xf32> to vector<64x128xbf16>
    %c0_128 = arith.constant 0 : index
    %c0_129 = arith.constant 0 : index
    %128 = vector.load %arg10[%c0_128, %c0_129] : memref<64x128xf32, #tpu.memory_space<vmem>>, vector<64x128xf32>
    %c6 = arith.constant 6 : index
    %c0_130 = arith.constant 0 : index
    %c0_131 = arith.constant 0 : index
    %129 = vector.load %arg4[%c6, %c0_130, %c0_131] : memref<9x128x128xbf16, #tpu.memory_space<vmem>>, vector<1x128x128xbf16>
    %130 = vector.shape_cast %129 : vector<1x128x128xbf16> to vector<128x128xbf16>
    %cst_132 = arith.constant dense<0.000000e+00> : vector<64x128xf32>
    %131 = tpu.matmul %127, %130, %cst_132 {dimension_numbers = #tpu.dot_dimension_numbers<[1], [0], [0], [1], [0, 0, 1, 1], [], []>} : vector<64x128xbf16>, vector<128x128xbf16>, vector<64x128xf32> -> vector<64x128xf32>
    %132 = arith.addf %128, %131 : vector<64x128xf32>
    %c0_133 = arith.constant 0 : index
    %c0_134 = arith.constant 0 : index
    %133 = vector.load %arg10[%c0_133, %c0_134] : memref<64x128xf32, #tpu.memory_space<vmem>>, vector<64x128xf32>
    tpu.vector_store %arg10[%c0_133, %c0_134], %132 {strides = array<i32>} : memref<64x128xf32, #tpu.memory_space<vmem>>, vector<64x128xf32>,
    %c1_135 = arith.constant 1 : index
    %c1_136 = arith.constant 1 : index
    %c0_137 = arith.constant 0 : index
    %c0_138 = arith.constant 0 : index
    %134 = vector.load %arg9[%c1_135, %c1_136, %c0_137, %c0_138] : memref<4x9x9x128xf32, #tpu.memory_space<vmem>>, vector<1x8x8x128xf32>
    %135 = vector.shape_cast %134 : vector<1x8x8x128xf32> to vector<8x8x128xf32>
    %136 = vector.shape_cast %135 : vector<8x8x128xf32> to vector<64x128xf32>
    %137 = arith.truncf %136 : vector<64x128xf32> to vector<64x128xbf16>
    %c0_139 = arith.constant 0 : index
    %c0_140 = arith.constant 0 : index
    %138 = vector.load %arg10[%c0_139, %c0_140] : memref<64x128xf32, #tpu.memory_space<vmem>>, vector<64x128xf32>
    %c7 = arith.constant 7 : index
    %c0_141 = arith.constant 0 : index
    %c0_142 = arith.constant 0 : index
    %139 = vector.load %arg4[%c7, %c0_141, %c0_142] : memref<9x128x128xbf16, #tpu.memory_space<vmem>>, vector<1x128x128xbf16>
    %140 = vector.shape_cast %139 : vector<1x128x128xbf16> to vector<128x128xbf16>
    %cst_143 = arith.constant dense<0.000000e+00> : vector<64x128xf32>
    %141 = tpu.matmul %137, %140, %cst_143 {dimension_numbers = #tpu.dot_dimension_numbers<[1], [0], [0], [1], [0, 0, 1, 1], [], []>} : vector<64x128xbf16>, vector<128x128xbf16>, vector<64x128xf32> -> vector<64x128xf32>
    %142 = arith.addf %138, %141 : vector<64x128xf32>
    %c0_144 = arith.constant 0 : index
    %c0_145 = arith.constant 0 : index
    %143 = vector.load %arg10[%c0_144, %c0_145] : memref<64x128xf32, #tpu.memory_space<vmem>>, vector<64x128xf32>
    tpu.vector_store %arg10[%c0_144, %c0_145], %142 {strides = array<i32>} : memref<64x128xf32, #tpu.memory_space<vmem>>, vector<64x128xf32>,
    %c0_146 = arith.constant 0 : index
    %c1_147 = arith.constant 1 : index
    %c1_148 = arith.constant 1 : index
    %c0_149 = arith.constant 0 : index
    %144 = vector.load %arg9[%c0_146, %c1_147, %c1_148, %c0_149] : memref<4x9x9x128xf32, #tpu.memory_space<vmem>>, vector<1x8x8x128xf32>
    %145 = vector.shape_cast %144 : vector<1x8x8x128xf32> to vector<8x8x128xf32>
    %146 = vector.shape_cast %145 : vector<8x8x128xf32> to vector<64x128xf32>
    %147 = arith.truncf %146 : vector<64x128xf32> to vector<64x128xbf16>
    %c0_150 = arith.constant 0 : index
    %c0_151 = arith.constant 0 : index
    %148 = vector.load %arg10[%c0_150, %c0_151] : memref<64x128xf32, #tpu.memory_space<vmem>>, vector<64x128xf32>
    %c8 = arith.constant 8 : index
    %c0_152 = arith.constant 0 : index
    %c0_153 = arith.constant 0 : index
    %149 = vector.load %arg4[%c8, %c0_152, %c0_153] : memref<9x128x128xbf16, #tpu.memory_space<vmem>>, vector<1x128x128xbf16>
    %150 = vector.shape_cast %149 : vector<1x128x128xbf16> to vector<128x128xbf16>
    %cst_154 = arith.constant dense<0.000000e+00> : vector<64x128xf32>
    %151 = tpu.matmul %147, %150, %cst_154 {dimension_numbers = #tpu.dot_dimension_numbers<[1], [0], [0], [1], [0, 0, 1, 1], [], []>} : vector<64x128xbf16>, vector<128x128xbf16>, vector<64x128xf32> -> vector<64x128xf32>
    %152 = arith.addf %148, %151 : vector<64x128xf32>
    %c0_155 = arith.constant 0 : index
    %c0_156 = arith.constant 0 : index
    %153 = vector.load %arg10[%c0_155, %c0_156] : memref<64x128xf32, #tpu.memory_space<vmem>>, vector<64x128xf32>
    tpu.vector_store %arg10[%c0_155, %c0_156], %152 {strides = array<i32>} : memref<64x128xf32, #tpu.memory_space<vmem>>, vector<64x128xf32>,
    %c0_157 = arith.constant 0 : index
    %c0_158 = arith.constant 0 : index
    %154 = vector.load %arg10[%c0_157, %c0_158] : memref<64x128xf32, #tpu.memory_space<vmem>>, vector<64x128xf32>
    %cst_159 = arith.constant dense<0.000000e+00> : vector<128xf32>
    %155 = vector.multi_reduction <add>, %154, %cst_159 [0] : vector<64x128xf32> to vector<128xf32>
    %156 = vector.shape_cast %155 : vector<128xf32> to vector<1x128xf32>
    %c0_160 = arith.constant 0 : index
    %c0_161 = arith.constant 0 : index
    %c0_162 = arith.constant 0 : index
    %157 = vector.load %arg8[%c0_160, %c0_161, %c0_162] : memref<1x2x128xf32, #tpu.memory_space<vmem>>, vector<1x1x128xf32>
    %158 = vector.shape_cast %157 : vector<1x1x128xf32> to vector<1x128xf32>
    %159 = vector.shape_cast %156 : vector<1x128xf32> to vector<1x1x128xf32>
    tpu.vector_store %arg8[%c0_160, %c0_161, %c0_162], %159 {strides = array<i32>} : memref<1x2x128xf32, #tpu.memory_space<vmem>>, vector<1x1x128xf32>,
    %160 = arith.mulf %154, %154 : vector<64x128xf32>
    %cst_163 = arith.constant dense<0.000000e+00> : vector<128xf32>
    %161 = vector.multi_reduction <add>, %160, %cst_163 [0] : vector<64x128xf32> to vector<128xf32>
    %162 = vector.shape_cast %161 : vector<128xf32> to vector<1x128xf32>
    %c0_164 = arith.constant 0 : index
    %c1_165 = arith.constant 1 : index
    %c0_166 = arith.constant 0 : index
    %163 = vector.load %arg8[%c0_164, %c1_165, %c0_166] : memref<1x2x128xf32, #tpu.memory_space<vmem>>, vector<1x1x128xf32>
    %164 = vector.shape_cast %163 : vector<1x1x128xf32> to vector<1x128xf32>
    %165 = vector.shape_cast %162 : vector<1x128xf32> to vector<1x1x128xf32>
    tpu.vector_store %arg8[%c0_164, %c1_165, %c0_166], %165 {strides = array<i32>} : memref<1x2x128xf32, #tpu.memory_space<vmem>>, vector<1x1x128xf32>,
    %166 = vector.shape_cast %154 : vector<64x128xf32> to vector<8x8x128xf32>
    %cst_167 = arith.constant 0.000000e+00 : f32
    %167 = vector.broadcast %cst_167 : f32 to vector<1x10x10x128xf32>
    %c0_168 = arith.constant 0 : index
    %c0_169 = arith.constant 0 : index
    %c0_170 = arith.constant 0 : index
    %c0_171 = arith.constant 0 : index
    %168 = vector.load %arg6[%c0_168, %c0_169, %c0_170, %c0_171] : memref<1x10x10x128xf32, #tpu.memory_space<vmem>>, vector<1x10x10x128xf32>
    tpu.vector_store %arg6[%c0_168, %c0_169, %c0_170, %c0_171], %167 {strides = array<i32>} : memref<1x10x10x128xf32, #tpu.memory_space<vmem>>, vector<1x10x10x128xf32>,
    %c0_172 = arith.constant 0 : index
    %c1_173 = arith.constant 1 : index
    %c1_174 = arith.constant 1 : index
    %c0_175 = arith.constant 0 : index
    %169 = vector.load %arg6[%c0_172, %c1_173, %c1_174, %c0_175] : memref<1x10x10x128xf32, #tpu.memory_space<vmem>>, vector<1x8x8x128xf32>
    %170 = vector.shape_cast %169 : vector<1x8x8x128xf32> to vector<8x8x128xf32>
    %171 = vector.shape_cast %166 : vector<8x8x128xf32> to vector<1x8x8x128xf32>
    tpu.vector_store %arg6[%c0_172, %c1_173, %c1_174, %c0_175], %171 {strides = array<i32>} : memref<1x10x10x128xf32, #tpu.memory_space<vmem>>, vector<1x8x8x128xf32>,
    return
  }
  func.func @transform_0(%arg0: i32) -> (i32, i32, i32, i32, i32) {
    %c0_i32 = arith.constant 0 : i32
    %c0_i32_0 = arith.constant 0 : i32
    %c0_i32_1 = arith.constant 0 : i32
    %c0_i32_2 = arith.constant 0 : i32
    %c0_i32_3 = arith.constant 0 : i32
    return %arg0, %c0_i32, %c0_i32_0, %c0_i32_1, %c0_i32_2 : i32, i32, i32, i32, i32
  }
  func.func @transform_1(%arg0: i32) -> (i32, i32) {
    %c0_i32 = arith.constant 0 : i32
    %c0_i32_0 = arith.constant 0 : i32
    %c0_i32_1 = arith.constant 0 : i32
    return %c0_i32, %c0_i32_0 : i32, i32
  }
  func.func @transform_2(%arg0: i32) -> (i32, i32) {
    %c0_i32 = arith.constant 0 : i32
    %c0_i32_0 = arith.constant 0 : i32
    %c0_i32_1 = arith.constant 0 : i32
    return %c0_i32, %c0_i32_0 : i32, i32
  }
  func.func @transform_3(%arg0: i32) -> (i32, i32, i32) {
    %c0_i32 = arith.constant 0 : i32
    %c0_i32_0 = arith.constant 0 : i32
    %c0_i32_1 = arith.constant 0 : i32
    %c0_i32_2 = arith.constant 0 : i32
    return %c0_i32, %c0_i32_0, %c0_i32_1 : i32, i32, i32
  }
  func.func @transform_4(%arg0: i32) -> (i32, i32) {
    %c0_i32 = arith.constant 0 : i32
    %c0_i32_0 = arith.constant 0 : i32
    %c0_i32_1 = arith.constant 0 : i32
    return %c0_i32, %c0_i32_0 : i32, i32
  }
  func.func @transform_5(%arg0: i32) -> (i32, i32, i32, i32) {
    %c0_i32 = arith.constant 0 : i32
    %c0_i32_0 = arith.constant 0 : i32
    %c0_i32_1 = arith.constant 0 : i32
    %c0_i32_2 = arith.constant 0 : i32
    return %arg0, %c0_i32, %c0_i32_0, %c0_i32_1 : i32, i32, i32, i32
  }
  func.func @transform_6(%arg0: i32) -> (i32, i32, i32, i32) {
    %c0_i32 = arith.constant 0 : i32
    %c0_i32_0 = arith.constant 0 : i32
    %c0_i32_1 = arith.constant 0 : i32
    %c0_i32_2 = arith.constant 0 : i32
    return %arg0, %c0_i32, %c0_i32_0, %c0_i32_1 : i32, i32, i32, i32
  }
  func.func @transform_7(%arg0: i32) -> (i32, i32, i32) {
    %c0_i32 = arith.constant 0 : i32
    %c0_i32_0 = arith.constant 0 : i32
    %c0_i32_1 = arith.constant 0 : i32
    return %arg0, %c0_i32, %c0_i32_0 : i32, i32, i32
  }
}

module attributes {stable_mosaic.version = 11 : i64} {
  func.func @kernel(%arg0: i32, %arg1: memref<1x1x10x10x128xf32, #tpu.memory_space<vmem>>, %arg2: memref<1x128xf32, #tpu.memory_space<vmem>>, %arg3: memref<1x128xf32, #tpu.memory_space<vmem>>, %arg4: memref<9x128x128xbf16, #tpu.memory_space<vmem>>, %arg5: memref<1x8x8x128xf32, #tpu.memory_space<vmem>>, %arg6: memref<1x8x8x128xf32, #tpu.memory_space<vmem>>, %arg7: memref<1x10x10x128xf32, #tpu.memory_space<vmem>>, %arg8: memref<64x128xf32, #tpu.memory_space<vmem>>) attributes {dimension_semantics = [#tpu.dimension_semantics<parallel>], iteration_bounds = array<i64: 2>, scalar_prefetch = 0 : i64, scratch_operands = 2 : i64, tpu.core_type = #tpu.core_type<tc>, window_params = [{transform_indices = @transform_0, window_bounds = array<i64: 1, 1, 10, 10, 128>}, {pipeline_mode = #tpu.pipeline_mode<synchronous>, transform_indices = @transform_1, window_bounds = array<i64: 1, 128>}, {pipeline_mode = #tpu.pipeline_mode<synchronous>, transform_indices = @transform_2, window_bounds = array<i64: 1, 128>}, {pipeline_mode = #tpu.pipeline_mode<synchronous>, transform_indices = @transform_3, window_bounds = array<i64: 9, 128, 128>}, {transform_indices = @transform_4, window_bounds = array<i64: 1, 8, 8, 128>}, {transform_indices = @transform_5, window_bounds = array<i64: 1, 8, 8, 128>}]} {
    %c0 = arith.constant 0 : index
    %c0_0 = arith.constant 0 : index
    %0 = vector.load %arg2[%c0, %c0_0] : memref<1x128xf32, #tpu.memory_space<vmem>>, vector<1x128xf32>
    %c0_1 = arith.constant 0 : index
    %c0_2 = arith.constant 0 : index
    %1 = vector.load %arg3[%c0_1, %c0_2] : memref<1x128xf32, #tpu.memory_space<vmem>>, vector<1x128xf32>
    %cst = arith.constant 0.000000e+00 : f32
    %2 = vector.broadcast %cst : f32 to vector<1x10x10x128xf32>
    %c0_3 = arith.constant 0 : index
    %c0_4 = arith.constant 0 : index
    %c0_5 = arith.constant 0 : index
    %c0_6 = arith.constant 0 : index
    %3 = vector.load %arg7[%c0_3, %c0_4, %c0_5, %c0_6] : memref<1x10x10x128xf32, #tpu.memory_space<vmem>>, vector<1x10x10x128xf32>
    tpu.vector_store %arg7[%c0_3, %c0_4, %c0_5, %c0_6], %2 {strides = array<i32>} : memref<1x10x10x128xf32, #tpu.memory_space<vmem>>, vector<1x10x10x128xf32>,
    %c0_7 = arith.constant 0 : index
    %c0_8 = arith.constant 0 : index
    %c1 = arith.constant 1 : index
    %c1_9 = arith.constant 1 : index
    %c0_10 = arith.constant 0 : index
    %4 = vector.load %arg1[%c0_7, %c0_8, %c1, %c1_9, %c0_10] : memref<1x1x10x10x128xf32, #tpu.memory_space<vmem>>, vector<1x1x8x8x128xf32>
    %5 = vector.shape_cast %4 : vector<1x1x8x8x128xf32> to vector<8x8x128xf32>
    %6 = vector.shape_cast %0 : vector<1x128xf32> to vector<1x1x128xf32>
    %7 = vector.broadcast %6 : vector<1x1x128xf32> to vector<8x8x128xf32>
    %8 = arith.mulf %5, %7 : vector<8x8x128xf32>
    %9 = vector.shape_cast %1 : vector<1x128xf32> to vector<1x1x128xf32>
    %10 = vector.broadcast %9 : vector<1x1x128xf32> to vector<8x8x128xf32>
    %11 = arith.addf %8, %10 : vector<8x8x128xf32>
    %cst_11 = arith.constant 0.000000e+00 : f32
    %12 = vector.broadcast %cst_11 : f32 to vector<8x8x128xf32>
    %13 = arith.maximumf %11, %12 : vector<8x8x128xf32>
    %c0_12 = arith.constant 0 : index
    %c1_13 = arith.constant 1 : index
    %c1_14 = arith.constant 1 : index
    %c0_15 = arith.constant 0 : index
    %14 = vector.load %arg7[%c0_12, %c1_13, %c1_14, %c0_15] : memref<1x10x10x128xf32, #tpu.memory_space<vmem>>, vector<1x8x8x128xf32>
    %15 = vector.shape_cast %14 : vector<1x8x8x128xf32> to vector<8x8x128xf32>
    %16 = vector.shape_cast %13 : vector<8x8x128xf32> to vector<1x8x8x128xf32>
    tpu.vector_store %arg7[%c0_12, %c1_13, %c1_14, %c0_15], %16 {strides = array<i32>} : memref<1x10x10x128xf32, #tpu.memory_space<vmem>>, vector<1x8x8x128xf32>,
    %cst_16 = arith.constant 0.000000e+00 : f32
    %17 = vector.broadcast %cst_16 : f32 to vector<64x128xf32>
    %c0_17 = arith.constant 0 : index
    %c0_18 = arith.constant 0 : index
    %18 = vector.load %arg8[%c0_17, %c0_18] : memref<64x128xf32, #tpu.memory_space<vmem>>, vector<64x128xf32>
    tpu.vector_store %arg8[%c0_17, %c0_18], %17 {strides = array<i32>} : memref<64x128xf32, #tpu.memory_space<vmem>>, vector<64x128xf32>,
    %c0_19 = arith.constant 0 : index
    %c0_20 = arith.constant 0 : index
    %c0_21 = arith.constant 0 : index
    %c0_22 = arith.constant 0 : index
    %19 = vector.load %arg7[%c0_19, %c0_20, %c0_21, %c0_22] : memref<1x10x10x128xf32, #tpu.memory_space<vmem>>, vector<1x8x8x128xf32>
    %20 = vector.shape_cast %19 : vector<1x8x8x128xf32> to vector<8x8x128xf32>
    %21 = vector.shape_cast %20 : vector<8x8x128xf32> to vector<64x128xf32>
    %22 = arith.truncf %21 : vector<64x128xf32> to vector<64x128xbf16>
    %c0_23 = arith.constant 0 : index
    %c0_24 = arith.constant 0 : index
    %23 = vector.load %arg8[%c0_23, %c0_24] : memref<64x128xf32, #tpu.memory_space<vmem>>, vector<64x128xf32>
    %c0_25 = arith.constant 0 : index
    %c0_26 = arith.constant 0 : index
    %c0_27 = arith.constant 0 : index
    %24 = vector.load %arg4[%c0_25, %c0_26, %c0_27] : memref<9x128x128xbf16, #tpu.memory_space<vmem>>, vector<1x128x128xbf16>
    %25 = vector.shape_cast %24 : vector<1x128x128xbf16> to vector<128x128xbf16>
    %cst_28 = arith.constant dense<0.000000e+00> : vector<64x128xf32>
    %26 = tpu.matmul %22, %25, %cst_28 {dimension_numbers = #tpu.dot_dimension_numbers<[1], [0], [0], [1], [0, 0, 1, 1], [], []>} : vector<64x128xbf16>, vector<128x128xbf16>, vector<64x128xf32> -> vector<64x128xf32>
    %27 = arith.addf %23, %26 : vector<64x128xf32>
    %c0_29 = arith.constant 0 : index
    %c0_30 = arith.constant 0 : index
    %28 = vector.load %arg8[%c0_29, %c0_30] : memref<64x128xf32, #tpu.memory_space<vmem>>, vector<64x128xf32>
    tpu.vector_store %arg8[%c0_29, %c0_30], %27 {strides = array<i32>} : memref<64x128xf32, #tpu.memory_space<vmem>>, vector<64x128xf32>,
    %c0_31 = arith.constant 0 : index
    %c0_32 = arith.constant 0 : index
    %c1_33 = arith.constant 1 : index
    %c0_34 = arith.constant 0 : index
    %29 = vector.load %arg7[%c0_31, %c0_32, %c1_33, %c0_34] : memref<1x10x10x128xf32, #tpu.memory_space<vmem>>, vector<1x8x8x128xf32>
    %30 = vector.shape_cast %29 : vector<1x8x8x128xf32> to vector<8x8x128xf32>
    %31 = vector.shape_cast %30 : vector<8x8x128xf32> to vector<64x128xf32>
    %32 = arith.truncf %31 : vector<64x128xf32> to vector<64x128xbf16>
    %c0_35 = arith.constant 0 : index
    %c0_36 = arith.constant 0 : index
    %33 = vector.load %arg8[%c0_35, %c0_36] : memref<64x128xf32, #tpu.memory_space<vmem>>, vector<64x128xf32>
    %c1_37 = arith.constant 1 : index
    %c0_38 = arith.constant 0 : index
    %c0_39 = arith.constant 0 : index
    %34 = vector.load %arg4[%c1_37, %c0_38, %c0_39] : memref<9x128x128xbf16, #tpu.memory_space<vmem>>, vector<1x128x128xbf16>
    %35 = vector.shape_cast %34 : vector<1x128x128xbf16> to vector<128x128xbf16>
    %cst_40 = arith.constant dense<0.000000e+00> : vector<64x128xf32>
    %36 = tpu.matmul %32, %35, %cst_40 {dimension_numbers = #tpu.dot_dimension_numbers<[1], [0], [0], [1], [0, 0, 1, 1], [], []>} : vector<64x128xbf16>, vector<128x128xbf16>, vector<64x128xf32> -> vector<64x128xf32>
    %37 = arith.addf %33, %36 : vector<64x128xf32>
    %c0_41 = arith.constant 0 : index
    %c0_42 = arith.constant 0 : index
    %38 = vector.load %arg8[%c0_41, %c0_42] : memref<64x128xf32, #tpu.memory_space<vmem>>, vector<64x128xf32>
    tpu.vector_store %arg8[%c0_41, %c0_42], %37 {strides = array<i32>} : memref<64x128xf32, #tpu.memory_space<vmem>>, vector<64x128xf32>,
    %c0_43 = arith.constant 0 : index
    %c0_44 = arith.constant 0 : index
    %c2 = arith.constant 2 : index
    %c0_45 = arith.constant 0 : index
    %39 = vector.load %arg7[%c0_43, %c0_44, %c2, %c0_45] : memref<1x10x10x128xf32, #tpu.memory_space<vmem>>, vector<1x8x8x128xf32>
    %40 = vector.shape_cast %39 : vector<1x8x8x128xf32> to vector<8x8x128xf32>
    %41 = vector.shape_cast %40 : vector<8x8x128xf32> to vector<64x128xf32>
    %42 = arith.truncf %41 : vector<64x128xf32> to vector<64x128xbf16>
    %c0_46 = arith.constant 0 : index
    %c0_47 = arith.constant 0 : index
    %43 = vector.load %arg8[%c0_46, %c0_47] : memref<64x128xf32, #tpu.memory_space<vmem>>, vector<64x128xf32>
    %c2_48 = arith.constant 2 : index
    %c0_49 = arith.constant 0 : index
    %c0_50 = arith.constant 0 : index
    %44 = vector.load %arg4[%c2_48, %c0_49, %c0_50] : memref<9x128x128xbf16, #tpu.memory_space<vmem>>, vector<1x128x128xbf16>
    %45 = vector.shape_cast %44 : vector<1x128x128xbf16> to vector<128x128xbf16>
    %cst_51 = arith.constant dense<0.000000e+00> : vector<64x128xf32>
    %46 = tpu.matmul %42, %45, %cst_51 {dimension_numbers = #tpu.dot_dimension_numbers<[1], [0], [0], [1], [0, 0, 1, 1], [], []>} : vector<64x128xbf16>, vector<128x128xbf16>, vector<64x128xf32> -> vector<64x128xf32>
    %47 = arith.addf %43, %46 : vector<64x128xf32>
    %c0_52 = arith.constant 0 : index
    %c0_53 = arith.constant 0 : index
    %48 = vector.load %arg8[%c0_52, %c0_53] : memref<64x128xf32, #tpu.memory_space<vmem>>, vector<64x128xf32>
    tpu.vector_store %arg8[%c0_52, %c0_53], %47 {strides = array<i32>} : memref<64x128xf32, #tpu.memory_space<vmem>>, vector<64x128xf32>,
    %c0_54 = arith.constant 0 : index
    %c1_55 = arith.constant 1 : index
    %c0_56 = arith.constant 0 : index
    %c0_57 = arith.constant 0 : index
    %49 = vector.load %arg7[%c0_54, %c1_55, %c0_56, %c0_57] : memref<1x10x10x128xf32, #tpu.memory_space<vmem>>, vector<1x8x8x128xf32>
    %50 = vector.shape_cast %49 : vector<1x8x8x128xf32> to vector<8x8x128xf32>
    %51 = vector.shape_cast %50 : vector<8x8x128xf32> to vector<64x128xf32>
    %52 = arith.truncf %51 : vector<64x128xf32> to vector<64x128xbf16>
    %c0_58 = arith.constant 0 : index
    %c0_59 = arith.constant 0 : index
    %53 = vector.load %arg8[%c0_58, %c0_59] : memref<64x128xf32, #tpu.memory_space<vmem>>, vector<64x128xf32>
    %c3 = arith.constant 3 : index
    %c0_60 = arith.constant 0 : index
    %c0_61 = arith.constant 0 : index
    %54 = vector.load %arg4[%c3, %c0_60, %c0_61] : memref<9x128x128xbf16, #tpu.memory_space<vmem>>, vector<1x128x128xbf16>
    %55 = vector.shape_cast %54 : vector<1x128x128xbf16> to vector<128x128xbf16>
    %cst_62 = arith.constant dense<0.000000e+00> : vector<64x128xf32>
    %56 = tpu.matmul %52, %55, %cst_62 {dimension_numbers = #tpu.dot_dimension_numbers<[1], [0], [0], [1], [0, 0, 1, 1], [], []>} : vector<64x128xbf16>, vector<128x128xbf16>, vector<64x128xf32> -> vector<64x128xf32>
    %57 = arith.addf %53, %56 : vector<64x128xf32>
    %c0_63 = arith.constant 0 : index
    %c0_64 = arith.constant 0 : index
    %58 = vector.load %arg8[%c0_63, %c0_64] : memref<64x128xf32, #tpu.memory_space<vmem>>, vector<64x128xf32>
    tpu.vector_store %arg8[%c0_63, %c0_64], %57 {strides = array<i32>} : memref<64x128xf32, #tpu.memory_space<vmem>>, vector<64x128xf32>,
    %c0_65 = arith.constant 0 : index
    %c1_66 = arith.constant 1 : index
    %c1_67 = arith.constant 1 : index
    %c0_68 = arith.constant 0 : index
    %59 = vector.load %arg7[%c0_65, %c1_66, %c1_67, %c0_68] : memref<1x10x10x128xf32, #tpu.memory_space<vmem>>, vector<1x8x8x128xf32>
    %60 = vector.shape_cast %59 : vector<1x8x8x128xf32> to vector<8x8x128xf32>
    %61 = vector.shape_cast %60 : vector<8x8x128xf32> to vector<64x128xf32>
    %62 = arith.truncf %61 : vector<64x128xf32> to vector<64x128xbf16>
    %c0_69 = arith.constant 0 : index
    %c0_70 = arith.constant 0 : index
    %63 = vector.load %arg8[%c0_69, %c0_70] : memref<64x128xf32, #tpu.memory_space<vmem>>, vector<64x128xf32>
    %c4 = arith.constant 4 : index
    %c0_71 = arith.constant 0 : index
    %c0_72 = arith.constant 0 : index
    %64 = vector.load %arg4[%c4, %c0_71, %c0_72] : memref<9x128x128xbf16, #tpu.memory_space<vmem>>, vector<1x128x128xbf16>
    %65 = vector.shape_cast %64 : vector<1x128x128xbf16> to vector<128x128xbf16>
    %cst_73 = arith.constant dense<0.000000e+00> : vector<64x128xf32>
    %66 = tpu.matmul %62, %65, %cst_73 {dimension_numbers = #tpu.dot_dimension_numbers<[1], [0], [0], [1], [0, 0, 1, 1], [], []>} : vector<64x128xbf16>, vector<128x128xbf16>, vector<64x128xf32> -> vector<64x128xf32>
    %67 = arith.addf %63, %66 : vector<64x128xf32>
    %c0_74 = arith.constant 0 : index
    %c0_75 = arith.constant 0 : index
    %68 = vector.load %arg8[%c0_74, %c0_75] : memref<64x128xf32, #tpu.memory_space<vmem>>, vector<64x128xf32>
    tpu.vector_store %arg8[%c0_74, %c0_75], %67 {strides = array<i32>} : memref<64x128xf32, #tpu.memory_space<vmem>>, vector<64x128xf32>,
    %c0_76 = arith.constant 0 : index
    %c1_77 = arith.constant 1 : index
    %c2_78 = arith.constant 2 : index
    %c0_79 = arith.constant 0 : index
    %69 = vector.load %arg7[%c0_76, %c1_77, %c2_78, %c0_79] : memref<1x10x10x128xf32, #tpu.memory_space<vmem>>, vector<1x8x8x128xf32>
    %70 = vector.shape_cast %69 : vector<1x8x8x128xf32> to vector<8x8x128xf32>
    %71 = vector.shape_cast %70 : vector<8x8x128xf32> to vector<64x128xf32>
    %72 = arith.truncf %71 : vector<64x128xf32> to vector<64x128xbf16>
    %c0_80 = arith.constant 0 : index
    %c0_81 = arith.constant 0 : index
    %73 = vector.load %arg8[%c0_80, %c0_81] : memref<64x128xf32, #tpu.memory_space<vmem>>, vector<64x128xf32>
    %c5 = arith.constant 5 : index
    %c0_82 = arith.constant 0 : index
    %c0_83 = arith.constant 0 : index
    %74 = vector.load %arg4[%c5, %c0_82, %c0_83] : memref<9x128x128xbf16, #tpu.memory_space<vmem>>, vector<1x128x128xbf16>
    %75 = vector.shape_cast %74 : vector<1x128x128xbf16> to vector<128x128xbf16>
    %cst_84 = arith.constant dense<0.000000e+00> : vector<64x128xf32>
    %76 = tpu.matmul %72, %75, %cst_84 {dimension_numbers = #tpu.dot_dimension_numbers<[1], [0], [0], [1], [0, 0, 1, 1], [], []>} : vector<64x128xbf16>, vector<128x128xbf16>, vector<64x128xf32> -> vector<64x128xf32>
    %77 = arith.addf %73, %76 : vector<64x128xf32>
    %c0_85 = arith.constant 0 : index
    %c0_86 = arith.constant 0 : index
    %78 = vector.load %arg8[%c0_85, %c0_86] : memref<64x128xf32, #tpu.memory_space<vmem>>, vector<64x128xf32>
    tpu.vector_store %arg8[%c0_85, %c0_86], %77 {strides = array<i32>} : memref<64x128xf32, #tpu.memory_space<vmem>>, vector<64x128xf32>,
    %c0_87 = arith.constant 0 : index
    %c2_88 = arith.constant 2 : index
    %c0_89 = arith.constant 0 : index
    %c0_90 = arith.constant 0 : index
    %79 = vector.load %arg7[%c0_87, %c2_88, %c0_89, %c0_90] : memref<1x10x10x128xf32, #tpu.memory_space<vmem>>, vector<1x8x8x128xf32>
    %80 = vector.shape_cast %79 : vector<1x8x8x128xf32> to vector<8x8x128xf32>
    %81 = vector.shape_cast %80 : vector<8x8x128xf32> to vector<64x128xf32>
    %82 = arith.truncf %81 : vector<64x128xf32> to vector<64x128xbf16>
    %c0_91 = arith.constant 0 : index
    %c0_92 = arith.constant 0 : index
    %83 = vector.load %arg8[%c0_91, %c0_92] : memref<64x128xf32, #tpu.memory_space<vmem>>, vector<64x128xf32>
    %c6 = arith.constant 6 : index
    %c0_93 = arith.constant 0 : index
    %c0_94 = arith.constant 0 : index
    %84 = vector.load %arg4[%c6, %c0_93, %c0_94] : memref<9x128x128xbf16, #tpu.memory_space<vmem>>, vector<1x128x128xbf16>
    %85 = vector.shape_cast %84 : vector<1x128x128xbf16> to vector<128x128xbf16>
    %cst_95 = arith.constant dense<0.000000e+00> : vector<64x128xf32>
    %86 = tpu.matmul %82, %85, %cst_95 {dimension_numbers = #tpu.dot_dimension_numbers<[1], [0], [0], [1], [0, 0, 1, 1], [], []>} : vector<64x128xbf16>, vector<128x128xbf16>, vector<64x128xf32> -> vector<64x128xf32>
    %87 = arith.addf %83, %86 : vector<64x128xf32>
    %c0_96 = arith.constant 0 : index
    %c0_97 = arith.constant 0 : index
    %88 = vector.load %arg8[%c0_96, %c0_97] : memref<64x128xf32, #tpu.memory_space<vmem>>, vector<64x128xf32>
    tpu.vector_store %arg8[%c0_96, %c0_97], %87 {strides = array<i32>} : memref<64x128xf32, #tpu.memory_space<vmem>>, vector<64x128xf32>,
    %c0_98 = arith.constant 0 : index
    %c2_99 = arith.constant 2 : index
    %c1_100 = arith.constant 1 : index
    %c0_101 = arith.constant 0 : index
    %89 = vector.load %arg7[%c0_98, %c2_99, %c1_100, %c0_101] : memref<1x10x10x128xf32, #tpu.memory_space<vmem>>, vector<1x8x8x128xf32>
    %90 = vector.shape_cast %89 : vector<1x8x8x128xf32> to vector<8x8x128xf32>
    %91 = vector.shape_cast %90 : vector<8x8x128xf32> to vector<64x128xf32>
    %92 = arith.truncf %91 : vector<64x128xf32> to vector<64x128xbf16>
    %c0_102 = arith.constant 0 : index
    %c0_103 = arith.constant 0 : index
    %93 = vector.load %arg8[%c0_102, %c0_103] : memref<64x128xf32, #tpu.memory_space<vmem>>, vector<64x128xf32>
    %c7 = arith.constant 7 : index
    %c0_104 = arith.constant 0 : index
    %c0_105 = arith.constant 0 : index
    %94 = vector.load %arg4[%c7, %c0_104, %c0_105] : memref<9x128x128xbf16, #tpu.memory_space<vmem>>, vector<1x128x128xbf16>
    %95 = vector.shape_cast %94 : vector<1x128x128xbf16> to vector<128x128xbf16>
    %cst_106 = arith.constant dense<0.000000e+00> : vector<64x128xf32>
    %96 = tpu.matmul %92, %95, %cst_106 {dimension_numbers = #tpu.dot_dimension_numbers<[1], [0], [0], [1], [0, 0, 1, 1], [], []>} : vector<64x128xbf16>, vector<128x128xbf16>, vector<64x128xf32> -> vector<64x128xf32>
    %97 = arith.addf %93, %96 : vector<64x128xf32>
    %c0_107 = arith.constant 0 : index
    %c0_108 = arith.constant 0 : index
    %98 = vector.load %arg8[%c0_107, %c0_108] : memref<64x128xf32, #tpu.memory_space<vmem>>, vector<64x128xf32>
    tpu.vector_store %arg8[%c0_107, %c0_108], %97 {strides = array<i32>} : memref<64x128xf32, #tpu.memory_space<vmem>>, vector<64x128xf32>,
    %c0_109 = arith.constant 0 : index
    %c2_110 = arith.constant 2 : index
    %c2_111 = arith.constant 2 : index
    %c0_112 = arith.constant 0 : index
    %99 = vector.load %arg7[%c0_109, %c2_110, %c2_111, %c0_112] : memref<1x10x10x128xf32, #tpu.memory_space<vmem>>, vector<1x8x8x128xf32>
    %100 = vector.shape_cast %99 : vector<1x8x8x128xf32> to vector<8x8x128xf32>
    %101 = vector.shape_cast %100 : vector<8x8x128xf32> to vector<64x128xf32>
    %102 = arith.truncf %101 : vector<64x128xf32> to vector<64x128xbf16>
    %c0_113 = arith.constant 0 : index
    %c0_114 = arith.constant 0 : index
    %103 = vector.load %arg8[%c0_113, %c0_114] : memref<64x128xf32, #tpu.memory_space<vmem>>, vector<64x128xf32>
    %c8 = arith.constant 8 : index
    %c0_115 = arith.constant 0 : index
    %c0_116 = arith.constant 0 : index
    %104 = vector.load %arg4[%c8, %c0_115, %c0_116] : memref<9x128x128xbf16, #tpu.memory_space<vmem>>, vector<1x128x128xbf16>
    %105 = vector.shape_cast %104 : vector<1x128x128xbf16> to vector<128x128xbf16>
    %cst_117 = arith.constant dense<0.000000e+00> : vector<64x128xf32>
    %106 = tpu.matmul %102, %105, %cst_117 {dimension_numbers = #tpu.dot_dimension_numbers<[1], [0], [0], [1], [0, 0, 1, 1], [], []>} : vector<64x128xbf16>, vector<128x128xbf16>, vector<64x128xf32> -> vector<64x128xf32>
    %107 = arith.addf %103, %106 : vector<64x128xf32>
    %c0_118 = arith.constant 0 : index
    %c0_119 = arith.constant 0 : index
    %108 = vector.load %arg8[%c0_118, %c0_119] : memref<64x128xf32, #tpu.memory_space<vmem>>, vector<64x128xf32>
    tpu.vector_store %arg8[%c0_118, %c0_119], %107 {strides = array<i32>} : memref<64x128xf32, #tpu.memory_space<vmem>>, vector<64x128xf32>,
    %c0_120 = arith.constant 0 : index
    %c0_121 = arith.constant 0 : index
    %109 = vector.load %arg8[%c0_120, %c0_121] : memref<64x128xf32, #tpu.memory_space<vmem>>, vector<64x128xf32>
    %c0_122 = arith.constant 0 : index
    %c0_123 = arith.constant 0 : index
    %c0_124 = arith.constant 0 : index
    %c0_125 = arith.constant 0 : index
    %110 = vector.load %arg5[%c0_122, %c0_123, %c0_124, %c0_125] : memref<1x8x8x128xf32, #tpu.memory_space<vmem>>, vector<1x8x8x128xf32>
    %111 = vector.shape_cast %110 : vector<1x8x8x128xf32> to vector<8x8x128xf32>
    %112 = vector.shape_cast %111 : vector<8x8x128xf32> to vector<64x128xf32>
    %113 = arith.addf %109, %112 : vector<64x128xf32>
    %114 = vector.shape_cast %113 : vector<64x128xf32> to vector<8x8x128xf32>
    %c0_126 = arith.constant 0 : index
    %c0_127 = arith.constant 0 : index
    %c0_128 = arith.constant 0 : index
    %c0_129 = arith.constant 0 : index
    %115 = vector.load %arg6[%c0_126, %c0_127, %c0_128, %c0_129] : memref<1x8x8x128xf32, #tpu.memory_space<vmem>>, vector<1x8x8x128xf32>
    %116 = vector.shape_cast %115 : vector<1x8x8x128xf32> to vector<8x8x128xf32>
    %117 = vector.shape_cast %114 : vector<8x8x128xf32> to vector<1x8x8x128xf32>
    tpu.vector_store %arg6[%c0_126, %c0_127, %c0_128, %c0_129], %117 {strides = array<i32>} : memref<1x8x8x128xf32, #tpu.memory_space<vmem>>, vector<1x8x8x128xf32>,
    return
  }
  func.func @transform_0(%arg0: i32) -> (i32, i32, i32, i32, i32) {
    %c0_i32 = arith.constant 0 : i32
    %c0_i32_0 = arith.constant 0 : i32
    %c0_i32_1 = arith.constant 0 : i32
    %c0_i32_2 = arith.constant 0 : i32
    %c0_i32_3 = arith.constant 0 : i32
    return %arg0, %c0_i32, %c0_i32_0, %c0_i32_1, %c0_i32_2 : i32, i32, i32, i32, i32
  }
  func.func @transform_1(%arg0: i32) -> (i32, i32) {
    %c0_i32 = arith.constant 0 : i32
    %c0_i32_0 = arith.constant 0 : i32
    %c0_i32_1 = arith.constant 0 : i32
    return %c0_i32, %c0_i32_0 : i32, i32
  }
  func.func @transform_2(%arg0: i32) -> (i32, i32) {
    %c0_i32 = arith.constant 0 : i32
    %c0_i32_0 = arith.constant 0 : i32
    %c0_i32_1 = arith.constant 0 : i32
    return %c0_i32, %c0_i32_0 : i32, i32
  }
  func.func @transform_3(%arg0: i32) -> (i32, i32, i32) {
    %c0_i32 = arith.constant 0 : i32
    %c0_i32_0 = arith.constant 0 : i32
    %c0_i32_1 = arith.constant 0 : i32
    %c0_i32_2 = arith.constant 0 : i32
    return %c0_i32, %c0_i32_0, %c0_i32_1 : i32, i32, i32
  }
  func.func @transform_4(%arg0: i32) -> (i32, i32, i32, i32) {
    %c0_i32 = arith.constant 0 : i32
    %c0_i32_0 = arith.constant 0 : i32
    %c0_i32_1 = arith.constant 0 : i32
    %c0_i32_2 = arith.constant 0 : i32
    return %arg0, %c0_i32, %c0_i32_0, %c0_i32_1 : i32, i32, i32, i32
  }
  func.func @transform_5(%arg0: i32) -> (i32, i32, i32, i32) {
    %c0_i32 = arith.constant 0 : i32
    %c0_i32_0 = arith.constant 0 : i32
    %c0_i32_1 = arith.constant 0 : i32
    %c0_i32_2 = arith.constant 0 : i32
    return %arg0, %c0_i32, %c0_i32_0, %c0_i32_1 : i32, i32, i32, i32
  }
}

</mosaic_0001>

<bundles_post_ra>
// kernel: preact_block_forward.3
= control target key start
LH: loop header
LB: loop body
LE: loop exit
PB: predicated region body
PF: predicated region fallthrough
CT: control target
= control target key end

     0   :  { %s346_s6 = smov 0   ;;  %s402_s0 = inlined_call_operand.vmem [shape: f32[512,128], index: 0, kind: input, shape index: {}]   ;;  %s403_s1 = inlined_call_operand.vmem [shape: f32[2,2,128], index: 1, kind: output, shape index: {}]  }
   0x1 LB: > { %s352_s7 = sadd.s32 4294967295, %s334_s6   ;;  %p314_p0 = scmp.ge.s32.totalorder %s334_s6, 1  ;;  %s334_s6 = sphi %s346_s6, %s11_s6  }
   0x2   : > { %p88_p1 = scmp.lt.s32.totalorder %s334_s6, 3 }
   0x4   : > { %p89_p2 = pnand %p314_p0, %p88_p1 }
   0x5   : > { %s315_s8 = sshll.u32 (!%p89_p2), %s352_s7, 5  ;;  %p113_p4 = scmp.lt.s32.totalorder (!%p89_p2), %s352_s7, 1 }
   0x6   : > { %92 = sbr.rel (%p89_p2) target bundleno = 92 (0x5c), region = 24  ;;  %p108_p3 = scmp.lt.s32.totalorder (!%p89_p2), %s315_s8, 63 }
   0xb   : > { %s405_s8 = smov (!%p108_p3, %s315_s8), 63  ;;  %s407_s7 = smov (!%p113_p4, %s352_s7), 1 }
   0xc   : > { %s316_s9 = sshll.u32 %s405_s8, 3  ;;  %s317_s13 = sshll.u32 %s407_s7, 1 }
   0xd   : > { %s360_s12 = scalar_lea.vmem %s402_s0, %s316_s9  ;;  %s116_s16 = scalar_lea.vmem %s403_s1, %s317_s13 }
   0xe   : > { %v117_v0 = vld [vmem:[%s360_s12] sm:$0xff]  ;;  %v118_v1 = vld [vmem:[%s360_s12 + $0x8] sm:$0xff]  ;;  %v119_v2 = vld [vmem:[%s360_s12 + $0x10] sm:$0xff] }
   0xf   : > { %v120_v3 = vld [vmem:[%s360_s12 + $0x18] sm:$0xff]  ;;  %v149_v4 = vadd.f32 %v118_v1, %v117_v0  ;;  %v187_v5 = vmul.f32 %v117_v0, %v117_v0  ;;  %v188_v6 = vmul.f32 %v118_v1, %v118_v1  ;;  %v189_v7 = vmul.f32 %v119_v2, %v119_v2  ;;  %v121_v8 = vld [vmem:[%s360_s12 + $0x20] sm:$0xff]  ;;  %v122_v12 = vld [vmem:[%s360_s12 + $0x28] sm:$0xff] }
  0x10   : > { %v190_v10 = vmul.f32 %v120_v3, %v120_v3  ;;  %v191_v14 = vmul.f32 %v121_v8, %v121_v8  ;;  %v123_v16 = vld [vmem:[%s360_s12 + $0x30] sm:$0xff]  ;;  %v192_v18 = vmul.f32 %v122_v12, %v122_v12  ;;  %v124_v20 = vld [vmem:[%s360_s12 + $0x38] sm:$0xff]  ;;  %v125_v24 = vld [vmem:[%s360_s12 + $0x40] sm:$0xff] }
  0x11   : > { %v150_v9 = vadd.f32 %v149_v4, %v119_v2  ;;  %v219_v11 = vadd.f32 %v188_v6, %v187_v5  ;;  %v193_v22 = vmul.f32 %v123_v16, %v123_v16  ;;  %v194_v26 = vmul.f32 %v124_v20, %v124_v20  ;;  %v126_v28 = vld [vmem:[%s360_s12 + $0x48] sm:$0xff]  ;;  %v127_v32 = vld [vmem:[%s360_s12 + $0x50] sm:$0xff]  ;;  %v128_v36 = vld [vmem:[%s360_s12 + $0x58] sm:$0xff] }
  0x12   : > { %v195_v30 = vmul.f32 %v125_v24, %v125_v24  ;;  %v196_v34 = vmul.f32 %v126_v28, %v126_v28  ;;  %v197_v38 = vmul.f32 %v127_v32, %v127_v32  ;;  %v129_v40 = vld [vmem:[%s360_s12 + $0x60] sm:$0xff]  ;;  %v198_v42 = vmul.f32 %v128_v36, %v128_v36  ;;  %v130_v44 = vld [vmem:[%s360_s12 + $0x68] sm:$0xff]  ;;  %v131_v48 = vld [vmem:[%s360_s12 + $0x70] sm:$0xff] }
  0x13   : > { %v151_v13 = vadd.f32 %v150_v9, %v120_v3  ;;  %v220_v15 = vadd.f32 %v219_v11, %v189_v7  ;;  %v199_v46 = vmul.f32 %v129_v40, %v129_v40  ;;  %v200_v50 = vmul.f32 %v130_v44, %v130_v44  ;;  %v132_v52 = vld [vmem:[%s360_s12 + $0x78] sm:$0xff]  ;;  %v133_v56 = vld [vmem:[%s360_s12 + $0x80] sm:$0xff]  ;;  %v134_v60 = vld [vmem:[%s360_s12 + $0x88] sm:$0xff] }
  0x14   : > { %v201_v54 = vmul.f32 %v131_v48, %v131_v48  ;;  %v202_v58 = vmul.f32 %v132_v52, %v132_v52  ;;  %v203_v62 = vmul.f32 %v133_v56, %v133_v56  ;;  %v135_v0 = vld [vmem:[%s360_s12 + $0x90] sm:$0xff]  ;;  %v204_v2 = vmul.f32 %v134_v60, %v134_v60  ;;  %v136_v4 = vld [vmem:[%s360_s12 + $0x98] sm:$0xff] }
  0x15   : > { %v152_v17 = vadd.f32 %v151_v13, %v121_v8  ;;  %v221_v19 = vadd.f32 %v220_v15, %v190_v10  ;;  %v205_v6 = vmul.f32 %v135_v0, %v135_v0  ;;  %v137_v8 = vld [vmem:[%s360_s12 + $0xa0] sm:$0xff]  ;;  %v206_v10 = vmul.f32 %v136_v4, %v136_v4 }
  0x17   : > { %v153_v21 = vadd.f32 %v152_v17, %v122_v12  ;;  %v222_v23 = vadd.f32 %v221_v19, %v191_v14  ;;  %v138_v12 = vld [vmem:[%s360_s12 + $0xa8] sm:$0xff]  ;;  %v207_v14 = vmul.f32 %v137_v8, %v137_v8 }
  0x19   : > { %v154_v25 = vadd.f32 %v153_v21, %v123_v16  ;;  %v223_v27 = vadd.f32 %v222_v23, %v192_v18  ;;  %v139_v16 = vld [vmem:[%s360_s12 + $0xb0] sm:$0xff]  ;;  %v208_v18 = vmul.f32 %v138_v12, %v138_v12 }
  0x1b   : > { %v155_v29 = vadd.f32 %v154_v25, %v124_v20  ;;  %v224_v31 = vadd.f32 %v223_v27, %v193_v22  ;;  %v140_v20 = vld [vmem:[%s360_s12 + $0xb8] sm:$0xff]  ;;  %v209_v22 = vmul.f32 %v139_v16, %v139_v16 }
  0x1d   : > { %v156_v33 = vadd.f32 %v155_v29, %v125_v24  ;;  %v225_v35 = vadd.f32 %v224_v31, %v194_v26  ;;  %v141_v24 = vld [vmem:[%s360_s12 + $0xc0] sm:$0xff]  ;;  %v210_v26 = vmul.f32 %v140_v20, %v140_v20 }
  0x1f   : > { %v157_v37 = vadd.f32 %v156_v33, %v126_v28  ;;  %v226_v39 = vadd.f32 %v225_v35, %v195_v30  ;;  %v142_v28 = vld [vmem:[%s360_s12 + $0xc8] sm:$0xff]  ;;  %v211_v30 = vmul.f32 %v141_v24, %v141_v24 }
  0x21   : > { %v158_v41 = vadd.f32 %v157_v37, %v127_v32  ;;  %v227_v43 = vadd.f32 %v226_v39, %v196_v34  ;;  %v143_v32 = vld [vmem:[%s360_s12 + $0xd0] sm:$0xff]  ;;  %v212_v34 = vmul.f32 %v142_v28, %v142_v28 }
  0x23   : > { %v159_v45 = vadd.f32 %v158_v41, %v128_v36  ;;  %v228_v47 = vadd.f32 %v227_v43, %v197_v38  ;;  %v144_v36 = vld [vmem:[%s360_s12 + $0xd8] sm:$0xff]  ;;  %v213_v38 = vmul.f32 %v143_v32, %v143_v32 }
  0x25   : > { %v160_v49 = vadd.f32 %v159_v45, %v129_v40  ;;  %v229_v51 = vadd.f32 %v228_v47, %v198_v42  ;;  %v145_v40 = vld [vmem:[%s360_s12 + $0xe0] sm:$0xff]  ;;  %v214_v42 = vmul.f32 %v144_v36, %v144_v36 }
  0x27   : > { %v161_v53 = vadd.f32 %v160_v49, %v130_v44  ;;  %v230_v55 = vadd.f32 %v229_v51, %v199_v46  ;;  %v146_v44 = vld [vmem:[%s360_s12 + $0xe8] sm:$0xff]  ;;  %v215_v46 = vmul.f32 %v145_v40, %v145_v40 }
  0x29   : > { %v162_v57 = vadd.f32 %v161_v53, %v131_v48  ;;  %v231_v59 = vadd.f32 %v230_v55, %v200_v50  ;;  %v147_v48 = vld [vmem:[%s360_s12 + $0xf0] sm:$0xff]  ;;  %v216_v50 = vmul.f32 %v146_v44, %v146_v44 }
  0x2b   : > { %v163_v61 = vadd.f32 %v162_v57, %v132_v52  ;;  %v232_v63 = vadd.f32 %v231_v59, %v201_v54  ;;  %v148_v52 = vld [vmem:[%s360_s12 + $0xf8] sm:$0xff]  ;;  %v217_v54 = vmul.f32 %v147_v48, %v147_v48 }
  0x2c   : > { %v218_v57 = vmul.f32 %v148_v52, %v148_v52 }
  0x2d   : > { %v164_v1 = vadd.f32 %v163_v61, %v133_v56  ;;  %v233_v3 = vadd.f32 %v232_v63, %v202_v58 }
  0x2f   : > { %v165_v5 = vadd.f32 %v164_v1, %v134_v60  ;;  %v234_v7 = vadd.f32 %v233_v3, %v203_v62 }
  0x31   : > { %v166_v9 = vadd.f32 %v165_v5, %v135_v0  ;;  %v235_v11 = vadd.f32 %v234_v7, %v204_v2 }
  0x33   : > { %v167_v13 = vadd.f32 %v166_v9, %v136_v4  ;;  %v236_v15 = vadd.f32 %v235_v11, %v205_v6 }
  0x35   : > { %v168_v17 = vadd.f32 %v167_v13, %v137_v8  ;;  %v237_v19 = vadd.f32 %v236_v15, %v206_v10 }
  0x37   : > { %v169_v21 = vadd.f32 %v168_v17, %v138_v12  ;;  %v238_v23 = vadd.f32 %v237_v19, %v207_v14 }
  0x39   : > { %v170_v25 = vadd.f32 %v169_v21, %v139_v16  ;;  %v239_v27 = vadd.f32 %v238_v23, %v208_v18 }
  0x3b   : > { %v171_v29 = vadd.f32 %v170_v25, %v140_v20  ;;  %v240_v31 = vadd.f32 %v239_v27, %v209_v22 }
  0x3d   : > { %v172_v33 = vadd.f32 %v171_v29, %v141_v24  ;;  %v241_v35 = vadd.f32 %v240_v31, %v210_v26 }
  0x3f   : > { %v173_v37 = vadd.f32 %v172_v33, %v142_v28  ;;  %v242_v39 = vadd.f32 %v241_v35, %v211_v30 }
  0x41   : > { %v174_v41 = vadd.f32 %v173_v37, %v143_v32  ;;  %v243_v43 = vadd.f32 %v242_v39, %v212_v34 }
  0x43   : > { %v175_v45 = vadd.f32 %v174_v41, %v144_v36  ;;  %v244_v47 = vadd.f32 %v243_v43, %v213_v38 }
  0x45   : > { %v176_v49 = vadd.f32 %v175_v45, %v145_v40  ;;  %v245_v51 = vadd.f32 %v244_v47, %v214_v42 }
  0x47   : > { %v177_v53 = vadd.f32 %v176_v49, %v146_v44  ;;  %v246_v55 = vadd.f32 %v245_v51, %v215_v46 }
  0x49   : > { %v178_v56 = vadd.f32 %v177_v53, %v147_v48  ;;  %v247_v58 = vadd.f32 %v246_v55, %v216_v50 }
  0x4b   : > { %v179_v59 = vadd.f32 %v178_v56, %v148_v52  ;;  %v248_v60 = vadd.f32 %v247_v58, %v217_v54 }
  0x4d   : > { %v180_v61 = vrot.slane %v179_v59, 4  ;;  %v249_v62 = vadd.f32 %v248_v60, %v218_v57 }
  0x4f   : > { %v181_v63 = vadd.f32 %v180_v61, %v179_v59  ;;  %v250_v0 = vrot.slane %v249_v62, 4 }
  0x51   : > { %v182_v1 = vrot.slane %v181_v63, 2  ;;  %v251_v2 = vadd.f32 %v250_v0, %v249_v62 }
  0x53   : > { %v183_v3 = vadd.f32 %v182_v1, %v181_v63  ;;  %v252_v4 = vrot.slane %v251_v2, 2 }
  0x55   : > { %v184_v5 = vrot.slane %v183_v3, 1  ;;  %v253_v6 = vadd.f32 %v252_v4, %v251_v2 }
  0x57   : > { %v185_v7 = vadd.f32 %v184_v5, %v183_v3  ;;  %v254_v8 = vrot.slane %v253_v6, 1 }
  0x59   : > { %186 = vst [vmem:[%s116_s16] sm:$0x1] %v185_v7  ;;  %v255_v9 = vadd.f32 %v254_v8, %v253_v6 }
  0x5b   : > { %256 = vst [vmem:[%s116_s16 + $0x1] sm:$0x1] %v255_v9 }
  0x5c PF: > { %s11_s6 = sadd.s32 1, %s334_s6  }
  0x5d   : > { %p8_p5 = scmp.ge.s32.totalorder %s11_s6, 4  }
  0x5f   :  { %10 = sbr.rel (!%p8_p5) target bundleno = 1 (0x1), region = 54 }

// kernel: preact_block_forward.5
= control target key start
LH: loop header
LB: loop body
LE: loop exit
PB: predicated region body
PF: predicated region fallthrough
CT: control target
= control target key end

     0   :  { %s2169_s18 = smov 0   ;;  %s2643_s0 = inlined_call_operand.vmem [shape: f32[2,1,10,10,128], index: 0, kind: input, shape index: {}]   ;;  %s2644_s1 = inlined_call_operand.vmem [shape: f32[1,128], index: 1, kind: input, shape index: {}]   ;;  %s2645_s2 = inlined_call_operand.vmem [shape: f32[1,128], index: 2, kind: input, shape index: {}]   ;;  %s2646_s3 = inlined_call_operand.vmem [shape: bf16[9,128,128], index: 3, kind: input, shape index: {}]   ;;  %s2647_s4 = inlined_call_operand.vmem [shape: f32[2,8,8,128], index: 4, kind: input, shape index: {}]   ;;  %s2648_s5 = inlined_call_operand.vmem [shape: f32[2,8,8,128], index: 5, kind: output, shape index: {}]  }
   0x1 LB: > { %s1592_s19 = sadd.s32 4294967295, %s2136_s18   ;;  %p1596_p0 = scmp.ge.s32.totalorder %s2136_s18, 1  ;;  %s2136_s18 = sphi %s2169_s18, %s15_s18  }
   0x2   : > { %p197_p1 = scmp.lt.s32.totalorder %s2136_s18, 3 }
   0x4   : > { %p198_p2 = pnand %p1596_p0, %p197_p1 }
   0x5   : > { %p230_p3 = scmp.lt.s32.totalorder (!%p198_p2), %s1592_s19, 1 }
   0x6   : > { %201 = sbr.rel (%p198_p2) target bundleno = 332 (0x14c), region = 40 }
   0xb   : > { %v2037_v0 = vld [vmem:[%s2646_s3 + $0x38] sm:$0xff]  ;;  %v2138_v2 = vmov 0.0   ;;  %v2036_v3 = vld [vmem:[%s2646_s3 + $0x30] sm:$0xff]  ;;  %s2650_s19 = smov (!%p230_p3, %s1592_s19), 1  ;;  %v2035_v6 = vld [vmem:[%s2646_s3 + $0x28] sm:$0xff] }
   0xc   : > { %v2053_v1 = vld [vmem:[%s2646_s3 + $0xb8] sm:$0xff]  ;;  %255 = vst [vmem:[#allocation2 + $0x40] sm:$0xff] %v2138_v2  ;;  %2102 = vmatpush.bf16.msra.mxu1 %v2037_v0  ;;  %407 = vmatpush.bf16.msra.mxu0 %v2037_v0  ;;  %v2052_v4 = vld [vmem:[%s2646_s3 + $0xb0] sm:$0xff]  ;;  %s2118_s30 = smul.u32 160, %s2650_s19  ;;  %v2214_v8 = vld [vmem:[%s2644_s1] ss:$0 sm:$0xff] }
   0xd   : > { %256 = vst [vmem:[#allocation2 + $0x48] sm:$0x3] %v2138_v2  ;;  %667 = vmatpush.bf16.msra.mxu2 %v2053_v1  ;;  %v2061_v5 = vld [vmem:[%s2646_s3 + $0xf8] sm:$0xff]  ;;  %v2060_v7 = vld [vmem:[%s2646_s3 + $0xf0] sm:$0xff]  ;;  %v2219_v9 = vld [vmem:[%s2645_s2] ss:$0 sm:$0xff] }
   0xe   : > { %257 = vst [vmem:[#allocation2 + $0x50] sm:$0xff] %v2138_v2  ;;  %797 = vmatpush.bf16.msra.mxu3 %v2061_v5  ;;  %s2209_s12 = scalar_lea.vmem %s2643_s0, %s2118_s30  ;;  %v2051_v10 = vld [vmem:[%s2646_s3 + $0xa8] sm:$0xff]  ;;  %v2034_v17 = vld [vmem:[%s2646_s3 + $0x20] sm:$0xff]  ;;  %v2033_v30 = vld [vmem:[%s2646_s3 + $0x18] sm:$0xff]  ;;  %s2028_s13 = sshll.u32 %s2650_s19, 6 }
   0xf   : > { %258 = vst [vmem:[#allocation2 + $0x58] sm:$0x3] %v2138_v2  ;;  %v1605_v11 = vld [vmem:[%s2209_s12 + $0x41] sm:$0xff]  ;;  %v1606_v12 = vld [vmem:[%s2209_s12 + $0x51] sm:$0xff]  ;;  %s2602_s16 = scalar_lea.vmem %s2647_s4, %s2028_s13  ;;  %s2608_s19 = scalar_lea.vmem %s2648_s5, %s2028_s13 }
  0x10   : > { %247 = vst [vmem:[#allocation2] sm:$0xff] %v2138_v2  ;;  %2103 = vmatpush.bf16.msra.mxu1 %v2036_v3  ;;  %408 = vmatpush.bf16.msra.mxu0 %v2036_v3  ;;  %v282_v13 = vmul.f32 %v2214_v8, %v1605_v11  ;;  %v283_v14 = vmul.f32 %v2214_v8, %v1606_v12  ;;  %v2059_v15 = vld [vmem:[%s2646_s3 + $0xe8] sm:$0xff]  ;;  %v1602_v16 = vld [vmem:[%s2209_s12 + $0x11] sm:$0xff]  ;;  %v2050_v20 = vld [vmem:[%s2646_s3 + $0xa0] sm:$0xff] }
  0x11   : > { %668 = vmatpush.bf16.msra.mxu2 %v2052_v4  ;;  %248 = vst [vmem:[#allocation2 + $0x8] sm:$0x3] %v2138_v2  ;;  %v279_v23 = vmul.f32 %v2214_v8, %v1602_v16  ;;  %v1607_v24 = vld [vmem:[%s2209_s12 + $0x61] sm:$0xff]  ;;  %v1608_v25 = vld [vmem:[%s2209_s12 + $0x71] sm:$0xff] }
  0x12   : > { %249 = vst [vmem:[#allocation2 + $0x10] sm:$0xff] %v2138_v2  ;;  %798 = vmatpush.bf16.msra.mxu3 %v2060_v7  ;;  %v293_v18 = vadd.f32 %v2219_v9, %v282_v13  ;;  %v294_v19 = vadd.f32 %v2219_v9, %v283_v14  ;;  %v2058_v26 = vld [vmem:[%s2646_s3 + $0xe0] sm:$0xff]  ;;  %v284_v27 = vmul.f32 %v2214_v8, %v1607_v24  ;;  %v1604_v29 = vld [vmem:[%s2209_s12 + $0x31] sm:$0xff]  ;;  %v2031_v46 = vld [vmem:[%s2646_s3 + $0x8] sm:$0xff] }
  0x13   : > { %250 = vst [vmem:[#allocation2 + $0x18] sm:$0x3] %v2138_v2  ;;  %v1603_v28 = vld [vmem:[%s2209_s12 + $0x21] sm:$0xff]  ;;  %v285_v31 = vmul.f32 %v2214_v8, %v1608_v25  ;;  %v2049_v32 = vld [vmem:[%s2646_s3 + $0x98] sm:$0xff]  ;;  %v290_v34 = vadd.f32 %v2219_v9, %v279_v23  ;;  %v281_v35 = vmul.f32 %v2214_v8, %v1604_v29  ;;  %v2032_v38 = vld [vmem:[%s2646_s3 + $0x10] sm:$0xff] }
  0x14   : > { %2104 = vmatpush.bf16.msra.mxu1 %v2035_v6  ;;  %409 = vmatpush.bf16.msra.mxu0 %v2035_v6  ;;  %251 = vst [vmem:[#allocation2 + $0x20] sm:$0xff] %v2138_v2  ;;  %v2245_v21 = vmax.f32 %v293_v18, 0.0  ;;  %v2247_v22 = vmax.f32 %v294_v19, 0.0  ;;  %v280_v33 = vmul.f32 %v2214_v8, %v1603_v28  ;;  %v2057_v36 = vld [vmem:[%s2646_s3 + $0xd8] sm:$0xff]  ;;  %v295_v37 = vadd.f32 %v2219_v9, %v284_v27  ;;  %v2048_v40 = vld [vmem:[%s2646_s3 + $0x90] sm:$0xff]  ;;  %v2047_v48 = vld [vmem:[%s2646_s3 + $0x88] sm:$0xff] }
  0x15   : > { %669 = vmatpush.bf16.msra.mxu2 %v2051_v10  ;;  %252 = vst [vmem:[#allocation2 + $0x28] sm:$0x3] %v2138_v2  ;;  %v296_v39 = vadd.f32 %v2219_v9, %v285_v31  ;;  %v2289_v42 = vmax.f32 %v290_v34, 0.0  ;;  %v292_v43 = vadd.f32 %v2219_v9, %v281_v35  ;;  %v2056_v44 = vld [vmem:[%s2646_s3 + $0xd0] sm:$0xff]  ;;  %v2055_v51 = vld [vmem:[%s2646_s3 + $0xc8] sm:$0xff]  ;;  %v2030_v52 = vld [vmem:[%s2646_s3] sm:$0xff] }
  0x16   : > { %253 = vst [vmem:[#allocation2 + $0x30] sm:$0xff] %v2138_v2  ;;  %799 = vmatpush.bf16.msra.mxu3 %v2059_v15  ;;  %v291_v41 = vadd.f32 %v2219_v9, %v280_v33  ;;  %v2296_v45 = vmax.f32 %v295_v37, 0.0  ;;  %v2045_v55 = vld [vmem:[%s2646_s3 + $0x78] sm:$0xff]  ;;  %v2046_v56 = vld [vmem:[%s2646_s3 + $0x80] sm:$0xff]  ;;  %v2044_v62 = vld [vmem:[%s2646_s3 + $0x70] sm:$0xff]  ;;  %v2429_v35 = vpack.c.bf16 %v2247_v22, %v2245_v21 }
  0x17   : > { %254 = vst [vmem:[#allocation2 + $0x38] sm:$0x3] %v2138_v2  ;;  %v2302_v47 = vmax.f32 %v296_v39, 0.0  ;;  %v2311_v50 = vmax.f32 %v292_v43, 0.0  ;;  %v2069_v57 = vld [vmem:[%s2646_s3 + $0x138] sm:$0xff]  ;;  %v2054_v61 = vld [vmem:[%s2646_s3 + $0xc0] sm:$0xff] }
  0x18   : > { %2105 = vmatpush.bf16.msra.mxu1 %v2034_v17  ;;  %410 = vmatpush.bf16.msra.mxu0 %v2034_v17  ;;  %310 = vst [vmem:[#allocation2 + $0x41] sm:$0xff] %v2245_v21  ;;  %v2308_v49 = vmax.f32 %v291_v41, 0.0  ;;  %v2085_v58 = vld [vmem:[%s2646_s3 + $0x1b8] sm:$0xff]  ;;  %v582_v60 = vld [vmem:[#allocation2 + $0x2] sm:$0xff]  ;;  %v2068_v5 = vld [vmem:[%s2646_s3 + $0x130] sm:$0xff] }
  0x19   : > { %670 = vmatpush.bf16.msra.mxu2 %v2050_v20  ;;  %311 = vst [vmem:[#allocation2 + $0x51] sm:$0xff] %v2247_v22  ;;  %v2093_v1 = vld [vmem:[%s2646_s3 + $0x1f8] sm:$0xff]  ;;  %v2084_v6 = vld [vmem:[%s2646_s3 + $0x1b0] sm:$0xff]  ;;  %v2067_v12 = vld [vmem:[%s2646_s3 + $0x128] sm:$0xff] }
  0x1a   : > { %259 = vst [vmem:[#allocation2 + $0x60] sm:$0xff] %v2138_v2  ;;  %800 = vmatpush.bf16.msra.mxu3 %v2058_v26  ;;  %v2092_v11 = vld [vmem:[%s2646_s3 + $0x1f0] sm:$0xff]  ;;  %v2083_v13 = vld [vmem:[%s2646_s3 + $0x1a8] sm:$0xff]  ;;  %v2042_v14 = vld [vmem:[%s2646_s3 + $0x60] sm:$0xff] }
  0x1b   : > { %260 = vst [vmem:[#allocation2 + $0x68] sm:$0x3] %v2138_v2  ;;  %v2091_v15 = vld [vmem:[%s2646_s3 + $0x1e8] sm:$0xff]  ;;  %v2066_v16 = vld [vmem:[%s2646_s3 + $0x120] sm:$0xff]  ;;  %v2041_v20 = vld [vmem:[%s2646_s3 + $0x58] sm:$0xff] }
  0x1c   : > { %2106 = vmatpush.bf16.msra.mxu1 %v2033_v30  ;;  %411 = vmatpush.bf16.msra.mxu0 %v2033_v30  ;;  %261 = vst [vmem:[#allocation2 + $0x70] sm:$0xff] %v2138_v2  ;;  %v2082_v17 = vld [vmem:[%s2646_s3 + $0x1a0] sm:$0xff]  ;;  %v2065_v26 = vld [vmem:[%s2646_s3 + $0x118] sm:$0xff]  ;;  %v2040_v30 = vld [vmem:[%s2646_s3 + $0x50] sm:$0xff] }
  0x1d   : > { %671 = vmatpush.bf16.msra.mxu2 %v2049_v32  ;;  %262 = vst [vmem:[#allocation2 + $0x78] sm:$0x3] %v2138_v2  ;;  %v2064_v31 = vld [vmem:[%s2646_s3 + $0x110] sm:$0xff]  ;;  %v2081_v33 = vld [vmem:[%s2646_s3 + $0x198] sm:$0xff]  ;;  %v2090_v34 = vld [vmem:[%s2646_s3 + $0x1e0] sm:$0xff] }
  0x1e   : > { %263 = vst [vmem:[#allocation2 + $0x80] sm:$0xff] %v2138_v2  ;;  %801 = vmatpush.bf16.msra.mxu3 %v2057_v36  ;;  %v2039_v36 = vld [vmem:[%s2646_s3 + $0x48] sm:$0xff]  ;;  %v2080_v37 = vld [vmem:[%s2646_s3 + $0x190] sm:$0xff]  ;;  %v2089_v39 = vld [vmem:[%s2646_s3 + $0x1d8] sm:$0xff] }
  0x1f   : > { %264 = vst [vmem:[#allocation2 + $0x88] sm:$0x3] %v2138_v2  ;;  %v2320_v53 = vld [vmem:[#allocation2 + $0x40] sm:$0xff] }
  0x20   : > { %2107 = vmatpush.bf16.msra.mxu1 %v2032_v38  ;;  %412 = vmatpush.bf16.msra.mxu0 %v2032_v38  ;;  %265 = vst [vmem:[#allocation2 + $0x90] sm:$0xff] %v2138_v2  ;;  %v2322_v54 = vld [vmem:[#allocation2 + $0x50] sm:$0xff]  ;;  %v2063_v38 = vld [vmem:[%s2646_s3 + $0x108] sm:$0xff]  ;;  %v2038_v41 = vld [vmem:[%s2646_s3 + $0x40] sm:$0xff] }
  0x21   : > { %672 = vmatpush.bf16.msra.mxu2 %v2048_v40  ;;  %266 = vst [vmem:[#allocation2 + $0x98] sm:$0x3] %v2138_v2  ;;  %v2341_v59 = vpack.c.bf16 %v2322_v54, %v2320_v53  ;;  %v1609_v40 = vld [vmem:[%s2209_s12 + $0x81] sm:$0xff] }
  0x22   : > { %307 = vst [vmem:[#allocation2 + $0x11] sm:$0xff] %v2289_v42  ;;  %802 = vmatpush.bf16.msra.mxu3 %v2056_v44  ;;  %v286_v43 = vmul.f32 %v2214_v8, %v1609_v40  ;;  %v2077_v44 = vld [vmem:[%s2646_s3 + $0x178] sm:$0xff] }
  0x23   : > { %312 = vst [vmem:[#allocation2 + $0x61] sm:$0xff] %v2296_v45  ;;  %v2460_v8 = vld [vmem:[#allocation2 + $0x52] sm:$0xff] }
  0x24   : > { %2108 = vmatpush.bf16.msra.mxu1 %v2031_v46  ;;  %413 = vmatpush.bf16.msra.mxu0 %v2031_v46  ;;  %313 = vst [vmem:[#allocation2 + $0x71] sm:$0xff] %v2302_v47  ;;  %v2062_v46 = vld [vmem:[%s2646_s3 + $0x100] sm:$0xff] }
  0x25   : > { %673 = vmatpush.bf16.msra.mxu2 %v2047_v48  ;;  %308 = vst [vmem:[#allocation2 + $0x21] sm:$0xff] %v2308_v49  ;;  %v2101_v48 = vld [vmem:[%s2646_s3 + $0x238] sm:$0xff] }
  0x26   : > { %309 = vst [vmem:[#allocation2 + $0x31] sm:$0xff] %v2311_v50  ;;  %803 = vmatpush.bf16.msra.mxu3 %v2055_v51  ;;  %v297_v51 = vadd.f32 %v2219_v9, %v286_v43  ;;  %v2100_v9 = vld [vmem:[%s2646_s3 + $0x230] sm:$0xff] }
  0x28   : > { %2109 = vmatpush.bf16.msra.mxu1 %v2030_v52  ;;  %414 = vmatpush.bf16.msra.mxu0 %v2030_v52  ;;  %v452_v52 = vld [vmem:[#allocation2 + $0x1] sm:$0xff] }
  0x29   : > { %674 = vmatpush.bf16.msra.mxu2 %v2046_v56  ;;  %v324_v63 = vld [vmem:[#allocation2 + $0x10] sm:$0xff] }
  0x2a   : > { %v2349_v0 = vld [vmem:[#allocation2 + $0x12] sm:$0xff]  ;;  %v331_v3 = vpack.c.bf16 %v324_v63, %v2138_v2  ;;  %804 = vmatpush.bf16.msra.mxu3 %v2054_v61  ;;  %v2043_v2 = vld [vmem:[%s2646_s3 + $0x68] sm:$0xff]  ;;  %v2387_v18 = vld [vmem:[#allocation2 + $0x60] sm:$0xff] }
  0x2b   : > { %v590_v4 = vpack.c.bf16 %v2349_v0, %v582_v60  ;;  %425 = vmatmul.bf16.vlgmr.msra.gmra.mxu1 %v2341_v59  ;;  %v2389_v19 = vld [vmem:[#allocation2 + $0x70] sm:$0xff]  ;;  %v2075_v61 = vld [vmem:[%s2646_s3 + $0x168] sm:$0xff] }
  0x2c   : > { %537 = vmatpush.bf16.msrb.mxu1 %v2045_v55  ;;  %927 = vmatpush.bf16.msrb.mxu0 %v2069_v57  ;;  %v325_v7 = vld [vmem:[#allocation2 + $0x20] sm:$0xff]  ;;  %v2403_v27 = vpack.c.bf16 %v2389_v19, %v2387_v18  ;;  %v2462_v55 = vmax.f32 %v297_v51, 0.0  ;;  %v2076_v56 = vld [vmem:[%s2646_s3 + $0x170] sm:$0xff]  ;;  %v460_v57 = vpack.c.bf16 %v2289_v42, %v452_v52 }
  0x2d   : > { %1188 = vmatpush.bf16.msrb.mxu2 %v2085_v58  ;;  %415 = vmatmul.bf16.vlgmr.msra.gmra.mxu0 %v331_v3  ;;  %v720_v10 = vpack.c.bf16 %v325_v7, %v324_v63  ;;  %v326_v23 = vld [vmem:[#allocation2 + $0x30] sm:$0xff]  ;;  %v2394_v24 = vld [vmem:[#allocation2 + $0x22] sm:$0xff]  ;;  %v850_v58 = vpack.c.bf16 %v2308_v49, %v2289_v42  ;;  %v722_v63 = vpack.c.bf16 %v2387_v18, %v2322_v54 }
  0x2e   : > { %675 = vmatmul.bf16.vlgmr.msra.gmra.mxu2 %v590_v4  ;;  %1318 = vmatpush.bf16.msrb.mxu3 %v2093_v1  ;;  %v2396_v25 = vld [vmem:[#allocation2 + $0x32] sm:$0xff]  ;;  %v2405_v28 = vpack.c.bf16 %v326_v23, %v325_v7  ;;  %v721_v32 = vpack.c.bf16 %v2320_v53, %v326_v23  ;;  %v2458_v53 = vld [vmem:[#allocation2 + $0x42] sm:$0xff]  ;;  %314 = vst [vmem:[#allocation2 + $0x81] sm:$0xff] %v2462_v55 }
  0x2f   : > { %805 = vmatmul.bf16.vlgmr.msra.gmra.mxu3 %v720_v10  ;;  %v2409_v29 = vpack.c.bf16 %v2396_v25, %v2394_v24  ;;  %v2476_v60 = vpack.c.bf16 %v2460_v8, %v2458_v53  ;;  %v852_v42 = vpack.c.bf16 %v2296_v45, %v2247_v22  ;;  %v2088_v1 = vld [vmem:[%s2646_s3 + $0x1d0] sm:$0xff]  ;;  %v2099_v3 = vld [vmem:[%s2646_s3 + $0x228] sm:$0xff]  ;;  %v2497_v4 = vpack.c.bf16 %v2302_v47, %v2296_v45  ;;  %v2078_v22 = vld [vmem:[%s2646_s3 + $0x180] sm:$0xff] }
  0x30   : > { %538 = vmatpush.bf16.msrb.mxu1 %v2044_v62  ;;  %928 = vmatpush.bf16.msrb.mxu0 %v2068_v5  ;;  %v2079_v62 = vld [vmem:[%s2646_s3 + $0x188] sm:$0xff]  ;;  %v2074_v54 = vld [vmem:[%s2646_s3 + $0x160] sm:$0xff]  ;;  %v2072_v10 = vld [vmem:[%s2646_s3 + $0x150] sm:$0xff]  ;;  %v853_v23 = vpack.c.bf16 %v2462_v55, %v2302_v47 }
  0x31   : > { %1189 = vmatpush.bf16.msrb.mxu2 %v2084_v6  ;;  %v2087_v5 = vld [vmem:[%s2646_s3 + $0x1c8] sm:$0xff]  ;;  %v2098_v45 = vld [vmem:[%s2646_s3 + $0x220] sm:$0xff]  ;;  %v2073_v6 = vld [vmem:[%s2646_s3 + $0x158] sm:$0xff] }
  0x32   : > { %1319 = vmatpush.bf16.msrb.mxu3 %v2092_v11  ;;  %v2514_v7 = vld [vmem:[#allocation2 + $0x62] sm:$0xff]  ;;  %v461_v11 = vpack.c.bf16 %v2311_v50, %v2308_v49  ;;  %v2096_v18 = vld [vmem:[%s2646_s3 + $0x210] sm:$0xff] }
  0x33   : > { %v2086_v49 = vld [vmem:[%s2646_s3 + $0x1c0] sm:$0xff] }
  0x34   : > { %539 = vmatpush.bf16.msrb.mxu1 %v2043_v2  ;;  %929 = vmatpush.bf16.msrb.mxu0 %v2067_v12  ;;  %v2516_v2 = vld [vmem:[#allocation2 + $0x72] sm:$0xff]  ;;  %v851_v12 = vpack.c.bf16 %v2245_v21, %v2311_v50  ;;  %v980_v50 = vpack.c.bf16 %v2394_v24, %v2349_v0  ;;  %v2094_v0 = vld [vmem:[%s2646_s3 + $0x200] sm:$0xff] }
  0x35   : > { %1190 = vmatpush.bf16.msrb.mxu2 %v2083_v13  ;;  %v593_v13 = vpack.c.bf16 %v2516_v2, %v2514_v7  ;;  %v2097_v21 = vld [vmem:[%s2646_s3 + $0x218] sm:$0xff]  ;;  %v1369_v47 = vld [vmem:[#allocation2 + $0x82] sm:$0xff] }
  0x36   : > { %1320 = vmatpush.bf16.msrb.mxu3 %v2091_v15 }
  0x38   : > { %540 = vmatpush.bf16.msrb.mxu1 %v2042_v14  ;;  %930 = vmatpush.bf16.msrb.mxu0 %v2066_v16  ;;  %v719_v14 = vld [vmem:[#allocation2 + $0x80] sm:$0xff]  ;;  %v2071_v16 = vld [vmem:[%s2646_s3 + $0x148] sm:$0xff] }
  0x39   : > { %1191 = vmatpush.bf16.msrb.mxu2 %v2082_v17  ;;  %v723_v15 = vpack.c.bf16 %v719_v14, %v2389_v19  ;;  %v2070_v17 = vld [vmem:[%s2646_s3 + $0x140] sm:$0xff]  ;;  %v2095_v19 = vld [vmem:[%s2646_s3 + $0x208] sm:$0xff]  ;;  %v1114_v24 = vpack.c.bf16 0.0, %v719_v14 }
  0x3a   : > { %1321 = vmatpush.bf16.msrb.mxu3 %v2090_v34 }
  0x3b   : > { %430 = vmatmul.bf16.gmra.mxu1 %v2403_v27 }
  0x3c   : > { %541 = vmatpush.bf16.msrb.mxu1 %v2041_v20  ;;  %931 = vmatpush.bf16.msrb.mxu0 %v2065_v26  ;;  %v981_v20 = vpack.c.bf16 %v2458_v53, %v2396_v25  ;;  %v1240_v25 = vld [vmem:[#allocation2 + $0x91] sm:$0xff] }
  0x3d   : > { %420 = vmatmul.bf16.gmra.mxu0 %v2405_v28  ;;  %1192 = vmatpush.bf16.msrb.mxu2 %v2081_v33  ;;  %v1244_v26 = vpack.c.bf16 %v1240_v25, %v2462_v55 }
  0x3e   : > { %680 = vmatmul.bf16.gmra.mxu2 %v2409_v29  ;;  %1322 = vmatpush.bf16.msrb.mxu3 %v2089_v39 }
  0x3f   : > { %810 = vmatmul.bf16.gmra.mxu3 %v721_v32 }
  0x40   : > { %542 = vmatpush.bf16.msrb.mxu1 %v2040_v30  ;;  %932 = vmatpush.bf16.msrb.mxu0 %v2064_v31 }
  0x41   : > { %1193 = vmatpush.bf16.msrb.mxu2 %v2080_v37 }
  0x42   : > { %1323 = vmatpush.bf16.msrb.mxu3 %v2088_v1 }
  0x44   : > { %543 = vmatpush.bf16.msrb.mxu1 %v2039_v36  ;;  %933 = vmatpush.bf16.msrb.mxu0 %v2063_v38 }
  0x45   : > { %1194 = vmatpush.bf16.msrb.mxu2 %v2079_v62 }
  0x46   : > { %1324 = vmatpush.bf16.msrb.mxu3 %v2087_v5 }
  0x48   : > { %544 = vmatpush.bf16.msrb.mxu1 %v2038_v41  ;;  %934 = vmatpush.bf16.msrb.mxu0 %v2062_v46 }
  0x49   : > { %1195 = vmatpush.bf16.msrb.mxu2 %v2078_v22 }
  0x4a   : > { %1325 = vmatpush.bf16.msrb.mxu3 %v2086_v49 }
  0x4b   : > { %545 = vmatmul.bf16.vlgmr.msrb.gmra.mxu1 %v460_v57 }
  0x4c   : > { %1057 = vmatpush.bf16.msra.mxu1 %v2077_v44  ;;  %1448 = vmatpush.bf16.msra.mxu0 %v2101_v48 }
  0x4d   : > { %935 = vmatmul.bf16.vlgmr.msrb.gmra.mxu0 %v850_v58  ;;  %2110 = vmatpush.bf16.msra.mxu2 %v2101_v48 }
  0x4e   : > { %685 = vmatmul.bf16.gmra.mxu2 %v2476_v60 }
  0x4f   : > { %815 = vmatmul.bf16.gmra.mxu3 %v722_v63 }
  0x50   : > { %1058 = vmatpush.bf16.msra.mxu1 %v2076_v56  ;;  %1449 = vmatpush.bf16.msra.mxu0 %v2100_v9 }
  0x51   : > { %2111 = vmatpush.bf16.msra.mxu2 %v2100_v9 }
  0x54   : > { %1059 = vmatpush.bf16.msra.mxu1 %v2075_v61  ;;  %1450 = vmatpush.bf16.msra.mxu0 %v2099_v3 }
  0x55   : > { %2112 = vmatpush.bf16.msra.mxu2 %v2099_v3 }
  0x58   : > { %1060 = vmatpush.bf16.msra.mxu1 %v2074_v54  ;;  %1451 = vmatpush.bf16.msra.mxu0 %v2098_v45 }
  0x59   : > { %2113 = vmatpush.bf16.msra.mxu2 %v2098_v45 }
  0x5b   : > { %550 = vmatmul.bf16.gmra.mxu1 %v461_v11 }
  0x5c   : > { %1061 = vmatpush.bf16.msra.mxu1 %v2073_v6  ;;  %1452 = vmatpush.bf16.msra.mxu0 %v2097_v21 }
  0x5d   : > { %940 = vmatmul.bf16.gmra.mxu0 %v851_v12  ;;  %2114 = vmatpush.bf16.msra.mxu2 %v2097_v21 }
  0x5e   : > { %690 = vmatmul.bf16.gmra.mxu2 %v593_v13 }
  0x5f   : > { %820 = vmatmul.bf16.gmra.mxu3 %v723_v15 }
  0x60   : > { %1062 = vmatpush.bf16.msra.mxu1 %v2072_v10  ;;  %1453 = vmatpush.bf16.msra.mxu0 %v2096_v18 }
  0x61   : > { %2115 = vmatpush.bf16.msra.mxu2 %v2096_v18 }
  0x64   : > { %1063 = vmatpush.bf16.msra.mxu1 %v2071_v16  ;;  %1454 = vmatpush.bf16.msra.mxu0 %v2095_v19 }
  0x65   : > { %2116 = vmatpush.bf16.msra.mxu2 %v2095_v19 }
  0x68   : > { %1064 = vmatpush.bf16.msra.mxu1 %v2070_v17  ;;  %1455 = vmatpush.bf16.msra.mxu0 %v2094_v0 }
  0x69   : > { %2117 = vmatpush.bf16.msra.mxu2 %v2094_v0 }
  0x6b   : > { %555 = vmatmul.bf16.gmra.mxu1 %v2429_v35 }
  0x6d   : > { %945 = vmatmul.bf16.gmra.mxu0 %v852_v42 }
  0x6e   : > { %1196 = vmatmul.bf16.vlgmr.msrb.gmra.mxu2 %v2405_v28  ;;  %v982_v28 = vpack.c.bf16 %v2514_v7, %v2460_v8 }
  0x6f   : > { %1326 = vmatmul.bf16.vlgmr.msrb.gmra.mxu3 %v461_v11 }
  0x7b   : > { %560 = vmatmul.bf16.gmra.mxu1 %v2497_v4 }
  0x7d   : > { %950 = vmatmul.bf16.gmra.mxu0 %v853_v23 }
  0x7e   : > { %1201 = vmatmul.bf16.gmra.mxu2 %v2341_v59  ;;  %v1370_v59 = vld [vmem:[#allocation2 + $0x92] sm:$0xff] }
  0x7f   : > { %1331 = vmatmul.bf16.gmra.mxu3 %v2429_v35  ;;  %v983_v35 = vpack.c.bf16 %v1369_v47, %v2516_v2 }
  0x8b   : > { %1065 = vmatmul.bf16.vlgmr.msra.gmra.mxu1 %v980_v50 }
  0x8d   : > { %1456 = vmatmul.bf16.vlgmr.msra.gmra.mxu0 %v2409_v29  ;;  %v1374_v29 = vpack.c.bf16 %v1370_v59, %v1369_v47 }
  0x8e   : > { %1206 = vmatmul.bf16.gmra.mxu2 %v2403_v27 }
  0x8f   : > { %1336 = vmatmul.bf16.gmra.mxu3 %v2497_v4 }
  0x9b   : > { %1070 = vmatmul.bf16.gmra.mxu1 %v981_v20 }
  0x9d   : > { %1461 = vmatmul.bf16.gmra.mxu0 %v2476_v60 }
  0x9e   : > { %1211 = vmatmul.bf16.gmra.mxu2 %v1114_v24 }
  0x9f   : > { %1341 = vmatmul.bf16.gmra.mxu3 %v1244_v26 }
  0xa8   : > { %v426_v30 = vpop.f32.mrf.mxu1 }
  0xaa   : > { %v416_v31 = vpop.f32.mrf.mxu0 }
  0xab   : > { %1075 = vmatmul.bf16.gmra.mxu1 %v982_v28 }
  0xad   : > { %1466 = vmatmul.bf16.gmra.mxu0 %v593_v13 }
  0xae   : > { %1471 = vmatmul.bf16.vlgmr.msra.gmra.mxu2 %v1374_v29 }
  0xb0   : > { %v428_v32 = vpop.f32.mrf.mxu1 }
  0xb1   : > { %v676_v27 = vpop.f32.mrf.mxu2 }
  0xb2   : > { %v418_v33 = vpop.f32.mrf.mxu0  ;;  %v806_v34 = vpop.f32.mrf.mxu3 }
  0xb8   : > { %v431_v37 = vpop.f32.mrf.mxu1 }
  0xb9   : > { %v678_v36 = vpop.f32.mrf.mxu2 }
  0xba   : > { %v421_v38 = vpop.f32.mrf.mxu0  ;;  %v808_v39 = vpop.f32.mrf.mxu3 }
  0xbb   : > { %1080 = vmatmul.bf16.gmra.mxu1 %v983_v35 }
  0xc0   : > { %v433_v41 = vpop.f32.mrf.mxu1 }
  0xc1   : > { %v681_v40 = vpop.f32.mrf.mxu2 }
  0xc2   : > { %v423_v43 = vpop.f32.mrf.mxu0  ;;  %v2568_v44 = vpop.f32.mrf.mxu3 }
  0xc8   : > { %v546_v48 = vpop.f32.mrf.mxu1 }
  0xc9   : > { %v683_v46 = vpop.f32.mrf.mxu2  ;;  %v566_v51 = vadd.f32 %v546_v48, %v416_v31 }
  0xca   : > { %v936_v52 = vpop.f32.mrf.mxu0  ;;  %v2570_v8 = vpop.f32.mrf.mxu3 }
  0xcb   : > { %v696_v53 = vadd.f32 %v676_v27, %v566_v51 }
  0xcd   : > { %v826_v47 = vadd.f32 %v806_v34, %v696_v53  ;;  %v1501_v34 = vld [vmem:[%s2602_s16] sm:$0xff] }
  0xcf   : > { %v956_v28 = vadd.f32 %v936_v52, %v826_v47 }
  0xd0   : > { %v548_v56 = vpop.f32.mrf.mxu1 }
  0xd1   : > { %v686_v55 = vpop.f32.mrf.mxu2  ;;  %v567_v57 = vadd.f32 %v548_v56, %v418_v33 }
  0xd2   : > { %v938_v9 = vpop.f32.mrf.mxu0  ;;  %v2572_v60 = vpop.f32.mrf.mxu3 }
  0xd3   : > { %v697_v58 = vadd.f32 %v678_v36, %v567_v57 }
  0xd5   : > { %v827_v33 = vadd.f32 %v808_v39, %v697_v58 }
  0xd8   : > { %v551_v62 = vpop.f32.mrf.mxu1 }
  0xd9   : > { %v688_v61 = vpop.f32.mrf.mxu2  ;;  %v568_v63 = vadd.f32 %v551_v62, %v421_v38 }
  0xda   : > { %v941_v42 = vpop.f32.mrf.mxu0  ;;  %v2574_v22 = vpop.f32.mrf.mxu3 }
  0xdb   : > { %v698_v1 = vadd.f32 %v681_v40, %v568_v63 }
  0xdd   : > { %v828_v48 = vadd.f32 %v2568_v44, %v698_v1 }
  0xdf   : > { %v958_v56 = vadd.f32 %v941_v42, %v828_v48 }
  0xe0   : > { %v553_v4 = vpop.f32.mrf.mxu1 }
  0xe1   : > { %v691_v3 = vpop.f32.mrf.mxu2  ;;  %v569_v54 = vadd.f32 %v553_v4, %v423_v43 }
  0xe2   : > { %v2576_v5 = vpop.f32.mrf.mxu0  ;;  %v2580_v11 = vpop.f32.mrf.mxu3 }
  0xe3   : > { %v699_v45 = vadd.f32 %v683_v46, %v569_v54  ;;  %v1503_v54 = vld [vmem:[%s2602_s16 + $0x10] sm:$0xff] }
  0xe5   : > { %v829_v63 = vadd.f32 %v2570_v8, %v699_v45 }
  0xe8   : > { %v556_v7 = vpop.f32.mrf.mxu1 }
  0xe9   : > { %v693_v6 = vpop.f32.mrf.mxu2  ;;  %v570_v2 = vadd.f32 %v556_v7, %v426_v30 }
  0xea   : > { %v2578_v10 = vpop.f32.mrf.mxu0  ;;  %v2588_v21 = vpop.f32.mrf.mxu3 }
  0xeb   : > { %v2582_v12 = vadd.f32 %v686_v55, %v570_v2  ;;  %v1502_v55 = vld [vmem:[%s2602_s16 + $0x8] sm:$0xff] }
  0xf0   : > { %v558_v14 = vpop.f32.mrf.mxu1 }
  0xf1   : > { %v1197_v13 = vpop.f32.mrf.mxu2  ;;  %v571_v15 = vadd.f32 %v558_v14, %v428_v32 }
  0xf2   : > { %v2584_v16 = vpop.f32.mrf.mxu0  ;;  %v1327_v20 = vpop.f32.mrf.mxu3 }
  0xf3   : > { %v2586_v49 = vadd.f32 %v688_v61, %v571_v15  ;;  %v830_v15 = vadd.f32 %v2572_v60, %v2582_v12 }
  0xf8   : > { %v561_v17 = vpop.f32.mrf.mxu1 }
  0xf9   : > { %v1199_v50 = vpop.f32.mrf.mxu2  ;;  %v572_v18 = vadd.f32 %v561_v17, %v431_v37  ;;  %v957_v37 = vadd.f32 %v938_v9, %v827_v33  ;;  %v1504_v17 = vld [vmem:[%s2602_s16 + $0x18] sm:$0xff] }
  0xfa   : > { %v2590_v19 = vpop.f32.mrf.mxu0  ;;  %v1329_v29 = vpop.f32.mrf.mxu3 }
  0xfb   : > { %v2592_v0 = vadd.f32 %v691_v3, %v572_v18  ;;  %v960_v18 = vadd.f32 %v2578_v10, %v830_v15 }
 0x100   : > { %v563_v23 = vpop.f32.mrf.mxu1 }
 0x101   : > { %v1202_v24 = vpop.f32.mrf.mxu2  ;;  %v573_v25 = vadd.f32 %v563_v23, %v433_v41 }
 0x102   : > { %v2594_v26 = vpop.f32.mrf.mxu0  ;;  %v1332_v46 = vpop.f32.mrf.mxu3 }
 0x103   : > { %v2596_v59 = vadd.f32 %v693_v6, %v573_v25  ;;  %v959_v6 = vadd.f32 %v2576_v5, %v829_v63 }
 0x108   : > { %v1066_v30 = vpop.f32.mrf.mxu1 }
 0x109   : > { %v1086_v31 = vadd.f32 %v1066_v30, %v956_v28  ;;  %v1204_v32 = vpop.f32.mrf.mxu2  ;;  %v831_v28 = vadd.f32 %v2574_v22, %v2586_v49  ;;  %v1505_v30 = vld [vmem:[%s2602_s16 + $0x20] sm:$0xff] }
 0x10a   : > { %v1457_v27 = vpop.f32.mrf.mxu0  ;;  %v1334_v4 = vpop.f32.mrf.mxu3 }
 0x10b   : > { %v1217_v35 = vadd.f32 %v1197_v13, %v1086_v31 }
 0x10d   : > { %v1347_v36 = vadd.f32 %v1327_v20, %v1217_v35 }
 0x10f   : > { %v1477_v38 = vadd.f32 %v1457_v27, %v1347_v36  ;;  %v832_v36 = vadd.f32 %v2580_v11, %v2592_v0 }
 0x110   : > { %v1068_v40 = vpop.f32.mrf.mxu1 }
 0x111   : > { %v1509_v39 = vadd.f32 %v1501_v34, %v1477_v38  ;;  %v1087_v41 = vadd.f32 %v1068_v40, %v957_v37  ;;  %v1207_v52 = vpop.f32.mrf.mxu2  ;;  %v1506_v37 = vld [vmem:[%s2602_s16 + $0x28] sm:$0xff]  ;;  %v962_v38 = vadd.f32 %v2590_v19, %v832_v36 }
 0x112   : > { %v1459_v43 = vpop.f32.mrf.mxu0 }
 0x113   : > { %1517 = vst [vmem:[%s2608_s19] sm:$0xff] %v1509_v39  ;;  %v1218_v51 = vadd.f32 %v1199_v50, %v1087_v41  ;;  %v1337_v50 = vpop.f32.mrf.mxu3 }
 0x115   : > { %v1348_v53 = vadd.f32 %v1329_v29, %v1218_v51  ;;  %v961_v29 = vadd.f32 %v2584_v16, %v831_v28  ;;  %v1507_v51 = vld [vmem:[%s2602_s16 + $0x30] sm:$0xff] }
 0x117   : > { %v1478_v57 = vadd.f32 %v1459_v43, %v1348_v53 }
 0x118   : > { %v1071_v9 = vpop.f32.mrf.mxu1 }
 0x119   : > { %v1510_v58 = vadd.f32 %v1502_v55, %v1478_v57  ;;  %v1088_v61 = vadd.f32 %v1071_v9, %v958_v56  ;;  %v1209_v1 = vpop.f32.mrf.mxu2 }
 0x11a   : > { %v1462_v62 = vpop.f32.mrf.mxu0 }
 0x11b   : > { %1518 = vst [vmem:[%s2608_s19 + $0x8] sm:$0xff] %v1510_v58  ;;  %v1219_v3 = vadd.f32 %v1202_v24, %v1088_v61  ;;  %v1339_v27 = vpop.f32.mrf.mxu3 }
 0x11d   : > { %v1349_v44 = vadd.f32 %v1332_v46, %v1219_v3  ;;  %v833_v46 = vadd.f32 %v2588_v21, %v2596_v59 }
 0x11f   : > { %v1479_v7 = vadd.f32 %v1462_v62, %v1349_v44  ;;  %v1508_v62 = vld [vmem:[%s2602_s16 + $0x38] sm:$0xff] }
 0x120   : > { %v1073_v2 = vpop.f32.mrf.mxu1 }
 0x121   : > { %v1511_v42 = vadd.f32 %v1503_v54, %v1479_v7  ;;  %v1089_v13 = vadd.f32 %v1073_v2, %v959_v6  ;;  %v1212_v23 = vpop.f32.mrf.mxu2 }
 0x122   : > { %v1464_v14 = vpop.f32.mrf.mxu0 }
 0x123   : > { %1519 = vst [vmem:[%s2608_s19 + $0x10] sm:$0xff] %v1511_v42  ;;  %v1220_v8 = vadd.f32 %v1204_v32, %v1089_v13  ;;  %v1342_v43 = vpop.f32.mrf.mxu3 }
 0x125   : > { %v1350_v45 = vadd.f32 %v1334_v4, %v1220_v8 }
 0x127   : > { %v1480_v20 = vadd.f32 %v1464_v14, %v1350_v45 }
 0x128   : > { %v1076_v5 = vpop.f32.mrf.mxu1 }
 0x129   : > { %v1512_v24 = vadd.f32 %v1504_v17, %v1480_v20  ;;  %v1090_v25 = vadd.f32 %v1076_v5, %v960_v18  ;;  %v1214_v35 = vpop.f32.mrf.mxu2 }
 0x12a   : > { %v1467_v47 = vpop.f32.mrf.mxu0 }
 0x12b   : > { %1520 = vst [vmem:[%s2608_s19 + $0x18] sm:$0xff] %v1512_v24  ;;  %v1221_v60 = vadd.f32 %v1207_v52, %v1090_v25  ;;  %v963_v52 = vadd.f32 %v2594_v26, %v833_v46  ;;  %v1344_v9 = vpop.f32.mrf.mxu3 }
 0x12d   : > { %v1351_v12 = vadd.f32 %v1337_v50, %v1221_v60 }
 0x12f   : > { %v1481_v31 = vadd.f32 %v1467_v47, %v1351_v12 }
 0x130   : > { %v1078_v10 = vpop.f32.mrf.mxu1 }
 0x131   : > { %v1513_v32 = vadd.f32 %v1505_v30, %v1481_v31  ;;  %v1091_v33 = vadd.f32 %v1078_v10, %v961_v29  ;;  %v1472_v0 = vpop.f32.mrf.mxu2 }
 0x132   : > { %v1469_v49 = vpop.f32.mrf.mxu0 }
 0x133   : > { %1521 = vst [vmem:[%s2608_s19 + $0x20] sm:$0xff] %v1513_v32  ;;  %v1222_v22 = vadd.f32 %v1209_v1, %v1091_v33 }
 0x135   : > { %v1352_v34 = vadd.f32 %v1339_v27, %v1222_v22 }
 0x137   : > { %v1482_v40 = vadd.f32 %v1469_v49, %v1352_v34 }
 0x138   : > { %v1081_v16 = vpop.f32.mrf.mxu1 }
 0x139   : > { %v1514_v39 = vadd.f32 %v1506_v37, %v1482_v40  ;;  %v1092_v41 = vadd.f32 %v1081_v16, %v962_v38  ;;  %v1474_v61 = vpop.f32.mrf.mxu2 }
 0x13b   : > { %1522 = vst [vmem:[%s2608_s19 + $0x28] sm:$0xff] %v1514_v39  ;;  %v1223_v11 = vadd.f32 %v1212_v23, %v1092_v41 }
 0x13d   : > { %v1353_v48 = vadd.f32 %v1342_v43, %v1223_v11 }
 0x13f   : > { %v1483_v53 = vadd.f32 %v1472_v0, %v1353_v48 }
 0x140   : > { %v1083_v19 = vpop.f32.mrf.mxu1 }
 0x141   : > { %v1515_v55 = vadd.f32 %v1507_v51, %v1483_v53  ;;  %v1093_v56 = vadd.f32 %v1083_v19, %v963_v52 }
 0x143   : > { %1523 = vst [vmem:[%s2608_s19 + $0x30] sm:$0xff] %v1515_v55  ;;  %v1224_v57 = vadd.f32 %v1214_v35, %v1093_v56 }
 0x145   : > { %v1354_v58 = vadd.f32 %v1344_v9, %v1224_v57 }
 0x147   : > { %v1484_v21 = vadd.f32 %v1474_v61, %v1354_v58 }
 0x149   : > { %v1516_v59 = vadd.f32 %v1508_v62, %v1484_v21 }
 0x14b   : > { %1524 = vst [vmem:[%s2608_s19 + $0x38] sm:$0xff] %v1516_v59 }
 0x14c PF: > { %s15_s18 = sadd.s32 1, %s2136_s18  }
 0x14d   : > { %p12_p4 = scmp.ge.s32.totalorder %s15_s18, 4  }
 0x14f   :  { %14 = sbr.rel (!%p12_p4) target bundleno = 1 (0x1), region = 84 }

// kernel: preact_block_forward.4
= control target key start
LH: loop header
LB: loop body
LE: loop exit
PB: predicated region body
PF: predicated region fallthrough
CT: control target
= control target key end

     0   :  { %s2680_s24 = smov 0   ;;  %s3356_s0 = inlined_call_operand.vmem [shape: f32[2,4,9,9,128], index: 0, kind: input, shape index: {}]   ;;  %s3357_s1 = inlined_call_operand.vmem [shape: f32[1,128], index: 1, kind: input, shape index: {}]   ;;  %s3358_s2 = inlined_call_operand.vmem [shape: f32[1,128], index: 2, kind: input, shape index: {}]   ;;  %s3359_s3 = inlined_call_operand.vmem [shape: bf16[9,128,128], index: 3, kind: input, shape index: {}]   ;;  %s3360_s4 = inlined_call_operand.vmem [shape: bf16[128,128], index: 4, kind: input, shape index: {}]   ;;  %s3361_s5 = inlined_call_operand.vmem [shape: f32[2,10,10,128], index: 5, kind: output, shape index: {0}]   ;;  %s3362_s6 = inlined_call_operand.vmem [shape: f32[2,8,8,128], index: 6, kind: output, shape index: {1}]   ;;  %s3363_s7 = inlined_call_operand.vmem [shape: f32[2,2,128], index: 7, kind: output, shape index: {2}]  }
   0x1 LB: > { %s2021_s25 = sadd.s32 4294967295, %s2637_s24   ;;  %p2025_p0 = scmp.ge.s32.totalorder %s2637_s24, 1  ;;  %s2637_s24 = sphi %s2680_s24, %s18_s24  }
   0x2   : > { %p242_p1 = scmp.lt.s32.totalorder %s2637_s24, 3 }
   0x4   : > { %p243_p2 = pnand %p2025_p0, %p242_p1 }
   0x5   : > { %p283_p3 = scmp.lt.s32.totalorder (!%p243_p2), %s2021_s25, 1 }
   0x6   : > { %246 = sbr.rel (%p243_p2) target bundleno = 362 (0x16a), region = 40 }
   0xb   : > { %v2529_v0 = vld [vmem:[%s3359_s3 + $0x38] sm:$0xff]  ;;  %v2639_v2 = vmov 0.0   ;;  %v2528_v3 = vld [vmem:[%s3359_s3 + $0x30] sm:$0xff]  ;;  %s3365_s25 = smov (!%p283_p3, %s2021_s25), 1  ;;  %v2527_v5 = vld [vmem:[%s3359_s3 + $0x28] sm:$0xff] }
   0xc   : > { %v2537_v1 = vld [vmem:[%s3359_s3 + $0x78] sm:$0xff]  ;;  %312 = vst [vmem:[#allocation2 + $0x40] sm:$0xff] %v2639_v2  ;;  %2602 = vmatpush.bf16.msra.mxu2 %v2529_v0  ;;  %v2536_v4 = vld [vmem:[%s3359_s3 + $0x70] sm:$0xff]  ;;  %642 = vmatpush.bf16.msra.mxu0 %v2529_v0  ;;  %s2618_s13 = smul.u32 576, %s3365_s25  ;;  %v2535_v6 = vld [vmem:[%s3359_s3 + $0x68] sm:$0xff]  ;;  %s2030_s17 = sshll.u32 %s3365_s25, 1 }
   0xd   : > { %2610 = vmatpush.bf16.msra.mxu3 %v2537_v1  ;;  %313 = vst [vmem:[#allocation2 + $0x48] sm:$0x1] %v2639_v2  ;;  %773 = vmatpush.bf16.msra.mxu1 %v2537_v1  ;;  %v2722_v7 = vld [vmem:[%s3357_s1] ss:$0 sm:$0xff]  ;;  %v2525_v19 = vld [vmem:[%s3359_s3 + $0x18] sm:$0xff]  ;;  %v2524_v25 = vld [vmem:[%s3359_s3 + $0x10] sm:$0xff]  ;;  %s301_s21 = scalar_lea.vmem %s3363_s7, %s2030_s17 }
   0xe   : > { %314 = vst [vmem:[#allocation2 + $0x50] sm:$0xff] %v2639_v2  ;;  %s2717_s18 = scalar_lea.vmem %s3356_s0, %s2618_s13  ;;  %v2727_v8 = vld [vmem:[%s3358_s2] ss:$0 sm:$0xff]  ;;  %v2533_v20 = vld [vmem:[%s3359_s3 + $0x58] sm:$0xff]  ;;  %v2532_v26 = vld [vmem:[%s3359_s3 + $0x50] sm:$0xff]  ;;  %s2619_s10 = smul.u32 160, %s3365_s25 }
   0xf   : > { %315 = vst [vmem:[#allocation2 + $0x58] sm:$0x1] %v2639_v2  ;;  %v2034_v9 = vld [vmem:[%s2717_s18 + $0x41] sm:$0xff]  ;;  %v2035_v10 = vld [vmem:[%s2717_s18 + $0x51] sm:$0xff] }
  0x10   : > { %304 = vst [vmem:[#allocation2] sm:$0xff] %v2639_v2  ;;  %2603 = vmatpush.bf16.msra.mxu2 %v2528_v3  ;;  %643 = vmatpush.bf16.msra.mxu0 %v2528_v3  ;;  %v391_v11 = vmul.f32 %v2722_v7, %v2034_v9  ;;  %v392_v12 = vmul.f32 %v2722_v7, %v2035_v10  ;;  %v2526_v13 = vld [vmem:[%s3359_s3 + $0x20] sm:$0xff]  ;;  %v2042_v21 = vld [vmem:[%s2717_s18 + $0xd0] sm:$0xff]  ;;  %v2523_v29 = vld [vmem:[%s3359_s3 + $0x8] sm:$0xff]  ;;  %s3216_s13 = scalar_lea.vmem %s3361_s5, %s2619_s10 }
  0x11   : > { %2611 = vmatpush.bf16.msra.mxu3 %v2536_v4  ;;  %305 = vst [vmem:[#allocation2 + $0x8] sm:$0x1] %v2639_v2  ;;  %774 = vmatpush.bf16.msra.mxu1 %v2536_v4  ;;  %v2534_v14 = vld [vmem:[%s3359_s3 + $0x60] sm:$0xff]  ;;  %v436_v23 = vmul.f32 %v2722_v7, %v2042_v21  ;;  %v2531_v30 = vld [vmem:[%s3359_s3 + $0x48] sm:$0xff]  ;;  %v2545_v37 = vld [vmem:[%s3359_s3 + $0xb8] sm:$0xff] }
  0x12   : > { %306 = vst [vmem:[#allocation2 + $0x10] sm:$0xff] %v2639_v2  ;;  %v2743_v15 = vadd.f32 %v2727_v8, %v391_v11  ;;  %v2746_v16 = vadd.f32 %v2727_v8, %v392_v12  ;;  %v2043_v22 = vld [vmem:[%s2717_s18 + $0xe0] sm:$0xff]  ;;  %v2553_v38 = vld [vmem:[%s3359_s3 + $0xf8] sm:$0xff]  ;;  %v2544_v47 = vld [vmem:[%s3359_s3 + $0xb0] sm:$0xff] }
  0x13   : > { %308 = vst [vmem:[#allocation2 + $0x20] sm:$0xff] %v2639_v2  ;;  %v437_v24 = vmul.f32 %v2722_v7, %v2043_v22  ;;  %v2775_v27 = vadd.f32 %v2727_v8, %v436_v23  ;;  %v2522_v31 = vld [vmem:[%s3359_s3] sm:$0xff]  ;;  %v2561_v46 = vld [vmem:[%s3359_s3 + $0x138] sm:$0xff]  ;;  %v2552_v48 = vld [vmem:[%s3359_s3 + $0xf0] sm:$0xff] }
  0x14   : > { %2604 = vmatpush.bf16.msra.mxu2 %v2527_v5  ;;  %644 = vmatpush.bf16.msra.mxu0 %v2527_v5  ;;  %310 = vst [vmem:[#allocation2 + $0x30] sm:$0xff] %v2639_v2  ;;  %v410_v17 = vmax.f32 %v2743_v15, 0.0  ;;  %v411_v18 = vmax.f32 %v2746_v16, 0.0  ;;  %v2530_v34 = vld [vmem:[%s3359_s3 + $0x40] sm:$0xff]  ;;  %v2569_v49 = vld [vmem:[%s3360_s4 + $0x38] sm:$0xff]  ;;  %v2560_v50 = vld [vmem:[%s3359_s3 + $0x130] sm:$0xff] }
  0x15   : > { %2612 = vmatpush.bf16.msra.mxu3 %v2535_v6  ;;  %775 = vmatpush.bf16.msra.mxu1 %v2535_v6  ;;  %316 = vst [vmem:[#allocation2 + $0x60] sm:$0xff] %v2639_v2  ;;  %v2778_v28 = vadd.f32 %v2727_v8, %v437_v24  ;;  %v452_v32 = vmax.f32 %v2775_v27, 0.0  ;;  %v2039_v41 = vld [vmem:[%s2717_s18 + $0xa0] sm:$0xff]  ;;  %v2543_v51 = vld [vmem:[%s3359_s3 + $0xa8] sm:$0xff]  ;;  %v2568_v53 = vld [vmem:[%s3360_s4 + $0x30] sm:$0xff] }
  0x16   : > { %419 = vst [vmem:[#allocation2 + $0x41] sm:$0xff] %v410_v17  ;;  %v433_v42 = vmul.f32 %v2722_v7, %v2039_v41  ;;  %v2551_v52 = vld [vmem:[%s3359_s3 + $0xe8] sm:$0xff]  ;;  %v2044_v54 = vld [vmem:[%s2717_s18 + $0xf0] sm:$0xff]  ;;  %v2045_v55 = vld [vmem:[%s2717_s18 + $0x100] sm:$0xff] }
  0x17   : > { %420 = vst [vmem:[#allocation2 + $0x51] sm:$0xff] %v411_v18  ;;  %v453_v33 = vmax.f32 %v2778_v28, 0.0  ;;  %v2559_v56 = vld [vmem:[%s3359_s3 + $0x128] sm:$0xff]  ;;  %v438_v57 = vmul.f32 %v2722_v7, %v2044_v54  ;;  %v439_v58 = vmul.f32 %v2722_v7, %v2045_v55  ;;  %v2031_v59 = vld [vmem:[%s2717_s18 + $0x11] sm:$0xff]  ;;  %v2542_v60 = vld [vmem:[%s3359_s3 + $0xa0] sm:$0xff] }
  0x18   : > { %2605 = vmatpush.bf16.msra.mxu2 %v2526_v13  ;;  %645 = vmatpush.bf16.msra.mxu0 %v2526_v13  ;;  %318 = vst [vmem:[#allocation2 + $0x70] sm:$0xff] %v2639_v2  ;;  %v2809_v43 = vadd.f32 %v2727_v8, %v433_v42  ;;  %v2550_v61 = vld [vmem:[%s3359_s3 + $0xe0] sm:$0xff]  ;;  %v2567_v62 = vld [vmem:[%s3360_s4 + $0x28] sm:$0xff]  ;;  %v2040_v1 = vld [vmem:[%s2717_s18 + $0xb0] sm:$0xff]  ;;  %v388_v12 = vmul.f32 %v2722_v7, %v2031_v59 }
  0x19   : > { %2613 = vmatpush.bf16.msra.mxu3 %v2534_v14  ;;  %776 = vmatpush.bf16.msra.mxu1 %v2534_v14  ;;  %320 = vst [vmem:[#allocation2 + $0x80] sm:$0xff] %v2639_v2  ;;  %v698_v40 = vpack.c.bf16 %v453_v33, %v452_v32  ;;  %v2863_v63 = vadd.f32 %v2727_v8, %v438_v57  ;;  %v2041_v3 = vld [vmem:[%s2717_s18 + $0xc0] sm:$0xff]  ;;  %v2037_v13 = vld [vmem:[%s2717_s18 + $0x71] sm:$0xff] }
  0x1a   : > { %340 = vst [vmem:[#allocation2 + $0x120] sm:$0xff] %v2639_v2  ;;  %v449_v44 = vmax.f32 %v2809_v43, 0.0  ;;  %v2866_v0 = vadd.f32 %v2727_v8, %v439_v58  ;;  %v434_v4 = vmul.f32 %v2722_v7, %v2040_v1  ;;  %v435_v5 = vmul.f32 %v2722_v7, %v2041_v3  ;;  %v2558_v6 = vld [vmem:[%s3359_s3 + $0x120] sm:$0xff]  ;;  %v2541_v14 = vld [vmem:[%s3359_s3 + $0x98] sm:$0xff]  ;;  %v2555_v58 = vld [vmem:[%s3359_s3 + $0x108] sm:$0xff] }
  0x1b   : > { %342 = vst [vmem:[#allocation2 + $0x130] sm:$0xff] %v2639_v2  ;;  %v2036_v9 = vld [vmem:[%s2717_s18 + $0x61] sm:$0xff]  ;;  %v454_v10 = vmax.f32 %v2863_v63, 0.0  ;;  %v2565_v41 = vld [vmem:[%s3360_s4 + $0x18] sm:$0xff] }
  0x1c   : > { %2606 = vmatpush.bf16.msra.mxu2 %v2525_v19  ;;  %646 = vmatpush.bf16.msra.mxu0 %v2525_v19  ;;  %344 = vst [vmem:[#allocation2 + $0x140] sm:$0xff] %v2639_v2  ;;  %v696_v45 = vpack.c.bf16 %v449_v44, %v2639_v2  ;;  %v455_v11 = vmax.f32 %v2866_v0, 0.0  ;;  %v2549_v19 = vld [vmem:[%s3359_s3 + $0xd8] sm:$0xff]  ;;  %v2890_v21 = vadd.f32 %v2727_v8, %v435_v5  ;;  %v2566_v23 = vld [vmem:[%s3360_s4 + $0x20] sm:$0xff]  ;;  %v2563_v5 = vld [vmem:[%s3360_s4 + $0x8] sm:$0xff] }
  0x1d   : > { %2614 = vmatpush.bf16.msra.mxu3 %v2533_v20  ;;  %777 = vmatpush.bf16.msra.mxu1 %v2533_v20  ;;  %v562_v35 = vld [vmem:[#allocation2 + $0x40] sm:$0xff]  ;;  %346 = vst [vmem:[#allocation2 + $0x150] sm:$0xff] %v2639_v2  ;;  %v2887_v20 = vadd.f32 %v2727_v8, %v434_v4  ;;  %v393_v24 = vmul.f32 %v2722_v7, %v2036_v9 }
  0x1e   : > { %v563_v36 = vld [vmem:[#allocation2 + $0x50] sm:$0xff]  ;;  %348 = vst [vmem:[#allocation2 + $0x160] sm:$0xff] %v2639_v2  ;;  %v699_v22 = vpack.c.bf16 %v455_v11, %v454_v10  ;;  %v2546_v1 = vld [vmem:[%s3359_s3 + $0xc0] sm:$0xff] }
  0x1f   : > { %v568_v39 = vpack.c.bf16 %v563_v36, %v562_v35  ;;  %350 = vst [vmem:[#allocation2 + $0x170] sm:$0xff] %v2639_v2  ;;  %v2557_v36 = vld [vmem:[%s3359_s3 + $0x118] sm:$0xff] }
  0x20   : > { %2607 = vmatpush.bf16.msra.mxu2 %v2524_v25  ;;  %647 = vmatpush.bf16.msra.mxu0 %v2524_v25  ;;  %352 = vst [vmem:[#allocation2 + $0x180] sm:$0xff] %v2639_v2  ;;  %v450_v25 = vmax.f32 %v2887_v20, 0.0 }
  0x21   : > { %2615 = vmatpush.bf16.msra.mxu3 %v2532_v26  ;;  %778 = vmatpush.bf16.msra.mxu1 %v2532_v26  ;;  %354 = vst [vmem:[#allocation2 + $0x190] sm:$0xff] %v2639_v2  ;;  %v451_v26 = vmax.f32 %v2890_v21, 0.0 }
  0x22   : > { %1873 = vst [vmem:[%s3216_s13] sm:$0xff] %v2639_v2 }
  0x23   : > { %v697_v35 = vpack.c.bf16 %v451_v26, %v450_v25  ;;  %1874 = vst [vmem:[%s3216_s13 + $0x8] sm:$0x3] %v2639_v2 }
  0x24   : > { %2608 = vmatpush.bf16.msra.mxu2 %v2523_v29  ;;  %648 = vmatpush.bf16.msra.mxu0 %v2523_v29  ;;  %v394_v29 = vmul.f32 %v2722_v7, %v2037_v13  ;;  %1875 = vst [vmem:[%s3216_s13 + $0x10] sm:$0xff] %v2639_v2 }
  0x25   : > { %2616 = vmatpush.bf16.msra.mxu3 %v2531_v30  ;;  %779 = vmatpush.bf16.msra.mxu1 %v2531_v30  ;;  %v2032_v30 = vld [vmem:[%s2717_s18 + $0x21] sm:$0xff]  ;;  %1876 = vst [vmem:[%s3216_s13 + $0x18] sm:$0x3] %v2639_v2 }
  0x26   : > { %v405_v42 = vadd.f32 %v2727_v8, %v394_v29  ;;  %1891 = vst [vmem:[%s3216_s13 + $0x90] sm:$0xff] %v2639_v2 }
  0x27   : > { %1892 = vst [vmem:[%s3216_s13 + $0x98] sm:$0x3] %v2639_v2 }
  0x28   : > { %2609 = vmatpush.bf16.msra.mxu2 %v2522_v31  ;;  %649 = vmatpush.bf16.msra.mxu0 %v2522_v31  ;;  %v399_v31 = vadd.f32 %v2727_v8, %v388_v12  ;;  %1877 = vst [vmem:[%s3216_s13 + $0x20] sm:$0xff] %v2639_v2 }
  0x29   : > { %2617 = vmatpush.bf16.msra.mxu3 %v2530_v34  ;;  %780 = vmatpush.bf16.msra.mxu1 %v2530_v34  ;;  %v2033_v34 = vld [vmem:[%s2717_s18 + $0x31] sm:$0xff]  ;;  %1878 = vst [vmem:[%s3216_s13 + $0x28] sm:$0x3] %v2639_v2 }
  0x2a   : > { %1879 = vst [vmem:[%s3216_s13 + $0x30] sm:$0xff] %v2639_v2 }
  0x2b   : > { %660 = vmatmul.bf16.vlgmr.msra.gmra.mxu2 %v568_v39  ;;  %v2540_v39 = vld [vmem:[%s3359_s3 + $0x90] sm:$0xff]  ;;  %1880 = vst [vmem:[%s3216_s13 + $0x38] sm:$0x3] %v2639_v2 }
  0x2c   : > { %903 = vmatpush.bf16.msrb.mxu2 %v2545_v37  ;;  %791 = vmatmul.bf16.vlgmr.msra.gmra.mxu3 %v698_v40  ;;  %v404_v37 = vadd.f32 %v2727_v8, %v393_v24  ;;  %v2548_v40 = vld [vmem:[%s3359_s3 + $0xd0] sm:$0xff]  ;;  %v2562_v24 = vld [vmem:[%s3360_s4] sm:$0xff]  ;;  %1881 = vst [vmem:[%s3216_s13 + $0x40] sm:$0xff] %v2639_v2 }
  0x2d   : > { %1033 = vmatpush.bf16.msrb.mxu3 %v2553_v38  ;;  %781 = vmatmul.bf16.vlgmr.msra.gmra.mxu1 %v696_v45  ;;  %v389_v38 = vmul.f32 %v2722_v7, %v2032_v30  ;;  %v390_v45 = vmul.f32 %v2722_v7, %v2033_v34  ;;  %1882 = vst [vmem:[%s3216_s13 + $0x48] sm:$0x3] %v2639_v2 }
  0x2e   : > { %1163 = vmatpush.bf16.msrb.mxu0 %v2561_v46  ;;  %1272 = vmatpush.bf16.msrb.mxu1 %v2569_v49  ;;  %v2556_v46 = vld [vmem:[%s3359_s3 + $0x110] sm:$0xff]  ;;  %v2539_v49 = vld [vmem:[%s3359_s3 + $0x88] sm:$0xff]  ;;  %1883 = vst [vmem:[%s3216_s13 + $0x50] sm:$0xff] %v2639_v2 }
  0x2f   : > { %v400_v54 = vadd.f32 %v2727_v8, %v389_v38  ;;  %v401_v57 = vadd.f32 %v2727_v8, %v390_v45  ;;  %1884 = vst [vmem:[%s3216_s13 + $0x58] sm:$0x3] %v2639_v2 }
  0x30   : > { %904 = vmatpush.bf16.msrb.mxu2 %v2544_v47  ;;  %v2047_v47 = vld [vmem:[%s2717_s18 + $0x121] sm:$0xff]  ;;  %1885 = vst [vmem:[%s3216_s13 + $0x60] sm:$0xff] %v2639_v2 }
  0x31   : > { %1034 = vmatpush.bf16.msrb.mxu3 %v2552_v48  ;;  %v2930_v48 = vmax.f32 %v399_v31, 0.0  ;;  %v475_v55 = vmul.f32 %v2722_v7, %v2047_v47  ;;  %v2971_v9 = vmax.f32 %v400_v54, 0.0  ;;  %v2576_v47 = vld [vmem:[%s3359_s3 + $0x170] sm:$0xff]  ;;  %v2601_v54 = vld [vmem:[%s3359_s3 + $0x238] sm:$0xff]  ;;  %1886 = vst [vmem:[%s3216_s13 + $0x68] sm:$0x3] %v2639_v2 }
  0x32   : > { %1164 = vmatpush.bf16.msrb.mxu0 %v2560_v50  ;;  %1273 = vmatpush.bf16.msrb.mxu1 %v2568_v53  ;;  %v2547_v50 = vld [vmem:[%s3359_s3 + $0xc8] sm:$0xff]  ;;  %v2942_v53 = vmax.f32 %v404_v37, 0.0  ;;  %v2050_v37 = vld [vmem:[%s2717_s18 + $0x151] sm:$0xff]  ;;  %1887 = vst [vmem:[%s3216_s13 + $0x70] sm:$0xff] %v2639_v2 }
  0x33   : > { %416 = vst [vmem:[#allocation2 + $0x11] sm:$0xff] %v2930_v48  ;;  %v2974_v12 = vadd.f32 %v2727_v8, %v475_v55  ;;  %v2584_v55 = vld [vmem:[%s3359_s3 + $0x1b0] sm:$0xff] }
  0x34   : > { %905 = vmatpush.bf16.msrb.mxu2 %v2543_v51  ;;  %v2048_v51 = vld [vmem:[%s2717_s18 + $0x131] sm:$0xff]  ;;  %421 = vst [vmem:[#allocation2 + $0x61] sm:$0xff] %v2942_v53 }
  0x35   : > { %1035 = vmatpush.bf16.msrb.mxu3 %v2551_v52  ;;  %v2564_v52 = vld [vmem:[%s3360_s4 + $0x10] sm:$0xff]  ;;  %v476_v59 = vmul.f32 %v2722_v7, %v2048_v51  ;;  %417 = vst [vmem:[#allocation2 + $0x21] sm:$0xff] %v2971_v9  ;;  %v491_v29 = vmax.f32 %v2974_v12, 0.0 }
  0x36   : > { %1165 = vmatpush.bf16.msrb.mxu0 %v2559_v56  ;;  %1274 = vmatpush.bf16.msrb.mxu1 %v2567_v62  ;;  %v2946_v56 = vmax.f32 %v405_v42, 0.0  ;;  %v2538_v62 = vld [vmem:[%s3359_s3 + $0x80] sm:$0xff]  ;;  %1888 = vst [vmem:[%s3216_s13 + $0x78] sm:$0x3] %v2639_v2 }
  0x37   : > { %500 = vst [vmem:[#allocation2 + $0x121] sm:$0xff] %v491_v29 }
  0x38   : > { %906 = vmatpush.bf16.msrb.mxu2 %v2542_v60  ;;  %v2055_v60 = vld [vmem:[%s2717_s18 + $0x1b0] sm:$0xff]  ;;  %422 = vst [vmem:[#allocation2 + $0x71] sm:$0xff] %v2946_v56 }
  0x39   : > { %1036 = vmatpush.bf16.msrb.mxu3 %v2550_v61  ;;  %v2056_v61 = vld [vmem:[%s2717_s18 + $0x1c0] sm:$0xff]  ;;  %v517_v3 = vmul.f32 %v2722_v7, %v2055_v60  ;;  %v2575_v60 = vld [vmem:[%s3359_s3 + $0x168] sm:$0xff]  ;;  %1889 = vst [vmem:[%s3216_s13 + $0x80] sm:$0xff] %v2639_v2 }
  0x3a   : > { %1166 = vmatpush.bf16.msrb.mxu0 %v2558_v6  ;;  %1275 = vmatpush.bf16.msrb.mxu1 %v2566_v23  ;;  %v518_v4 = vmul.f32 %v2722_v7, %v2056_v61  ;;  %v2577_v6 = vld [vmem:[%s3359_s3 + $0x178] sm:$0xff]  ;;  %v2985_v23 = vadd.f32 %v2727_v8, %v476_v59  ;;  %v2992_v34 = vld [vmem:[#allocation2 + $0x10] sm:$0xff]  ;;  %v2058_v61 = vld [vmem:[%s2717_s18 + $0x1e0] sm:$0xff]  ;;  %1890 = vst [vmem:[%s3216_s13 + $0x88] sm:$0x3] %v2639_v2 }
  0x3b   : > { %v525_v13 = vadd.f32 %v2727_v8, %v517_v3  ;;  %v566_v38 = vpack.c.bf16 %v2992_v34, %v2639_v2  ;;  %v2057_v59 = vld [vmem:[%s2717_s18 + $0x1d0] sm:$0xff] }
  0x3c   : > { %796 = vmatmul.bf16.gmra.mxu3 %v699_v22  ;;  %907 = vmatpush.bf16.msrb.mxu2 %v2541_v14  ;;  %v526_v14 = vadd.f32 %v2727_v8, %v518_v4  ;;  %v2554_v22 = vld [vmem:[%s3359_s3 + $0x100] sm:$0xff] }
  0x3d   : > { %1037 = vmatpush.bf16.msrb.mxu3 %v2549_v19  ;;  %786 = vmatmul.bf16.gmra.mxu1 %v697_v35  ;;  %v2979_v19 = vmax.f32 %v401_v57, 0.0  ;;  %v533_v30 = vmax.f32 %v525_v13, 0.0  ;;  %v492_v35 = vmax.f32 %v2985_v23, 0.0 }
  0x3e   : > { %1167 = vmatpush.bf16.msrb.mxu0 %v2557_v36  ;;  %1276 = vmatpush.bf16.msrb.mxu1 %v2565_v41  ;;  %v534_v31 = vmax.f32 %v526_v14, 0.0  ;;  %v2049_v36 = vld [vmem:[%s2717_s18 + $0x141] sm:$0xff] }
  0x3f   : > { %418 = vst [vmem:[#allocation2 + $0x31] sm:$0xff] %v2979_v19  ;;  %v3002_v41 = vld [vmem:[#allocation2 + $0x60] sm:$0xff]  ;;  %650 = vmatmul.bf16.vlgmr.msra.gmra.mxu0 %v566_v38  ;;  %v3004_v42 = vld [vmem:[#allocation2 + $0x70] sm:$0xff]  ;;  %v1317_v15 = vpack.c.bf16 %v492_v35, %v491_v29  ;;  %v2595_v29 = vld [vmem:[%s3359_s3 + $0x208] sm:$0xff] }
  0x40   : > { %908 = vmatpush.bf16.msrb.mxu2 %v2540_v39  ;;  %v477_v39 = vmul.f32 %v2722_v7, %v2049_v36  ;;  %v3008_v45 = vpack.c.bf16 %v534_v31, %v533_v30  ;;  %v569_v51 = vpack.c.bf16 %v3004_v42, %v3002_v41  ;;  %501 = vst [vmem:[#allocation2 + $0x131] sm:$0xff] %v492_v35  ;;  %v948_v4 = vld [vmem:[#allocation2 + $0x120] sm:$0xff]  ;;  %v2052_v38 = vld [vmem:[%s2717_s18 + $0x171] sm:$0xff] }
  0x41   : > { %1038 = vmatpush.bf16.msrb.mxu3 %v2548_v40  ;;  %v478_v40 = vmul.f32 %v2722_v7, %v2050_v37  ;;  %v3051_v14 = vld [vmem:[#allocation2 + $0x20] sm:$0xff] }
  0x42   : > { %1168 = vmatpush.bf16.msrb.mxu0 %v2556_v46  ;;  %1277 = vmatpush.bf16.msrb.mxu1 %v2564_v52  ;;  %v2585_v46 = vld [vmem:[%s3359_s3 + $0x1b8] sm:$0xff]  ;;  %v818_v36 = vld [vmem:[#allocation2 + $0x1] sm:$0xff] }
  0x43   : > { %v2593_v52 = vld [vmem:[%s3359_s3 + $0x1f8] sm:$0xff]  ;;  %665 = vmatmul.bf16.gmra.mxu2 %v569_v51  ;;  %v2051_v37 = vld [vmem:[%s2717_s18 + $0x161] sm:$0xff]  ;;  %v2592_v51 = vld [vmem:[%s3359_s3 + $0x1f0] sm:$0xff] }
  0x44   : > { %909 = vmatpush.bf16.msrb.mxu2 %v2539_v49  ;;  %v3017_v49 = vadd.f32 %v2727_v8, %v477_v39  ;;  %v479_v39 = vmul.f32 %v2722_v7, %v2051_v37  ;;  %v2586_v35 = vld [vmem:[%s3359_s3 + $0x1c0] sm:$0xff] }
  0x45   : > { %1039 = vmatpush.bf16.msrb.mxu3 %v2547_v50  ;;  %v3020_v50 = vadd.f32 %v2727_v8, %v478_v40  ;;  %v480_v40 = vmul.f32 %v2722_v7, %v2052_v38 }
  0x46   : > { %1169 = vmatpush.bf16.msrb.mxu0 %v2555_v58  ;;  %1278 = vmatpush.bf16.msrb.mxu1 %v2563_v5  ;;  %v493_v57 = vmax.f32 %v3017_v49, 0.0  ;;  %v1577_v49 = vpack.c.bf16 %v450_v25, %v449_v44 }
  0x47   : > { %v494_v58 = vmax.f32 %v3020_v50, 0.0 }
  0x48   : > { %910 = vmatpush.bf16.msrb.mxu2 %v2538_v62  ;;  %502 = vst [vmem:[#allocation2 + $0x141] sm:$0xff] %v493_v57  ;;  %v519_v62 = vmul.f32 %v2722_v7, %v2057_v59 }
  0x49   : > { %1040 = vmatpush.bf16.msrb.mxu3 %v2546_v1  ;;  %503 = vst [vmem:[#allocation2 + $0x151] sm:$0xff] %v494_v58  ;;  %v520_v1 = vmul.f32 %v2722_v7, %v2058_v61  ;;  %v2582_v61 = vld [vmem:[%s3359_s3 + $0x1a0] sm:$0xff] }
  0x4a   : > { %1170 = vmatpush.bf16.msrb.mxu0 %v2554_v22  ;;  %1279 = vmatpush.bf16.msrb.mxu1 %v2562_v24  ;;  %v527_v3 = vadd.f32 %v2727_v8, %v519_v62  ;;  %v3053_v22 = vld [vmem:[#allocation2 + $0x30] sm:$0xff]  ;;  %v2591_v62 = vld [vmem:[%s3359_s3 + $0x1e8] sm:$0xff] }
  0x4b   : > { %v528_v5 = vadd.f32 %v2727_v8, %v520_v1  ;;  %v567_v31 = vpack.c.bf16 %v3053_v22, %v3051_v14 }
  0x4c   : > { %1394 = vmatpush.bf16.msra.mxu2 %v2577_v6  ;;  %v949_v6 = vld [vmem:[#allocation2 + $0x130] sm:$0xff]  ;;  %v535_v13 = vmax.f32 %v527_v3, 0.0 }
  0x4d   : > { %1524 = vmatpush.bf16.msra.mxu3 %v2585_v46  ;;  %1280 = vmatmul.bf16.vlgmr.msrb.gmra.mxu1 %v3008_v45  ;;  %v956_v24 = vpack.c.bf16 %v949_v6, %v948_v4  ;;  %v536_v30 = vmax.f32 %v528_v5, 0.0  ;;  %v826_v46 = vpack.c.bf16 %v2930_v48, %v818_v36  ;;  %v2059_v5 = vld [vmem:[%s2717_s18 + $0x1f0] sm:$0xff]  ;;  %v2060_v6 = vld [vmem:[%s2717_s18 + $0x200] sm:$0xff] }
  0x4e   : > { %1654 = vmatpush.bf16.msra.mxu0 %v2593_v52  ;;  %1784 = vmatpush.bf16.msra.mxu1 %v2601_v54  ;;  %v2600_v52 = vld [vmem:[%s3359_s3 + $0x230] sm:$0xff]  ;;  %v3072_v54 = vadd.f32 %v2727_v8, %v479_v39  ;;  %v522_v36 = vmul.f32 %v2722_v7, %v2060_v6 }
  0x4f   : > { %1041 = vmatmul.bf16.vlgmr.msrb.gmra.mxu3 %v956_v24  ;;  %655 = vmatmul.bf16.gmra.mxu0 %v567_v31  ;;  %v3077_v59 = vpack.c.bf16 %v536_v30, %v535_v13  ;;  %v950_v4 = vld [vmem:[#allocation2 + $0x140] sm:$0xff]  ;;  %v2599_v24 = vld [vmem:[%s3359_s3 + $0x228] sm:$0xff]  ;;  %v2573_v30 = vld [vmem:[%s3359_s3 + $0x158] sm:$0xff]  ;;  %v521_v31 = vmul.f32 %v2722_v7, %v2059_v5 }
  0x50   : > { %1395 = vmatpush.bf16.msra.mxu2 %v2576_v47  ;;  %v2583_v47 = vld [vmem:[%s3359_s3 + $0x1a8] sm:$0xff]  ;;  %v495_v1 = vmax.f32 %v3072_v54, 0.0  ;;  %v951_v13 = vld [vmem:[#allocation2 + $0x150] sm:$0xff]  ;;  %v530_v38 = vadd.f32 %v2727_v8, %v522_v36  ;;  %v2598_v5 = vld [vmem:[%s3359_s3 + $0x220] sm:$0xff] }
  0x51   : > { %1525 = vmatpush.bf16.msra.mxu3 %v2584_v55  ;;  %v3075_v55 = vadd.f32 %v2727_v8, %v480_v40  ;;  %v529_v37 = vadd.f32 %v2727_v8, %v521_v31  ;;  %v957_v39 = vpack.c.bf16 %v951_v13, %v950_v4  ;;  %v2590_v4 = vld [vmem:[%s3359_s3 + $0x1e0] sm:$0xff]  ;;  %v2589_v31 = vld [vmem:[%s3359_s3 + $0x1d8] sm:$0xff] }
  0x52   : > { %1655 = vmatpush.bf16.msra.mxu0 %v2592_v51  ;;  %1785 = vmatpush.bf16.msra.mxu1 %v2600_v52  ;;  %504 = vst [vmem:[#allocation2 + $0x161] sm:$0xff] %v495_v1  ;;  %v2054_v51 = vld [vmem:[%s2717_s18 + $0x191] sm:$0xff] }
  0x53   : > { %v496_v3 = vmax.f32 %v3075_v55, 0.0  ;;  %911 = vmatmul.bf16.vlgmr.msrb.gmra.mxu2 %v826_v46  ;;  %v537_v40 = vmax.f32 %v529_v37, 0.0  ;;  %v538_v46 = vmax.f32 %v530_v38, 0.0 }
  0x54   : > { %1396 = vmatpush.bf16.msra.mxu2 %v2575_v60  ;;  %v2574_v60 = vld [vmem:[%s3359_s3 + $0x160] sm:$0xff] }
  0x55   : > { %1526 = vmatpush.bf16.msra.mxu3 %v2583_v47  ;;  %505 = vst [vmem:[#allocation2 + $0x171] sm:$0xff] %v496_v3  ;;  %v2053_v47 = vld [vmem:[%s2717_s18 + $0x181] sm:$0xff] }
  0x56   : > { %1656 = vmatpush.bf16.msra.mxu0 %v2591_v62  ;;  %1786 = vmatpush.bf16.msra.mxu1 %v2599_v24  ;;  %v481_v52 = vmul.f32 %v2722_v7, %v2053_v47  ;;  %v2581_v62 = vld [vmem:[%s3359_s3 + $0x198] sm:$0xff]  ;;  %v2572_v24 = vld [vmem:[%s3359_s3 + $0x150] sm:$0xff] }
  0x57   : > { %v2597_v47 = vld [vmem:[%s3359_s3 + $0x218] sm:$0xff] }
  0x58   : > { %1397 = vmatpush.bf16.msra.mxu2 %v2574_v60  ;;  %v482_v60 = vmul.f32 %v2722_v7, %v2054_v51  ;;  %v3124_v6 = vadd.f32 %v2727_v8, %v481_v52  ;;  %v2571_v51 = vld [vmem:[%s3359_s3 + $0x148] sm:$0xff] }
  0x59   : > { %1527 = vmatpush.bf16.msra.mxu3 %v2582_v61  ;;  %v827_v61 = vpack.c.bf16 %v2979_v19, %v2971_v9  ;;  %v952_v38 = vld [vmem:[#allocation2 + $0x160] sm:$0xff] }
  0x5a   : > { %v3127_v13 = vadd.f32 %v2727_v8, %v482_v60  ;;  %1657 = vmatpush.bf16.msra.mxu0 %v2590_v4  ;;  %v497_v36 = vmax.f32 %v3124_v6, 0.0  ;;  %1787 = vmatpush.bf16.msra.mxu1 %v2598_v5 }
  0x5c   : > { %1398 = vmatpush.bf16.msra.mxu2 %v2573_v30  ;;  %v2580_v30 = vld [vmem:[%s3359_s3 + $0x190] sm:$0xff]  ;;  %v498_v37 = vmax.f32 %v3127_v13, 0.0  ;;  %506 = vst [vmem:[#allocation2 + $0x181] sm:$0xff] %v497_v36 }
  0x5d   : > { %1285 = vmatmul.bf16.gmra.mxu1 %v3077_v59  ;;  %1528 = vmatpush.bf16.msra.mxu3 %v2581_v62 }
  0x5e   : > { %507 = vst [vmem:[#allocation2 + $0x191] sm:$0xff] %v498_v37  ;;  %1658 = vmatpush.bf16.msra.mxu0 %v2589_v31  ;;  %1788 = vmatpush.bf16.msra.mxu1 %v2597_v47  ;;  %v2588_v31 = vld [vmem:[%s3359_s3 + $0x1d0] sm:$0xff]  ;;  %v829_v47 = vpack.c.bf16 %v2946_v56, %v2942_v53 }
  0x5f   : > { %1046 = vmatmul.bf16.gmra.mxu3 %v957_v39  ;;  %1171 = vmatmul.bf16.vlgmr.msrb.gmra.mxu0 %v3008_v45  ;;  %v1088_v45 = vpack.c.bf16 %v538_v46, %v537_v40  ;;  %v2061_v39 = vld [vmem:[%s2717_s18 + $0x210] sm:$0xff]  ;;  %v2062_v40 = vld [vmem:[%s2717_s18 + $0x220] sm:$0xff] }
  0x60   : > { %v953_v46 = vld [vmem:[#allocation2 + $0x170] sm:$0xff]  ;;  %1399 = vmatpush.bf16.msra.mxu2 %v2572_v24  ;;  %v523_v52 = vmul.f32 %v2722_v7, %v2061_v39  ;;  %v524_v60 = vmul.f32 %v2722_v7, %v2062_v40  ;;  %v828_v39 = vpack.c.bf16 %v411_v18, %v410_v17  ;;  %v2570_v17 = vld [vmem:[%s3359_s3 + $0x140] sm:$0xff] }
  0x61   : > { %1529 = vmatpush.bf16.msra.mxu3 %v2580_v30  ;;  %v958_v4 = vpack.c.bf16 %v953_v46, %v952_v38  ;;  %v2579_v30 = vld [vmem:[%s3359_s3 + $0x188] sm:$0xff]  ;;  %v2596_v38 = vld [vmem:[%s3359_s3 + $0x210] sm:$0xff]  ;;  %v2578_v18 = vld [vmem:[%s3359_s3 + $0x180] sm:$0xff] }
  0x62   : > { %v532_v62 = vadd.f32 %v2727_v8, %v524_v60  ;;  %1659 = vmatpush.bf16.msra.mxu0 %v2588_v31  ;;  %1789 = vmatpush.bf16.msra.mxu1 %v2596_v38  ;;  %v2594_v46 = vld [vmem:[%s3359_s3 + $0x200] sm:$0xff]  ;;  %v1447_v60 = vpack.c.bf16 %v3051_v14, %v2992_v34 }
  0x63   : > { %916 = vmatmul.bf16.gmra.mxu2 %v827_v61  ;;  %v531_v61 = vadd.f32 %v2727_v8, %v523_v52  ;;  %v954_v12 = vld [vmem:[#allocation2 + $0x180] sm:$0xff]  ;;  %v1318_v52 = vpack.c.bf16 %v494_v58, %v493_v57  ;;  %v1703_v58 = vld [vmem:[#allocation2 + $0x51] sm:$0xff] }
  0x64   : > { %1400 = vmatpush.bf16.msra.mxu2 %v2571_v51  ;;  %v540_v24 = vmax.f32 %v532_v62, 0.0  ;;  %v1707_v51 = vpack.c.bf16 %v2971_v9, %v2930_v48  ;;  %v1442_v48 = vld [vmem:[#allocation2 + $0x40] sm:$0xff]  ;;  %v1709_v20 = vpack.c.bf16 %v2942_v53, %v1703_v58  ;;  %v1443_v53 = vld [vmem:[#allocation2 + $0x50] sm:$0xff] }
  0x65   : > { %v539_v5 = vmax.f32 %v531_v61, 0.0  ;;  %1530 = vmatpush.bf16.msra.mxu3 %v2579_v30  ;;  %v955_v23 = vld [vmem:[#allocation2 + $0x190] sm:$0xff]  ;;  %v1702_v61 = vld [vmem:[#allocation2 + $0x41] sm:$0xff]  ;;  %v1448_v9 = vpack.c.bf16 %v1442_v48, %v3053_v22  ;;  %v1449_v62 = vpack.c.bf16 %v3002_v41, %v1443_v53 }
  0x66   : > { %v959_v40 = vpack.c.bf16 %v955_v23, %v954_v12  ;;  %1790 = vmatpush.bf16.msra.mxu1 %v2595_v29  ;;  %v2038_v57 = vld [vmem:[%s2717_s18 + $0x81] sm:$0xff] }
  0x67   : > { %v1089_v16 = vpack.c.bf16 %v540_v24, %v539_v5  ;;  %v395_v34 = vmul.f32 %v2722_v7, %v2038_v57 }
  0x68   : > { %1401 = vmatpush.bf16.msra.mxu2 %v2570_v17 }
  0x69   : > { %1531 = vmatpush.bf16.msra.mxu3 %v2578_v18  ;;  %v406_v25 = vadd.f32 %v2727_v8, %v395_v34 }
  0x6a   : > { %1791 = vmatpush.bf16.msra.mxu1 %v2594_v46 }
  0x6b   : > { %v414_v14 = vmax.f32 %v406_v25, 0.0 }
  0x6d   : > { %1290 = vmatmul.bf16.gmra.mxu1 %v1088_v45  ;;  %423 = vst [vmem:[#allocation2 + $0x81] sm:$0xff] %v414_v14  ;;  %v1710_v27 = vpack.c.bf16 %v414_v14, %v2946_v56  ;;  %v1579_v56 = vpack.c.bf16 %v454_v10, %v453_v33 }
  0x6f   : > { %1051 = vmatmul.bf16.gmra.mxu3 %v958_v4  ;;  %1176 = vmatmul.bf16.gmra.mxu0 %v3077_v59  ;;  %v2587_v59 = vld [vmem:[%s3359_s3 + $0x1c8] sm:$0xff]  ;;  %v2046_v4 = vld [vmem:[%s2717_s18 + $0x110] sm:$0xff]  ;;  %s2521_s18 = sshll.u32 %s3365_s25, 6 }
  0x70   : > { %1660 = vmatpush.bf16.msra.mxu0 %v2587_v59  ;;  %s3286_s16 = scalar_lea.vmem %s3362_s6, %s2521_s18 }
  0x73   : > { %921 = vmatmul.bf16.gmra.mxu2 %v828_v39  ;;  %v440_v39 = vmul.f32 %v2722_v7, %v2046_v4  ;;  %v1578_v7 = vpack.c.bf16 %v452_v32, %v451_v26 }
  0x74   : > { %1661 = vmatpush.bf16.msra.mxu0 %v2586_v35  ;;  %v1446_v32 = vld [vmem:[#allocation2 + $0x80] sm:$0xff] }
  0x75   : > { %v448_v41 = vadd.f32 %v2727_v8, %v440_v39  ;;  %v1319_v8 = vpack.c.bf16 %v496_v3, %v495_v1  ;;  %v1450_v21 = vpack.c.bf16 %v1446_v32, %v3004_v42  ;;  %v1320_v42 = vpack.c.bf16 %v498_v37, %v497_v36 }
  0x77   : > { %v456_v31 = vmax.f32 %v448_v41, 0.0 }
  0x79   : > { %v1580_v6 = vpack.c.bf16 %v456_v31, %v455_v11 }
  0x7d   : > { %1295 = vmatmul.bf16.gmra.mxu1 %v1089_v16 }
  0x7f   : > { %1056 = vmatmul.bf16.gmra.mxu3 %v959_v40  ;;  %1181 = vmatmul.bf16.gmra.mxu0 %v1088_v45  ;;  %v1708_v45 = vpack.c.bf16 %v1702_v61, %v2979_v19 }
  0x83   : > { %926 = vmatmul.bf16.gmra.mxu2 %v829_v47 }
  0x8d   : > { %1792 = vmatmul.bf16.vlgmr.msra.gmra.mxu1 %v1707_v51 }
  0x8f   : > { %1532 = vmatmul.bf16.vlgmr.msra.gmra.mxu3 %v1447_v60  ;;  %1186 = vmatmul.bf16.gmra.mxu0 %v1089_v16 }
  0x93   : > { %1402 = vmatmul.bf16.vlgmr.msra.gmra.mxu2 %v1317_v15 }
  0x9d   : > { %1797 = vmatmul.bf16.gmra.mxu1 %v1708_v45 }
  0x9f   : > { %1537 = vmatmul.bf16.gmra.mxu3 %v1448_v9  ;;  %1662 = vmatmul.bf16.vlgmr.msra.gmra.mxu0 %v1577_v49 }
  0xa3   : > { %1407 = vmatmul.bf16.gmra.mxu2 %v1318_v52 }
  0xaa   : > { %v3208_v50 = vpop.f32.mrf.mxu1 }
  0xad   : > { %1802 = vmatmul.bf16.gmra.mxu1 %v1709_v20 }
  0xae   : > { %v661_v43 = vpop.f32.mrf.mxu2 }
  0xaf   : > { %v792_v44 = vpop.f32.mrf.mxu3  ;;  %1542 = vmatmul.bf16.gmra.mxu3 %v1449_v62  ;;  %1667 = vmatmul.bf16.gmra.mxu0 %v1578_v7 }
  0xb0   : > { %v3222_v19 = vadd.f32 %v792_v44, %v661_v43 }
  0xb2   : > { %v784_v22 = vpop.f32.mrf.mxu1 }
  0xb3   : > { %1412 = vmatmul.bf16.gmra.mxu2 %v1319_v8 }
  0xb6   : > { %v663_v5 = vpop.f32.mrf.mxu2 }
  0xb7   : > { %v794_v24 = vpop.f32.mrf.mxu3 }
  0xb8   : > { %v3241_v30 = vadd.f32 %v794_v24, %v663_v5 }
  0xba   : > { %v787_v38 = vpop.f32.mrf.mxu1 }
  0xbc   : > { %v651_v55 = vpop.f32.mrf.mxu0 }
  0xbd   : > { %1807 = vmatmul.bf16.gmra.mxu1 %v1710_v27  ;;  %v802_v2 = vadd.f32 %v3208_v50, %v651_v55 }
  0xbf   : > { %v797_v54 = vpop.f32.mrf.mxu3  ;;  %1547 = vmatmul.bf16.gmra.mxu3 %v1450_v21  ;;  %1672 = vmatmul.bf16.gmra.mxu0 %v1579_v56 }
  0xc2   : > { %v789_v26 = vpop.f32.mrf.mxu1 }
  0xc3   : > { %1417 = vmatmul.bf16.gmra.mxu2 %v1320_v42 }
  0xc4   : > { %v653_v33 = vpop.f32.mrf.mxu0 }
  0xc5   : > { %v803_v63 = vadd.f32 %v784_v22, %v653_v33 }
  0xc6   : > { %v666_v10 = vpop.f32.mrf.mxu2 }
  0xc7   : > { %v799_v28 = vpop.f32.mrf.mxu3  ;;  %v3294_v3 = vadd.f32 %v797_v54, %v666_v10 }
  0xca   : > { %v1281_v1 = vpop.f32.mrf.mxu1 }
  0xcb   : > { %1301 = vst [vmem:[%s3286_s16] sm:$0xff] %v1281_v1 }
  0xcc   : > { %v656_v16 = vpop.f32.mrf.mxu0 }
  0xcd   : > { %v804_v13 = vadd.f32 %v787_v38, %v656_v16 }
  0xce   : > { %v668_v36 = vpop.f32.mrf.mxu2 }
  0xcf   : > { %v3299_v17 = vadd.f32 %v799_v28, %v668_v36  ;;  %1677 = vmatmul.bf16.gmra.mxu0 %v1580_v6 }
  0xd2   : > { %v1283_v15 = vpop.f32.mrf.mxu1  ;;  %v1042_v37 = vpop.f32.mrf.mxu3 }
  0xd3   : > { %1302 = vst [vmem:[%s3286_s16 + $0x8] sm:$0xff] %v1283_v15 }
  0xd4   : > { %v658_v59 = vpop.f32.mrf.mxu0 }
  0xd5   : > { %v805_v12 = vadd.f32 %v789_v26, %v658_v59 }
  0xd6   : > { %v912_v23 = vpop.f32.mrf.mxu2 }
  0xd7   : > { %v932_v53 = vadd.f32 %v912_v23, %v802_v2 }
  0xd9   : > { %v1062_v5 = vadd.f32 %v1042_v37, %v932_v53 }
  0xda   : > { %v1286_v18 = vpop.f32.mrf.mxu1  ;;  %v1044_v29 = vpop.f32.mrf.mxu3 }
  0xdb   : > { %1303 = vst [vmem:[%s3286_s16 + $0x10] sm:$0xff] %v1286_v18 }
  0xdc   : > { %v1172_v0 = vpop.f32.mrf.mxu0 }
  0xdd   : > { %v1192_v7 = vadd.f32 %v1172_v0, %v1062_v5 }
  0xde   : > { %v914_v11 = vpop.f32.mrf.mxu2 }
  0xdf   : > { %v933_v39 = vadd.f32 %v914_v11, %v803_v63 }
  0xe1   : > { %v1063_v27 = vadd.f32 %v1044_v29, %v933_v39 }
  0xe2   : > { %v1288_v35 = vpop.f32.mrf.mxu1  ;;  %v1047_v40 = vpop.f32.mrf.mxu3 }
  0xe3   : > { %1304 = vst [vmem:[%s3286_s16 + $0x18] sm:$0xff] %v1288_v35 }
  0xe4   : > { %v1174_v47 = vpop.f32.mrf.mxu0 }
  0xe5   : > { %v1193_v56 = vadd.f32 %v1174_v47, %v1063_v27 }
  0xe6   : > { %v917_v51 = vpop.f32.mrf.mxu2 }
  0xe7   : > { %v934_v26 = vadd.f32 %v917_v51, %v804_v13 }
  0xe9   : > { %v1064_v33 = vadd.f32 %v1047_v40, %v934_v26 }
  0xea   : > { %v1291_v46 = vpop.f32.mrf.mxu1  ;;  %v1049_v52 = vpop.f32.mrf.mxu3 }
  0xeb   : > { %1305 = vst [vmem:[%s3286_s16 + $0x20] sm:$0xff] %v1291_v46 }
  0xec   : > { %v1177_v61 = vpop.f32.mrf.mxu0 }
  0xed   : > { %v1194_v16 = vadd.f32 %v1177_v61, %v1064_v33 }
  0xee   : > { %v919_v45 = vpop.f32.mrf.mxu2 }
  0xef   : > { %v935_v10 = vadd.f32 %v919_v45, %v805_v12 }
  0xf1   : > { %v1065_v13 = vadd.f32 %v1049_v52, %v935_v10 }
  0xf2   : > { %v1293_v60 = vpop.f32.mrf.mxu1  ;;  %v3305_v48 = vpop.f32.mrf.mxu3 }
  0xf3   : > { %1306 = vst [vmem:[%s3286_s16 + $0x28] sm:$0xff] %v1293_v60 }
  0xf4   : > { %v1179_v49 = vpop.f32.mrf.mxu0 }
  0xf5   : > { %v1195_v12 = vadd.f32 %v1179_v49, %v1065_v13 }
  0xf6   : > { %v922_v50 = vpop.f32.mrf.mxu2 }
  0xf7   : > { %v936_v46 = vadd.f32 %v922_v50, %v3222_v19 }
  0xfa   : > { %v1296_v9 = vpop.f32.mrf.mxu1  ;;  %v3308_v57 = vpop.f32.mrf.mxu3 }
  0xfb   : > { %1307 = vst [vmem:[%s3286_s16 + $0x30] sm:$0xff] %v1296_v9 }
  0xfc   : > { %v3311_v58 = vpop.f32.mrf.mxu0 }
  0xfe   : > { %v924_v43 = vpop.f32.mrf.mxu2 }
  0xff   : > { %v937_v39 = vadd.f32 %v924_v43, %v3241_v30 }
 0x102   : > { %v1298_v34 = vpop.f32.mrf.mxu1  ;;  %v3313_v44 = vpop.f32.mrf.mxu3 }
 0x103   : > { %1308 = vst [vmem:[%s3286_s16 + $0x38] sm:$0xff] %v1298_v34  ;;  %v1066_v34 = vadd.f32 %v3305_v48, %v936_v46 }
 0x104   : > { %v3315_v20 = vpop.f32.mrf.mxu0 }
 0x105   : > { %v1196_v19 = vadd.f32 %v3311_v58, %v1066_v34 }
 0x106   : > { %v3317_v25 = vpop.f32.mrf.mxu2 }
 0x10a   : > { %v3319_v14 = vpop.f32.mrf.mxu3  ;;  %v1793_v24 = vpop.f32.mrf.mxu1 }
 0x10c   : > { %v3321_v22 = vpop.f32.mrf.mxu0 }
 0x10e   : > { %v3323_v62 = vpop.f32.mrf.mxu2 }
 0x112   : > { %v1533_v4 = vpop.f32.mrf.mxu3  ;;  %v1795_v21 = vpop.f32.mrf.mxu1 }
 0x114   : > { %v3325_v41 = vpop.f32.mrf.mxu0 }
 0x116   : > { %v1403_v31 = vpop.f32.mrf.mxu2 }
 0x117   : > { %v1423_v8 = vadd.f32 %v1403_v31, %v1192_v7 }
 0x119   : > { %v1553_v32 = vadd.f32 %v1533_v4, %v1423_v8  ;;  %v1067_v8 = vadd.f32 %v3308_v57, %v937_v39 }
 0x11a   : > { %v1535_v38 = vpop.f32.mrf.mxu3  ;;  %v1798_v6 = vpop.f32.mrf.mxu1 }
 0x11b   : > { %v1197_v43 = vadd.f32 %v3315_v20, %v1067_v8 }
 0x11c   : > { %v1663_v54 = vpop.f32.mrf.mxu0 }
 0x11d   : > { %v1683_v55 = vadd.f32 %v1663_v54, %v1553_v32  ;;  %v938_v54 = vadd.f32 %v3317_v25, %v3294_v3  ;;  %v939_v3 = vadd.f32 %v3323_v62, %v3299_v17 }
 0x11e   : > { %v1405_v2 = vpop.f32.mrf.mxu2 }
 0x11f   : > { %v1424_v42 = vadd.f32 %v1405_v2, %v1193_v56  ;;  %v1813_v28 = vadd.f32 %v1793_v24, %v1683_v55  ;;  %v1068_v57 = vadd.f32 %v3313_v44, %v938_v54  ;;  %v1069_v44 = vadd.f32 %v3319_v14, %v939_v3 }
 0x121   : > { %2511 = vst [vmem:[%s3216_s13 + $0x11] sm:$0xff] %v1813_v28  ;;  %v1554_v63 = vadd.f32 %v1535_v38, %v1424_v42  ;;  %v1851_v29 = vmul.f32 %v1813_v28, %v1813_v28  ;;  %v1198_v20 = vadd.f32 %v3321_v22, %v1068_v57  ;;  %v1199_v17 = vadd.f32 %v3325_v41, %v1069_v44 }
 0x122   : > { %v1538_v1 = vpop.f32.mrf.mxu3  ;;  %v1800_v61 = vpop.f32.mrf.mxu1 }
 0x124   : > { %v1665_v15 = vpop.f32.mrf.mxu0 }
 0x125   : > { %v1684_v36 = vadd.f32 %v1665_v15, %v1554_v63 }
 0x126   : > { %v1408_v37 = vpop.f32.mrf.mxu2 }
 0x127   : > { %v1425_v18 = vadd.f32 %v1408_v37, %v1194_v16  ;;  %v1814_v59 = vadd.f32 %v1795_v21, %v1684_v36 }
 0x129   : > { %v1837_v35 = vadd.f32 %v1814_v59, %v1813_v28  ;;  %v1852_v0 = vmul.f32 %v1814_v59, %v1814_v59  ;;  %2512 = vst [vmem:[%s3216_s13 + $0x21] sm:$0xff] %v1814_v59  ;;  %v1555_v11 = vadd.f32 %v1538_v1, %v1425_v18 }
 0x12a   : > { %v1540_v23 = vpop.f32.mrf.mxu3  ;;  %v1803_v27 = vpop.f32.mrf.mxu1 }
 0x12b   : > { %v1859_v40 = vadd.f32 %v1852_v0, %v1851_v29 }
 0x12c   : > { %v1668_v47 = vpop.f32.mrf.mxu0 }
 0x12d   : > { %v1685_v51 = vadd.f32 %v1668_v47, %v1555_v11 }
 0x12e   : > { %v1410_v60 = vpop.f32.mrf.mxu2 }
 0x12f   : > { %v1426_v45 = vadd.f32 %v1410_v60, %v1195_v12  ;;  %v1815_v9 = vadd.f32 %v1798_v6, %v1685_v51 }
 0x131   : > { %v1838_v52 = vadd.f32 %v1837_v35, %v1815_v9  ;;  %v1853_v53 = vmul.f32 %v1815_v9, %v1815_v9  ;;  %2513 = vst [vmem:[%s3216_s13 + $0x31] sm:$0xff] %v1815_v9  ;;  %v1556_v4 = vadd.f32 %v1540_v23, %v1426_v45 }
 0x132   : > { %v1543_v5 = vpop.f32.mrf.mxu3  ;;  %v1805_v63 = vpop.f32.mrf.mxu1 }
 0x133   : > { %v1860_v24 = vadd.f32 %v1859_v40, %v1853_v53 }
 0x134   : > { %v1670_v7 = vpop.f32.mrf.mxu0 }
 0x135   : > { %v1686_v49 = vadd.f32 %v1670_v7, %v1556_v4 }
 0x136   : > { %v1413_v50 = vpop.f32.mrf.mxu2 }
 0x137   : > { %v1427_v31 = vadd.f32 %v1413_v50, %v1196_v19  ;;  %v1816_v38 = vadd.f32 %v1800_v61, %v1686_v49 }
 0x139   : > { %v1839_v48 = vadd.f32 %v1838_v52, %v1816_v38  ;;  %v1854_v32 = vmul.f32 %v1816_v38, %v1816_v38  ;;  %2514 = vst [vmem:[%s3216_s13 + $0x41] sm:$0xff] %v1816_v38  ;;  %v1557_v21 = vadd.f32 %v1543_v5, %v1427_v31 }
 0x13a   : > { %v1545_v58 = vpop.f32.mrf.mxu3  ;;  %v1808_v35 = vpop.f32.mrf.mxu1 }
 0x13b   : > { %v1861_v26 = vadd.f32 %v1860_v24, %v1854_v32 }
 0x13c   : > { %v1673_v30 = vpop.f32.mrf.mxu0 }
 0x13d   : > { %v1687_v56 = vadd.f32 %v1673_v30, %v1557_v21 }
 0x13e   : > { %v1415_v55 = vpop.f32.mrf.mxu2 }
 0x13f   : > { %v1428_v2 = vadd.f32 %v1415_v55, %v1197_v43  ;;  %v1817_v42 = vadd.f32 %v1803_v27, %v1687_v56 }
 0x141   : > { %v1840_v1 = vadd.f32 %v1839_v48, %v1817_v42  ;;  %v1855_v28 = vmul.f32 %v1817_v42, %v1817_v42  ;;  %2515 = vst [vmem:[%s3216_s13 + $0x51] sm:$0xff] %v1817_v42  ;;  %v1558_v33 = vadd.f32 %v1545_v58, %v1428_v2 }
 0x142   : > { %v1548_v36 = vpop.f32.mrf.mxu3  ;;  %v1810_v61 = vpop.f32.mrf.mxu1 }
 0x143   : > { %v1862_v10 = vadd.f32 %v1861_v26, %v1855_v28 }
 0x144   : > { %v1675_v25 = vpop.f32.mrf.mxu0 }
 0x145   : > { %v1688_v15 = vadd.f32 %v1675_v25, %v1558_v33 }
 0x146   : > { %v1418_v6 = vpop.f32.mrf.mxu2 }
 0x147   : > { %v1429_v16 = vadd.f32 %v1418_v6, %v1198_v20  ;;  %v1818_v37 = vadd.f32 %v1805_v63, %v1688_v15 }
 0x149   : > { %v1841_v18 = vadd.f32 %v1840_v1, %v1818_v37  ;;  %v1856_v59 = vmul.f32 %v1818_v37, %v1818_v37  ;;  %2516 = vst [vmem:[%s3216_s13 + $0x61] sm:$0xff] %v1818_v37  ;;  %v1559_v13 = vadd.f32 %v1548_v36, %v1429_v16 }
 0x14a   : > { %v1550_v40 = vpop.f32.mrf.mxu3 }
 0x14b   : > { %v1863_v23 = vadd.f32 %v1862_v10, %v1856_v59 }
 0x14c   : > { %v1678_v29 = vpop.f32.mrf.mxu0 }
 0x14d   : > { %v1689_v62 = vadd.f32 %v1678_v29, %v1559_v13 }
 0x14e   : > { %v1420_v22 = vpop.f32.mrf.mxu2 }
 0x14f   : > { %v1430_v0 = vadd.f32 %v1420_v22, %v1199_v17  ;;  %v1819_v11 = vadd.f32 %v1808_v35, %v1689_v62 }
 0x151   : > { %v1842_v46 = vadd.f32 %v1841_v18, %v1819_v11  ;;  %v1857_v47 = vmul.f32 %v1819_v11, %v1819_v11  ;;  %2517 = vst [vmem:[%s3216_s13 + $0x71] sm:$0xff] %v1819_v11  ;;  %v1560_v14 = vadd.f32 %v1550_v40, %v1430_v0 }
 0x153   : > { %v1864_v12 = vadd.f32 %v1863_v23, %v1857_v47 }
 0x154   : > { %v1680_v51 = vpop.f32.mrf.mxu0 }
 0x155   : > { %v1690_v60 = vadd.f32 %v1680_v51, %v1560_v14 }
 0x157   : > { %v1820_v45 = vadd.f32 %v1810_v61, %v1690_v60 }
 0x159   : > { %v1843_v9 = vadd.f32 %v1842_v46, %v1820_v45  ;;  %v1858_v34 = vmul.f32 %v1820_v45, %v1820_v45  ;;  %2518 = vst [vmem:[%s3216_s13 + $0x81] sm:$0xff] %v1820_v45 }
 0x15b   : > { %v1844_v41 = vrot.slane %v1843_v9, 4  ;;  %v1865_v52 = vadd.f32 %v1864_v12, %v1858_v34 }
 0x15d   : > { %v1845_v53 = vadd.f32 %v1844_v41, %v1843_v9  ;;  %v1866_v4 = vrot.slane %v1865_v52, 4 }
 0x15f   : > { %v1846_v5 = vrot.slane %v1845_v53, 2  ;;  %v1867_v24 = vadd.f32 %v1866_v4, %v1865_v52 }
 0x161   : > { %v1847_v39 = vadd.f32 %v1846_v5, %v1845_v53  ;;  %v1868_v7 = vrot.slane %v1867_v24, 2 }
 0x163   : > { %v1848_v19 = vrot.slane %v1847_v39, 1  ;;  %v1869_v49 = vadd.f32 %v1868_v7, %v1867_v24 }
 0x165   : > { %v1849_v50 = vadd.f32 %v1848_v19, %v1847_v39  ;;  %v1870_v31 = vrot.slane %v1869_v49, 1 }
 0x167   : > { %1850 = vst [vmem:[%s301_s21] sm:$0x1] %v1849_v50  ;;  %v1871_v38 = vadd.f32 %v1870_v31, %v1869_v49 }
 0x169   : > { %1872 = vst [vmem:[%s301_s21 + $0x1] sm:$0x1] %v1871_v38 }
 0x16a PF: > { %s18_s24 = sadd.s32 1, %s2637_s24  }
 0x16b   : > { %p15_p4 = scmp.ge.s32.totalorder %s18_s24, 4  }
 0x16d   :  { %17 = sbr.rel (!%p15_p4) target bundleno = 1 (0x1), region = 112 }

</bundles_post_ra>
